<compile_context>
chip_gen: v5e
topology: v5e:2x2
jax: 0.10.0
libtpu: 0.0.40
codegen_flags: <defaults>
</compile_context>

<pallas_src>
import math
from functools import partial

import jax
import jax.numpy as jnp
from jax import lax
from jax.experimental import pallas as pl
from jax.experimental.pallas import tpu as pltpu

NEG_INF = -1e10
LN_EPS = 1e-5
VMEM_LIMIT = 32 * 1024 * 1024


def _round_up(x, m):
    return ((x + m - 1) // m) * m


# --------------------------- in-kernel helpers ------------------------------

def _dense(x, w, b):
    # x: (S, K) f32, w: (K, N) bf16, b: (1, N) f32 -> (S, N) f32
    return jnp.dot(x.astype(jnp.bfloat16), w,
                   preferred_element_type=jnp.float32) + b


def _layer_norm(x, g, b, eps=LN_EPS):
    mean = jnp.mean(x, axis=-1, keepdims=True)
    c = x - mean
    var = jnp.mean(c * c, axis=-1, keepdims=True)
    return c * lax.rsqrt(var + eps) * g + b


def _mha(xq, xkv, mask, wq, bq, wk, bk, wv, bv, wo, bo, n_heads):
    """Multi-head attention with head-major weights.

    xq: (Sq, D) f32, xkv: (Sk, D) f32, mask: (Sq, Sk) bool (True = attend).
    wq/wk/wv: (H, D, dh) bf16 (wq already folds 1/sqrt(dh)), bq/bk/bv: (H,1,dh) f32.
    wo: (H, dh, D) bf16, bo: (1, D) f32.
    Heads index weights on the leading dim (no lane slicing of activations);
    the head merge + output projection is folded into per-head accumulation.
    """
    sq = xq.shape[0]
    d_model = wo.shape[-1]
    xq_b = xq.astype(jnp.bfloat16)
    xkv_b = xkv.astype(jnp.bfloat16)
    acc = jnp.broadcast_to(bo, (sq, d_model))
    attns = []
    for h in range(n_heads):
        q = jnp.dot(xq_b, wq[h], preferred_element_type=jnp.float32) + bq[h]
        k = jnp.dot(xkv_b, wk[h], preferred_element_type=jnp.float32) + bk[h]
        v = jnp.dot(xkv_b, wv[h], preferred_element_type=jnp.float32) + bv[h]
        e = lax.dot_general(q.astype(jnp.bfloat16), k.astype(jnp.bfloat16),
                            (((1,), (1,)), ((), ())),
                            preferred_element_type=jnp.float32)       # (Sq, Sk)
        e = jnp.where(mask, e, NEG_INF)
        m = jnp.max(e, axis=-1, keepdims=True)
        p = jnp.exp(e - m)
        attn = p / jnp.sum(p, axis=-1, keepdims=True)   # exact softmax (parity)
        ctx = jnp.dot(attn.astype(jnp.bfloat16), v.astype(jnp.bfloat16),
                      preferred_element_type=jnp.float32)             # (Sq, dh)
        acc = acc + jnp.dot(ctx.astype(jnp.bfloat16), wo[h],
                            preferred_element_type=jnp.float32)
        attns.append(attn)
    return acc, attns


# ------------------------------ fused kernels -------------------------------

def _encoder_stack_kernel(x_ref, keep_ref,
                          w_qkv_ref, b_qkv_ref, wo_ref, bo_ref,
                          g1_ref, be1_ref,
                          w1_ref, fb1_ref, w2_ref, fb2_ref,
                          g2_ref, be2_ref,
                          o_ref, *, n_heads):
    l = pl.program_id(1)
    H = n_heads

    @pl.when(l == 0)
    def _():                                  # seed the resident activation
        o_ref[...] = x_ref[...]

    s = o_ref.shape[0]
    x = o_ref[...]                            # (S, D) f32, lives across layers
    keep = keep_ref[...] > 0.5                # (1, S) bool over KEY positions
    mask = jnp.broadcast_to(keep, (s, s))     # built in-kernel, O(B*S) HBM only

    w_qkv, b_qkv = w_qkv_ref[...], b_qkv_ref[...]
    sa, _ = _mha(x, x, mask,
                 w_qkv[0:H], b_qkv[0:H],
                 w_qkv[H:2 * H], b_qkv[H:2 * H],
                 w_qkv[2 * H:3 * H], b_qkv[2 * H:3 * H],
                 wo_ref[...], bo_ref[...], H)
    x = _layer_norm(x + sa, g1_ref[...], be1_ref[...])
    hmid = jnp.maximum(_dense(x, w1_ref[...], fb1_ref[...]), 0.0)
    x = _layer_norm(x + _dense(hmid, w2_ref[...], fb2_ref[...]),
                    g2_ref[...], be2_ref[...])
    o_ref[...] = x


def _decoder_stack_kernel(y_ref, enc_ref, tkeep_ref, skeep_ref,
                          sa_wqkv_ref, sa_bqkv_ref, sa_wo_ref, sa_bo_ref,
                          g1_ref, be1_ref,
                          ca_wq_ref, ca_bq_ref, ca_wkv_ref, ca_bkv_ref,
                          ca_wo_ref, ca_bo_ref,
                          g2_ref, be2_ref,
                          w1_ref, fb1_ref, w2_ref, fb2_ref,
                          g3_ref, be3_ref,
                          o_ref, attn_ref, *, n_heads):
    l = pl.program_id(1)
    last = pl.num_programs(1) - 1
    H = n_heads

    @pl.when(l == 0)
    def _():
        o_ref[...] = y_ref[...]

    st = o_ref.shape[0]
    ss = enc_ref.shape[0]
    x = o_ref[...]                            # (St, D) f32, resident
    enc = enc_ref[...]                        # (Ss, D) f32, resident per batch

    # masks rebuilt in-kernel from 1-D keep vectors
    tkeep = tkeep_ref[...] > 0.5              # (1, St): target KEY not pad
    rows = lax.broadcasted_iota(jnp.int32, (st, st), 0)
    cols = lax.broadcasted_iota(jnp.int32, (st, st), 1)
    tmask = jnp.broadcast_to(tkeep, (st, st)) & (cols <= rows)   # pad & causal
    smask = jnp.broadcast_to(skeep_ref[...] > 0.5, (st, ss))     # source pad

    # masked multi-head self-attention + add & norm
    sa_wqkv, sa_bqkv = sa_wqkv_ref[...], sa_bqkv_ref[...]
    sa, _ = _mha(x, x, tmask,
                 sa_wqkv[0:H], sa_bqkv[0:H],
                 sa_wqkv[H:2 * H], sa_bqkv[H:2 * H],
                 sa_wqkv[2 * H:3 * H], sa_bqkv[2 * H:3 * H],
                 sa_wo_ref[...], sa_bo_ref[...], H)
    x = _layer_norm(x + sa, g1_ref[...], be1_ref[...])

    # cross-attention over encoder output + add & norm
    ca_wkv, ca_bkv = ca_wkv_ref[...], ca_bkv_ref[...]
    ca, attns = _mha(x, enc, smask,
                     ca_wq_ref[...], ca_bq_ref[...],
                     ca_wkv[0:H], ca_bkv[0:H],
                     ca_wkv[H:2 * H], ca_bkv[H:2 * H],
                     ca_wo_ref[...], ca_bo_ref[...], H)
    x = _layer_norm(x + ca, g2_ref[...], be2_ref[...])

    # position-wise feed-forward + add & norm
    hmid = jnp.maximum(_dense(x, w1_ref[...], fb1_ref[...]), 0.0)
    x = _layer_norm(x + _dense(hmid, w2_ref[...], fb2_ref[...]),
                    g3_ref[...], be3_ref[...])
    o_ref[...] = x

    # lane-dense attention output (key axis zero-padded to a 128 multiple);
    # only the last layer's cross-attention probabilities are emitted.
    @pl.when(l == last)
    def _():
        sp = attn_ref.shape[-1]
        for h in range(H):
            a = attns[h]
            if sp > ss:
                a = jnp.concatenate(
                    [a, jnp.zeros((st, sp - ss), jnp.float32)], axis=-1)
            attn_ref[h, :, :] = a


def _out_proj_kernel(x_ref, w_ref, b_ref, o_ref):
    o_ref[...] = (jnp.dot(x_ref[...], w_ref[...],
                          preferred_element_type=jnp.float32) + b_ref[...])


# ----------------------------- BlockSpec helpers -----------------------------

def _act_spec(shape):
    # per-batch block, constant across the layer axis (stays resident)
    nd = len(shape) - 1
    return pl.BlockSpec((None,) + tuple(shape[1:]),
                        lambda b, l, _nd=nd: (b,) + (0,) * _nd)


def _w_spec(shape):
    # per-layer weight block, streamed (double-buffered) along the layer axis
    nd = len(shape) - 1
    return pl.BlockSpec((None,) + tuple(shape[1:]),
                        lambda b, l, _nd=nd: (l,) + (0,) * _nd)


# ------------------------------ stack wrappers --------------------------------

def encoder_stack(x, src_keep, ep, n_heads):
    B, S, D = x.shape
    L = ep["w_qkv"].shape[0]
    weights = [ep["w_qkv"], ep["b_qkv"], ep["wo"], ep["bo"],
               ep["ln1_g"], ep["ln1_b"],
               ep["ff_w1"], ep["ff_b1"], ep["ff_w2"], ep["ff_b2"],
               ep["ln2_g"], ep["ln2_b"]]
    in_specs = ([_act_spec(x.shape), _act_spec(src_keep.shape)]
                + [_w_spec(w.shape) for w in weights])
    return pl.pallas_call(
        partial(_encoder_stack_kernel, n_heads=n_heads),
        grid=(B, L),
        out_shape=jax.ShapeDtypeStruct((B, S, D), jnp.float32),
        in_specs=in_specs,
        out_specs=pl.BlockSpec((None, S, D), lambda b, l: (b, 0, 0)),
        compiler_params=pltpu.CompilerParams(
            dimension_semantics=("parallel", "arbitrary"),
            vmem_limit_bytes=VMEM_LIMIT),
    )(x, src_keep, *weights)


def decoder_stack(y, enc_src, trg_keep, src_keep, dp, n_heads):
    B, St, D = y.shape
    Ss = enc_src.shape[1]
    L = dp["sa_w_qkv"].shape[0]
    Sp = _round_up(Ss, 128)                       # lane-dense attention output
    weights = [dp["sa_w_qkv"], dp["sa_b_qkv"], dp["sa_wo"], dp["sa_bo"],
               dp["ln1_g"], dp["ln1_b"],
               dp["ca_wq"], dp["ca_bq"], dp["ca_w_kv"], dp["ca_b_kv"],
               dp["ca_wo"], dp["ca_bo"],
               dp["ln2_g"], dp["ln2_b"],
               dp["ff_w1"], dp["ff_b1"], dp["ff_w2"], dp["ff_b2"],
               dp["ln3_g"], dp["ln3_b"]]
    in_specs = ([_act_spec(y.shape), _act_spec(enc_src.shape),
                 _act_spec(trg_keep.shape), _act_spec(src_keep.shape)]
                + [_w_spec(w.shape) for w in weights])
    y_out, attn = pl.pallas_call(
        partial(_decoder_stack_kernel, n_heads=n_heads),
        grid=(B, L),
        out_shape=(jax.ShapeDtypeStruct((B, St, D), jnp.float32),
                   jax.ShapeDtypeStruct((B, n_heads, St, Sp), jnp.float32)),
        in_specs=in_specs,
        out_specs=(pl.BlockSpec((None, St, D), lambda b, l: (b, 0, 0)),
                   pl.BlockSpec((None, n_heads, St, Sp),
                                lambda b, l: (b, 0, 0, 0))),
        compiler_params=pltpu.CompilerParams(
            dimension_semantics=("parallel", "arbitrary"),
            vmem_limit_bytes=VMEM_LIMIT),
    )(y, enc_src, trg_keep, src_keep, *weights)
    return y_out, attn[:, :, :, :Ss]


def output_projection(y, w_pad, b_pad, output_dim):
    # tiled, lane-dense vocab projection: grid over (row blocks, vocab blocks)
    # so the weight streams through VMEM instead of being loaded whole.
    # TODO(synk): also tile the contraction (D) axis for very large hidden dims.
    B, St, D = y.shape
    rows = B * St
    Vp = w_pad.shape[1]                           # already a multiple of 128
    tm = 256 if rows >= 256 else _round_up(rows, 8)
    rows_pad = _round_up(rows, tm)
    tn = 512 if Vp % 512 == 0 else (256 if Vp % 256 == 0 else 128)

    x2d = y.reshape(rows, D).astype(jnp.bfloat16)
    if rows_pad != rows:
        x2d = jnp.concatenate(
            [x2d, jnp.zeros((rows_pad - rows, D), jnp.bfloat16)], axis=0)

    logits = pl.pallas_call(
        _out_proj_kernel,
        grid=(rows_pad // tm, Vp // tn),
        out_shape=jax.ShapeDtypeStruct((rows_pad, Vp), jnp.float32),
        in_specs=[pl.BlockSpec((tm, D), lambda i, j: (i, 0)),
                  pl.BlockSpec((D, tn), lambda i, j: (0, j)),
                  pl.BlockSpec((1, tn), lambda i, j: (0, j))],
        out_specs=pl.BlockSpec((tm, tn), lambda i, j: (i, j)),
        compiler_params=pltpu.CompilerParams(
            dimension_semantics=("parallel", "parallel"),
            vmem_limit_bytes=VMEM_LIMIT),
    )(x2d, w_pad, b_pad)
    return logits[:rows, :output_dim].reshape(B, St, output_dim)


# ------------------------------- Seq2Seq glue --------------------------------

def seq2seq_forward(params, src_ids, trg_ids, *, n_heads, hid_dim, output_dim,
                    src_pad_idx, trg_pad_idx):
    B, Ss = src_ids.shape
    _, St = trg_ids.shape
    scale = math.sqrt(hid_dim)

    # 1-D "keep" vectors (1.0 = real token / 0.0 = pad); the (Sq, Sk) masks are
    # rebuilt in-kernel from these (saves O(B*S^2) HBM traffic).
    src_keep = (src_ids != src_pad_idx).astype(jnp.float32)[:, None, :]  # (B,1,Ss)
    trg_keep = (trg_ids != trg_pad_idx).astype(jnp.float32)[:, None, :]  # (B,1,St)

    # TODO(synk): token/positional embedding gathers + scale/add stay in XLA glue.
    x = (jnp.take(params["enc_tok_emb"], src_ids, axis=0) * scale
         + params["enc_pos_emb"][:Ss][None, :, :])
    enc_src = encoder_stack(x, src_keep, params["encoder"], n_heads)

    y = (jnp.take(params["dec_tok_emb"], trg_ids, axis=0) * scale
         + params["dec_pos_emb"][:St][None, :, :])
    y, attention = decoder_stack(y, enc_src, trg_keep, src_keep,
                                 params["decoder"], n_heads)

    logits = output_projection(y, params["fc_out_w"], params["fc_out_b"],
                               output_dim)
    return logits, attention


# ------------------------------ parameter init -------------------------------

def init_params(key, input_dim, output_dim, hid_dim, n_layers, n_heads,
                pf_dim, max_length):
    D, PF, H, L = hid_dim, pf_dim, n_heads, n_layers
    dh = D // H
    inv_scale = 1.0 / math.sqrt(dh)   # folded into the q projection weights/bias
    keys = iter(jax.random.split(key, 64))

    def nrm(shape, s=0.02):
        return (s * jax.random.normal(next(keys), shape)).astype(jnp.float32)

    ones = lambda s: jnp.ones(s, jnp.float32)
    zeros = lambda s: jnp.zeros(s, jnp.float32)
    bf = lambda x: x.astype(jnp.bfloat16)

    def qkv_w():
        # (L, 3H, D, dh): heads [0,H) = q (pre-scaled by 1/sqrt(dh)),
        # [H,2H) = k, [2H,3H) = v.  Zero biases (would be scaled identically).
        w = nrm((L, 3 * H, D, dh)).at[:, :H].multiply(inv_scale)
        return bf(w), zeros((L, 3 * H, 1, dh))

    enc_w_qkv, enc_b_qkv = qkv_w()
    encoder = {
        "w_qkv": enc_w_qkv, "b_qkv": enc_b_qkv,
        "wo": bf(nrm((L, H, dh, D))), "bo": zeros((L, 1, D)),
        "ln1_g": ones((L, 1, D)), "ln1_b": zeros((L, 1, D)),
        "ff_w1": bf(nrm((L, D, PF))), "ff_b1": zeros((L, 1, PF)),
        "ff_w2": bf(nrm((L, PF, D))), "ff_b2": zeros((L, 1, D)),
        "ln2_g": ones((L, 1, D)), "ln2_b": zeros((L, 1, D)),
    }

    sa_w_qkv, sa_b_qkv = qkv_w()
    decoder = {
        "sa_w_qkv": sa_w_qkv, "sa_b_qkv": sa_b_qkv,
        "sa_wo": bf(nrm((L, H, dh, D))), "sa_bo": zeros((L, 1, D)),
        "ln1_g": ones((L, 1, D)), "ln1_b": zeros((L, 1, D)),
        "ca_wq": bf(nrm((L, H, D, dh)) * inv_scale),
        "ca_bq": zeros((L, H, 1, dh)),
        "ca_w_kv": bf(nrm((L, 2 * H, D, dh))),
        "ca_b_kv": zeros((L, 2 * H, 1, dh)),
        "ca_wo": bf(nrm((L, H, dh, D))), "ca_bo": zeros((L, 1, D)),
        "ln2_g": ones((L, 1, D)), "ln2_b": zeros((L, 1, D)),
        "ff_w1": bf(nrm((L, D, PF))), "ff_b1": zeros((L, 1, PF)),
        "ff_w2": bf(nrm((L, PF, D))), "ff_b2": zeros((L, 1, D)),
        "ln3_g": ones((L, 1, D)), "ln3_b": zeros((L, 1, D)),
    }

    vocab_pad = _round_up(output_dim, 128)
    fc_w = jnp.zeros((D, vocab_pad), jnp.float32).at[:, :output_dim].set(
        nrm((D, output_dim)))

    return {
        "enc_tok_emb": nrm((input_dim, D), 1.0),
        "enc_pos_emb": nrm((max_length, D), 1.0),
        "dec_tok_emb": nrm((output_dim, D), 1.0),
        "dec_pos_emb": nrm((max_length, D), 1.0),
        "encoder": encoder,
        "decoder": decoder,
        "fc_out_w": bf(fc_w),                 # (D, vocab padded to 128 lanes)
        "fc_out_b": zeros((1, vocab_pad)),
    }


# ----------------------------------- main ------------------------------------

if __name__ == "__main__":
    INPUT_DIM = 60        # source vocab
    OUTPUT_DIM = 50       # target vocab
    HID_DIM = 32
    N_LAYERS = 2
    N_HEADS = 4
    PF_DIM = 64
    MAX_LEN = 100
    SRC_PAD_IDX = 0
    TRG_PAD_IDX = 0
    B, SRC_LEN, TRG_LEN = 2, 10, 8

    key = jax.random.PRNGKey(0)
    kp, ks, kt = jax.random.split(key, 3)

    params = init_params(kp, INPUT_DIM, OUTPUT_DIM, HID_DIM, N_LAYERS,
                         N_HEADS, PF_DIM, MAX_LEN)

    src_ids = jax.random.randint(ks, (B, SRC_LEN), 1, INPUT_DIM, dtype=jnp.int32)
    trg_ids = jax.random.randint(kt, (B, TRG_LEN), 1, OUTPUT_DIM, dtype=jnp.int32)

    fwd = jax.jit(partial(seq2seq_forward,
                          n_heads=N_HEADS, hid_dim=HID_DIM,
                          output_dim=OUTPUT_DIM,
                          src_pad_idx=SRC_PAD_IDX, trg_pad_idx=TRG_PAD_IDX))

    out, attention = fwd(params, src_ids, trg_ids)
    jax.block_until_ready(out)
    jax.block_until_ready(attention)

    assert out.shape == (B, TRG_LEN, OUTPUT_DIM)
    assert attention.shape == (B, N_HEADS, TRG_LEN, SRC_LEN)
    assert bool(jnp.isfinite(out).all())
    print("KERNEL_OK")
</pallas_src>

<mosaic_0001>
module attributes {stable_mosaic.version = 11 : i64} {
  func.func @_encoder_stack_kernel(%arg0: i32, %arg1: i32, %arg2: memref<1x10x32xf32, #tpu.memory_space<vmem>>, %arg3: memref<1x1x10xf32, #tpu.memory_space<vmem>>, %arg4: memref<1x12x32x8xbf16, #tpu.memory_space<vmem>>, %arg5: memref<1x12x1x8xf32, #tpu.memory_space<vmem>>, %arg6: memref<1x4x8x32xbf16, #tpu.memory_space<vmem>>, %arg7: memref<1x1x32xf32, #tpu.memory_space<vmem>>, %arg8: memref<1x1x32xf32, #tpu.memory_space<vmem>>, %arg9: memref<1x1x32xf32, #tpu.memory_space<vmem>>, %arg10: memref<1x32x64xbf16, #tpu.memory_space<vmem>>, %arg11: memref<1x1x64xf32, #tpu.memory_space<vmem>>, %arg12: memref<1x64x32xbf16, #tpu.memory_space<vmem>>, %arg13: memref<1x1x32xf32, #tpu.memory_space<vmem>>, %arg14: memref<1x1x32xf32, #tpu.memory_space<vmem>>, %arg15: memref<1x1x32xf32, #tpu.memory_space<vmem>>, %arg16: memref<1x10x32xf32, #tpu.memory_space<vmem>>) attributes {dimension_semantics = [#tpu.dimension_semantics<parallel>, #tpu.dimension_semantics<arbitrary>], iteration_bounds = array<i64: 2, 2>, scalar_prefetch = 0 : i64, scratch_operands = 0 : i64, tpu.core_type = #tpu.core_type<tc>, window_params = [{transform_indices = @transform_0, window_bounds = array<i64: 1, 10, 32>}, {transform_indices = @transform_1, window_bounds = array<i64: 1, 1, 10>}, {transform_indices = @transform_2, window_bounds = array<i64: 1, 12, 32, 8>}, {transform_indices = @transform_3, window_bounds = array<i64: 1, 12, 1, 8>}, {transform_indices = @transform_4, window_bounds = array<i64: 1, 4, 8, 32>}, {transform_indices = @transform_5, window_bounds = array<i64: 1, 1, 32>}, {transform_indices = @transform_6, window_bounds = array<i64: 1, 1, 32>}, {transform_indices = @transform_7, window_bounds = array<i64: 1, 1, 32>}, {transform_indices = @transform_8, window_bounds = array<i64: 1, 32, 64>}, {transform_indices = @transform_9, window_bounds = array<i64: 1, 1, 64>}, {transform_indices = @transform_10, window_bounds = array<i64: 1, 64, 32>}, {transform_indices = @transform_11, window_bounds = array<i64: 1, 1, 32>}, {transform_indices = @transform_12, window_bounds = array<i64: 1, 1, 32>}, {transform_indices = @transform_13, window_bounds = array<i64: 1, 1, 32>}, {transform_indices = @transform_14, window_bounds = array<i64: 1, 10, 32>}]} {
    %c0_i32 = arith.constant 0 : i32
    %0 = arith.cmpi eq, %arg1, %c0_i32 : i32
    %1 = arith.extui %0 : i1 to i32
    %c0_i32_0 = arith.constant 0 : i32
    %2 = arith.cmpi ne, %1, %c0_i32_0 : i32
    scf.if %2 {
      %c0_97 = arith.constant 0 : index
      %c0_98 = arith.constant 0 : index
      %c0_99 = arith.constant 0 : index
      %272 = vector.load %arg2[%c0_97, %c0_98, %c0_99] : memref<1x10x32xf32, #tpu.memory_space<vmem>>, vector<1x10x32xf32>
      %273 = vector.shape_cast %272 : vector<1x10x32xf32> to vector<10x32xf32>
      %c0_100 = arith.constant 0 : index
      %c0_101 = arith.constant 0 : index
      %c0_102 = arith.constant 0 : index
      %274 = vector.load %arg16[%c0_100, %c0_101, %c0_102] : memref<1x10x32xf32, #tpu.memory_space<vmem>>, vector<1x10x32xf32>
      %275 = vector.shape_cast %274 : vector<1x10x32xf32> to vector<10x32xf32>
      %276 = vector.shape_cast %273 : vector<10x32xf32> to vector<1x10x32xf32>
      tpu.vector_store %arg16[%c0_100, %c0_101, %c0_102], %276 {strides = array<i32>} : memref<1x10x32xf32, #tpu.memory_space<vmem>>, vector<1x10x32xf32>,
    } else {
    }
    %c0 = arith.constant 0 : index
    %c0_1 = arith.constant 0 : index
    %c0_2 = arith.constant 0 : index
    %3 = vector.load %arg16[%c0, %c0_1, %c0_2] : memref<1x10x32xf32, #tpu.memory_space<vmem>>, vector<1x10x32xf32>
    %4 = vector.shape_cast %3 : vector<1x10x32xf32> to vector<10x32xf32>
    %c0_3 = arith.constant 0 : index
    %c0_4 = arith.constant 0 : index
    %c0_5 = arith.constant 0 : index
    %5 = vector.load %arg3[%c0_3, %c0_4, %c0_5] : memref<1x1x10xf32, #tpu.memory_space<vmem>>, vector<1x1x10xf32>
    %6 = vector.shape_cast %5 : vector<1x1x10xf32> to vector<1x10xf32>
    %cst = arith.constant 5.000000e-01 : f32
    %7 = vector.broadcast %cst : f32 to vector<1x10xf32>
    %8 = arith.cmpf ogt, %6, %7 : vector<1x10xf32>
    %9 = vector.shape_cast %8 : vector<1x10xi1> to vector<1x10xi1>
    %10 = vector.broadcast %9 : vector<1x10xi1> to vector<10x10xi1>
    %c0_6 = arith.constant 0 : index
    %c0_7 = arith.constant 0 : index
    %c0_8 = arith.constant 0 : index
    %c0_9 = arith.constant 0 : index
    %11 = vector.load %arg4[%c0_6, %c0_7, %c0_8, %c0_9] : memref<1x12x32x8xbf16, #tpu.memory_space<vmem>>, vector<1x12x32x8xbf16>
    %12 = vector.shape_cast %11 : vector<1x12x32x8xbf16> to vector<12x32x8xbf16>
    %c0_10 = arith.constant 0 : index
    %c0_11 = arith.constant 0 : index
    %c0_12 = arith.constant 0 : index
    %c0_13 = arith.constant 0 : index
    %13 = vector.load %arg5[%c0_10, %c0_11, %c0_12, %c0_13] : memref<1x12x1x8xf32, #tpu.memory_space<vmem>>, vector<1x12x1x8xf32>
    %14 = vector.shape_cast %13 : vector<1x12x1x8xf32> to vector<12x1x8xf32>
    %15 = vector.extract_strided_slice %12 {offsets = [0, 0, 0], sizes = [4, 32, 8], strides = [1, 1, 1]} : vector<12x32x8xbf16> to vector<4x32x8xbf16>
    %16 = vector.extract_strided_slice %14 {offsets = [0, 0, 0], sizes = [4, 1, 8], strides = [1, 1, 1]} : vector<12x1x8xf32> to vector<4x1x8xf32>
    %17 = vector.extract_strided_slice %12 {offsets = [4, 0, 0], sizes = [4, 32, 8], strides = [1, 1, 1]} : vector<12x32x8xbf16> to vector<4x32x8xbf16>
    %18 = vector.extract_strided_slice %14 {offsets = [4, 0, 0], sizes = [4, 1, 8], strides = [1, 1, 1]} : vector<12x1x8xf32> to vector<4x1x8xf32>
    %19 = vector.extract_strided_slice %12 {offsets = [8, 0, 0], sizes = [4, 32, 8], strides = [1, 1, 1]} : vector<12x32x8xbf16> to vector<4x32x8xbf16>
    %20 = vector.extract_strided_slice %14 {offsets = [8, 0, 0], sizes = [4, 1, 8], strides = [1, 1, 1]} : vector<12x1x8xf32> to vector<4x1x8xf32>
    %c0_14 = arith.constant 0 : index
    %c0_15 = arith.constant 0 : index
    %c0_16 = arith.constant 0 : index
    %c0_17 = arith.constant 0 : index
    %21 = vector.load %arg6[%c0_14, %c0_15, %c0_16, %c0_17] : memref<1x4x8x32xbf16, #tpu.memory_space<vmem>>, vector<1x4x8x32xbf16>
    %22 = vector.shape_cast %21 : vector<1x4x8x32xbf16> to vector<4x8x32xbf16>
    %c0_18 = arith.constant 0 : index
    %c0_19 = arith.constant 0 : index
    %c0_20 = arith.constant 0 : index
    %23 = vector.load %arg7[%c0_18, %c0_19, %c0_20] : memref<1x1x32xf32, #tpu.memory_space<vmem>>, vector<1x1x32xf32>
    %24 = vector.shape_cast %23 : vector<1x1x32xf32> to vector<1x32xf32>
    %25 = arith.truncf %4 : vector<10x32xf32> to vector<10x32xbf16>
    %26 = arith.truncf %4 : vector<10x32xf32> to vector<10x32xbf16>
    %27 = vector.shape_cast %24 : vector<1x32xf32> to vector<1x32xf32>
    %28 = vector.broadcast %27 : vector<1x32xf32> to vector<10x32xf32>
    %29 = vector.extract_strided_slice %15 {offsets = [0, 0, 0], sizes = [1, 32, 8], strides = [1, 1, 1]} : vector<4x32x8xbf16> to vector<1x32x8xbf16>
    %30 = vector.shape_cast %29 : vector<1x32x8xbf16> to vector<32x8xbf16>
    %cst_21 = arith.constant dense<0.000000e+00> : vector<10x8xf32>
    %31 = tpu.matmul %25, %30, %cst_21 {dimension_numbers = #tpu.dot_dimension_numbers<[1], [0], [0], [1], [0, 0, 1, 1], [], []>} : vector<10x32xbf16>, vector<32x8xbf16>, vector<10x8xf32> -> vector<10x8xf32>
    %32 = vector.extract_strided_slice %16 {offsets = [0, 0, 0], sizes = [1, 1, 8], strides = [1, 1, 1]} : vector<4x1x8xf32> to vector<1x1x8xf32>
    %33 = vector.shape_cast %32 : vector<1x1x8xf32> to vector<1x8xf32>
    %34 = vector.broadcast %33 : vector<1x8xf32> to vector<10x8xf32>
    %35 = arith.addf %31, %34 : vector<10x8xf32>
    %36 = vector.extract_strided_slice %17 {offsets = [0, 0, 0], sizes = [1, 32, 8], strides = [1, 1, 1]} : vector<4x32x8xbf16> to vector<1x32x8xbf16>
    %37 = vector.shape_cast %36 : vector<1x32x8xbf16> to vector<32x8xbf16>
    %cst_22 = arith.constant dense<0.000000e+00> : vector<10x8xf32>
    %38 = tpu.matmul %26, %37, %cst_22 {dimension_numbers = #tpu.dot_dimension_numbers<[1], [0], [0], [1], [0, 0, 1, 1], [], []>} : vector<10x32xbf16>, vector<32x8xbf16>, vector<10x8xf32> -> vector<10x8xf32>
    %39 = vector.extract_strided_slice %18 {offsets = [0, 0, 0], sizes = [1, 1, 8], strides = [1, 1, 1]} : vector<4x1x8xf32> to vector<1x1x8xf32>
    %40 = vector.shape_cast %39 : vector<1x1x8xf32> to vector<1x8xf32>
    %41 = vector.broadcast %40 : vector<1x8xf32> to vector<10x8xf32>
    %42 = arith.addf %38, %41 : vector<10x8xf32>
    %43 = vector.extract_strided_slice %19 {offsets = [0, 0, 0], sizes = [1, 32, 8], strides = [1, 1, 1]} : vector<4x32x8xbf16> to vector<1x32x8xbf16>
    %44 = vector.shape_cast %43 : vector<1x32x8xbf16> to vector<32x8xbf16>
    %cst_23 = arith.constant dense<0.000000e+00> : vector<10x8xf32>
    %45 = tpu.matmul %26, %44, %cst_23 {dimension_numbers = #tpu.dot_dimension_numbers<[1], [0], [0], [1], [0, 0, 1, 1], [], []>} : vector<10x32xbf16>, vector<32x8xbf16>, vector<10x8xf32> -> vector<10x8xf32>
    %46 = vector.extract_strided_slice %20 {offsets = [0, 0, 0], sizes = [1, 1, 8], strides = [1, 1, 1]} : vector<4x1x8xf32> to vector<1x1x8xf32>
    %47 = vector.shape_cast %46 : vector<1x1x8xf32> to vector<1x8xf32>
    %48 = vector.broadcast %47 : vector<1x8xf32> to vector<10x8xf32>
    %49 = arith.addf %45, %48 : vector<10x8xf32>
    %50 = arith.truncf %35 : vector<10x8xf32> to vector<10x8xbf16>
    %51 = arith.truncf %42 : vector<10x8xf32> to vector<10x8xbf16>
    %cst_24 = arith.constant dense<0.000000e+00> : vector<10x10xf32>
    %52 = tpu.matmul %50, %51, %cst_24 {dimension_numbers = #tpu.dot_dimension_numbers<[1], [1], [0], [0], [0, 0, 1, 0], [], []>} : vector<10x8xbf16>, vector<10x8xbf16>, vector<10x10xf32> -> vector<10x10xf32>
    %cst_25 = arith.constant -1.000000e+10 : f32
    %53 = vector.broadcast %cst_25 : f32 to vector<10x10xf32>
    %54 = arith.select %10, %52, %53 : vector<10x10xi1>, vector<10x10xf32>
    %cst_26 = arith.constant dense<0xFF800000> : vector<10xf32>
    %55 = vector.multi_reduction <maximumf>, %54, %cst_26 [1] : vector<10x10xf32> to vector<10xf32>
    %56 = vector.shape_cast %55 : vector<10xf32> to vector<10x1xf32>
    %57 = vector.broadcast %56 : vector<10x1xf32> to vector<10x10xf32>
    %58 = arith.subf %54, %57 : vector<10x10xf32>
    %59 = math.exp %58 : vector<10x10xf32>
    %cst_27 = arith.constant dense<0.000000e+00> : vector<10xf32>
    %60 = vector.multi_reduction <add>, %59, %cst_27 [1] : vector<10x10xf32> to vector<10xf32>
    %61 = vector.shape_cast %60 : vector<10xf32> to vector<10x1xf32>
    %62 = vector.broadcast %61 : vector<10x1xf32> to vector<10x10xf32>
    %63 = arith.divf %59, %62 : vector<10x10xf32>
    %64 = arith.truncf %63 : vector<10x10xf32> to vector<10x10xbf16>
    %65 = arith.truncf %49 : vector<10x8xf32> to vector<10x8xbf16>
    %cst_28 = arith.constant dense<0.000000e+00> : vector<10x8xf32>
    %66 = tpu.matmul %64, %65, %cst_28 {dimension_numbers = #tpu.dot_dimension_numbers<[1], [0], [0], [1], [0, 0, 1, 1], [], []>} : vector<10x10xbf16>, vector<10x8xbf16>, vector<10x8xf32> -> vector<10x8xf32>
    %67 = arith.truncf %66 : vector<10x8xf32> to vector<10x8xbf16>
    %68 = vector.extract_strided_slice %22 {offsets = [0, 0, 0], sizes = [1, 8, 32], strides = [1, 1, 1]} : vector<4x8x32xbf16> to vector<1x8x32xbf16>
    %69 = vector.shape_cast %68 : vector<1x8x32xbf16> to vector<8x32xbf16>
    %cst_29 = arith.constant dense<0.000000e+00> : vector<10x32xf32>
    %70 = tpu.matmul %67, %69, %cst_29 {dimension_numbers = #tpu.dot_dimension_numbers<[1], [0], [0], [1], [0, 0, 1, 1], [], []>} : vector<10x8xbf16>, vector<8x32xbf16>, vector<10x32xf32> -> vector<10x32xf32>
    %71 = arith.addf %28, %70 : vector<10x32xf32>
    %72 = vector.extract_strided_slice %15 {offsets = [1, 0, 0], sizes = [1, 32, 8], strides = [1, 1, 1]} : vector<4x32x8xbf16> to vector<1x32x8xbf16>
    %73 = vector.shape_cast %72 : vector<1x32x8xbf16> to vector<32x8xbf16>
    %cst_30 = arith.constant dense<0.000000e+00> : vector<10x8xf32>
    %74 = tpu.matmul %25, %73, %cst_30 {dimension_numbers = #tpu.dot_dimension_numbers<[1], [0], [0], [1], [0, 0, 1, 1], [], []>} : vector<10x32xbf16>, vector<32x8xbf16>, vector<10x8xf32> -> vector<10x8xf32>
    %75 = vector.extract_strided_slice %16 {offsets = [1, 0, 0], sizes = [1, 1, 8], strides = [1, 1, 1]} : vector<4x1x8xf32> to vector<1x1x8xf32>
    %76 = vector.shape_cast %75 : vector<1x1x8xf32> to vector<1x8xf32>
    %77 = vector.broadcast %76 : vector<1x8xf32> to vector<10x8xf32>
    %78 = arith.addf %74, %77 : vector<10x8xf32>
    %79 = vector.extract_strided_slice %17 {offsets = [1, 0, 0], sizes = [1, 32, 8], strides = [1, 1, 1]} : vector<4x32x8xbf16> to vector<1x32x8xbf16>
    %80 = vector.shape_cast %79 : vector<1x32x8xbf16> to vector<32x8xbf16>
    %cst_31 = arith.constant dense<0.000000e+00> : vector<10x8xf32>
    %81 = tpu.matmul %26, %80, %cst_31 {dimension_numbers = #tpu.dot_dimension_numbers<[1], [0], [0], [1], [0, 0, 1, 1], [], []>} : vector<10x32xbf16>, vector<32x8xbf16>, vector<10x8xf32> -> vector<10x8xf32>
    %82 = vector.extract_strided_slice %18 {offsets = [1, 0, 0], sizes = [1, 1, 8], strides = [1, 1, 1]} : vector<4x1x8xf32> to vector<1x1x8xf32>
    %83 = vector.shape_cast %82 : vector<1x1x8xf32> to vector<1x8xf32>
    %84 = vector.broadcast %83 : vector<1x8xf32> to vector<10x8xf32>
    %85 = arith.addf %81, %84 : vector<10x8xf32>
    %86 = vector.extract_strided_slice %19 {offsets = [1, 0, 0], sizes = [1, 32, 8], strides = [1, 1, 1]} : vector<4x32x8xbf16> to vector<1x32x8xbf16>
    %87 = vector.shape_cast %86 : vector<1x32x8xbf16> to vector<32x8xbf16>
    %cst_32 = arith.constant dense<0.000000e+00> : vector<10x8xf32>
    %88 = tpu.matmul %26, %87, %cst_32 {dimension_numbers = #tpu.dot_dimension_numbers<[1], [0], [0], [1], [0, 0, 1, 1], [], []>} : vector<10x32xbf16>, vector<32x8xbf16>, vector<10x8xf32> -> vector<10x8xf32>
    %89 = vector.extract_strided_slice %20 {offsets = [1, 0, 0], sizes = [1, 1, 8], strides = [1, 1, 1]} : vector<4x1x8xf32> to vector<1x1x8xf32>
    %90 = vector.shape_cast %89 : vector<1x1x8xf32> to vector<1x8xf32>
    %91 = vector.broadcast %90 : vector<1x8xf32> to vector<10x8xf32>
    %92 = arith.addf %88, %91 : vector<10x8xf32>
    %93 = arith.truncf %78 : vector<10x8xf32> to vector<10x8xbf16>
    %94 = arith.truncf %85 : vector<10x8xf32> to vector<10x8xbf16>
    %cst_33 = arith.constant dense<0.000000e+00> : vector<10x10xf32>
    %95 = tpu.matmul %93, %94, %cst_33 {dimension_numbers = #tpu.dot_dimension_numbers<[1], [1], [0], [0], [0, 0, 1, 0], [], []>} : vector<10x8xbf16>, vector<10x8xbf16>, vector<10x10xf32> -> vector<10x10xf32>
    %cst_34 = arith.constant -1.000000e+10 : f32
    %96 = vector.broadcast %cst_34 : f32 to vector<10x10xf32>
    %97 = arith.select %10, %95, %96 : vector<10x10xi1>, vector<10x10xf32>
    %cst_35 = arith.constant dense<0xFF800000> : vector<10xf32>
    %98 = vector.multi_reduction <maximumf>, %97, %cst_35 [1] : vector<10x10xf32> to vector<10xf32>
    %99 = vector.shape_cast %98 : vector<10xf32> to vector<10x1xf32>
    %100 = vector.broadcast %99 : vector<10x1xf32> to vector<10x10xf32>
    %101 = arith.subf %97, %100 : vector<10x10xf32>
    %102 = math.exp %101 : vector<10x10xf32>
    %cst_36 = arith.constant dense<0.000000e+00> : vector<10xf32>
    %103 = vector.multi_reduction <add>, %102, %cst_36 [1] : vector<10x10xf32> to vector<10xf32>
    %104 = vector.shape_cast %103 : vector<10xf32> to vector<10x1xf32>
    %105 = vector.broadcast %104 : vector<10x1xf32> to vector<10x10xf32>
    %106 = arith.divf %102, %105 : vector<10x10xf32>
    %107 = arith.truncf %106 : vector<10x10xf32> to vector<10x10xbf16>
    %108 = arith.truncf %92 : vector<10x8xf32> to vector<10x8xbf16>
    %cst_37 = arith.constant dense<0.000000e+00> : vector<10x8xf32>
    %109 = tpu.matmul %107, %108, %cst_37 {dimension_numbers = #tpu.dot_dimension_numbers<[1], [0], [0], [1], [0, 0, 1, 1], [], []>} : vector<10x10xbf16>, vector<10x8xbf16>, vector<10x8xf32> -> vector<10x8xf32>
    %110 = arith.truncf %109 : vector<10x8xf32> to vector<10x8xbf16>
    %111 = vector.extract_strided_slice %22 {offsets = [1, 0, 0], sizes = [1, 8, 32], strides = [1, 1, 1]} : vector<4x8x32xbf16> to vector<1x8x32xbf16>
    %112 = vector.shape_cast %111 : vector<1x8x32xbf16> to vector<8x32xbf16>
    %cst_38 = arith.constant dense<0.000000e+00> : vector<10x32xf32>
    %113 = tpu.matmul %110, %112, %cst_38 {dimension_numbers = #tpu.dot_dimension_numbers<[1], [0], [0], [1], [0, 0, 1, 1], [], []>} : vector<10x8xbf16>, vector<8x32xbf16>, vector<10x32xf32> -> vector<10x32xf32>
    %114 = arith.addf %71, %113 : vector<10x32xf32>
    %115 = vector.extract_strided_slice %15 {offsets = [2, 0, 0], sizes = [1, 32, 8], strides = [1, 1, 1]} : vector<4x32x8xbf16> to vector<1x32x8xbf16>
    %116 = vector.shape_cast %115 : vector<1x32x8xbf16> to vector<32x8xbf16>
    %cst_39 = arith.constant dense<0.000000e+00> : vector<10x8xf32>
    %117 = tpu.matmul %25, %116, %cst_39 {dimension_numbers = #tpu.dot_dimension_numbers<[1], [0], [0], [1], [0, 0, 1, 1], [], []>} : vector<10x32xbf16>, vector<32x8xbf16>, vector<10x8xf32> -> vector<10x8xf32>
    %118 = vector.extract_strided_slice %16 {offsets = [2, 0, 0], sizes = [1, 1, 8], strides = [1, 1, 1]} : vector<4x1x8xf32> to vector<1x1x8xf32>
    %119 = vector.shape_cast %118 : vector<1x1x8xf32> to vector<1x8xf32>
    %120 = vector.broadcast %119 : vector<1x8xf32> to vector<10x8xf32>
    %121 = arith.addf %117, %120 : vector<10x8xf32>
    %122 = vector.extract_strided_slice %17 {offsets = [2, 0, 0], sizes = [1, 32, 8], strides = [1, 1, 1]} : vector<4x32x8xbf16> to vector<1x32x8xbf16>
    %123 = vector.shape_cast %122 : vector<1x32x8xbf16> to vector<32x8xbf16>
    %cst_40 = arith.constant dense<0.000000e+00> : vector<10x8xf32>
    %124 = tpu.matmul %26, %123, %cst_40 {dimension_numbers = #tpu.dot_dimension_numbers<[1], [0], [0], [1], [0, 0, 1, 1], [], []>} : vector<10x32xbf16>, vector<32x8xbf16>, vector<10x8xf32> -> vector<10x8xf32>
    %125 = vector.extract_strided_slice %18 {offsets = [2, 0, 0], sizes = [1, 1, 8], strides = [1, 1, 1]} : vector<4x1x8xf32> to vector<1x1x8xf32>
    %126 = vector.shape_cast %125 : vector<1x1x8xf32> to vector<1x8xf32>
    %127 = vector.broadcast %126 : vector<1x8xf32> to vector<10x8xf32>
    %128 = arith.addf %124, %127 : vector<10x8xf32>
    %129 = vector.extract_strided_slice %19 {offsets = [2, 0, 0], sizes = [1, 32, 8], strides = [1, 1, 1]} : vector<4x32x8xbf16> to vector<1x32x8xbf16>
    %130 = vector.shape_cast %129 : vector<1x32x8xbf16> to vector<32x8xbf16>
    %cst_41 = arith.constant dense<0.000000e+00> : vector<10x8xf32>
    %131 = tpu.matmul %26, %130, %cst_41 {dimension_numbers = #tpu.dot_dimension_numbers<[1], [0], [0], [1], [0, 0, 1, 1], [], []>} : vector<10x32xbf16>, vector<32x8xbf16>, vector<10x8xf32> -> vector<10x8xf32>
    %132 = vector.extract_strided_slice %20 {offsets = [2, 0, 0], sizes = [1, 1, 8], strides = [1, 1, 1]} : vector<4x1x8xf32> to vector<1x1x8xf32>
    %133 = vector.shape_cast %132 : vector<1x1x8xf32> to vector<1x8xf32>
    %134 = vector.broadcast %133 : vector<1x8xf32> to vector<10x8xf32>
    %135 = arith.addf %131, %134 : vector<10x8xf32>
    %136 = arith.truncf %121 : vector<10x8xf32> to vector<10x8xbf16>
    %137 = arith.truncf %128 : vector<10x8xf32> to vector<10x8xbf16>
    %cst_42 = arith.constant dense<0.000000e+00> : vector<10x10xf32>
    %138 = tpu.matmul %136, %137, %cst_42 {dimension_numbers = #tpu.dot_dimension_numbers<[1], [1], [0], [0], [0, 0, 1, 0], [], []>} : vector<10x8xbf16>, vector<10x8xbf16>, vector<10x10xf32> -> vector<10x10xf32>
    %cst_43 = arith.constant -1.000000e+10 : f32
    %139 = vector.broadcast %cst_43 : f32 to vector<10x10xf32>
    %140 = arith.select %10, %138, %139 : vector<10x10xi1>, vector<10x10xf32>
    %cst_44 = arith.constant dense<0xFF800000> : vector<10xf32>
    %141 = vector.multi_reduction <maximumf>, %140, %cst_44 [1] : vector<10x10xf32> to vector<10xf32>
    %142 = vector.shape_cast %141 : vector<10xf32> to vector<10x1xf32>
    %143 = vector.broadcast %142 : vector<10x1xf32> to vector<10x10xf32>
    %144 = arith.subf %140, %143 : vector<10x10xf32>
    %145 = math.exp %144 : vector<10x10xf32>
    %cst_45 = arith.constant dense<0.000000e+00> : vector<10xf32>
    %146 = vector.multi_reduction <add>, %145, %cst_45 [1] : vector<10x10xf32> to vector<10xf32>
    %147 = vector.shape_cast %146 : vector<10xf32> to vector<10x1xf32>
    %148 = vector.broadcast %147 : vector<10x1xf32> to vector<10x10xf32>
    %149 = arith.divf %145, %148 : vector<10x10xf32>
    %150 = arith.truncf %149 : vector<10x10xf32> to vector<10x10xbf16>
    %151 = arith.truncf %135 : vector<10x8xf32> to vector<10x8xbf16>
    %cst_46 = arith.constant dense<0.000000e+00> : vector<10x8xf32>
    %152 = tpu.matmul %150, %151, %cst_46 {dimension_numbers = #tpu.dot_dimension_numbers<[1], [0], [0], [1], [0, 0, 1, 1], [], []>} : vector<10x10xbf16>, vector<10x8xbf16>, vector<10x8xf32> -> vector<10x8xf32>
    %153 = arith.truncf %152 : vector<10x8xf32> to vector<10x8xbf16>
    %154 = vector.extract_strided_slice %22 {offsets = [2, 0, 0], sizes = [1, 8, 32], strides = [1, 1, 1]} : vector<4x8x32xbf16> to vector<1x8x32xbf16>
    %155 = vector.shape_cast %154 : vector<1x8x32xbf16> to vector<8x32xbf16>
    %cst_47 = arith.constant dense<0.000000e+00> : vector<10x32xf32>
    %156 = tpu.matmul %153, %155, %cst_47 {dimension_numbers = #tpu.dot_dimension_numbers<[1], [0], [0], [1], [0, 0, 1, 1], [], []>} : vector<10x8xbf16>, vector<8x32xbf16>, vector<10x32xf32> -> vector<10x32xf32>
    %157 = arith.addf %114, %156 : vector<10x32xf32>
    %158 = vector.extract_strided_slice %15 {offsets = [3, 0, 0], sizes = [1, 32, 8], strides = [1, 1, 1]} : vector<4x32x8xbf16> to vector<1x32x8xbf16>
    %159 = vector.shape_cast %158 : vector<1x32x8xbf16> to vector<32x8xbf16>
    %cst_48 = arith.constant dense<0.000000e+00> : vector<10x8xf32>
    %160 = tpu.matmul %25, %159, %cst_48 {dimension_numbers = #tpu.dot_dimension_numbers<[1], [0], [0], [1], [0, 0, 1, 1], [], []>} : vector<10x32xbf16>, vector<32x8xbf16>, vector<10x8xf32> -> vector<10x8xf32>
    %161 = vector.extract_strided_slice %16 {offsets = [3, 0, 0], sizes = [1, 1, 8], strides = [1, 1, 1]} : vector<4x1x8xf32> to vector<1x1x8xf32>
    %162 = vector.shape_cast %161 : vector<1x1x8xf32> to vector<1x8xf32>
    %163 = vector.broadcast %162 : vector<1x8xf32> to vector<10x8xf32>
    %164 = arith.addf %160, %163 : vector<10x8xf32>
    %165 = vector.extract_strided_slice %17 {offsets = [3, 0, 0], sizes = [1, 32, 8], strides = [1, 1, 1]} : vector<4x32x8xbf16> to vector<1x32x8xbf16>
    %166 = vector.shape_cast %165 : vector<1x32x8xbf16> to vector<32x8xbf16>
    %cst_49 = arith.constant dense<0.000000e+00> : vector<10x8xf32>
    %167 = tpu.matmul %26, %166, %cst_49 {dimension_numbers = #tpu.dot_dimension_numbers<[1], [0], [0], [1], [0, 0, 1, 1], [], []>} : vector<10x32xbf16>, vector<32x8xbf16>, vector<10x8xf32> -> vector<10x8xf32>
    %168 = vector.extract_strided_slice %18 {offsets = [3, 0, 0], sizes = [1, 1, 8], strides = [1, 1, 1]} : vector<4x1x8xf32> to vector<1x1x8xf32>
    %169 = vector.shape_cast %168 : vector<1x1x8xf32> to vector<1x8xf32>
    %170 = vector.broadcast %169 : vector<1x8xf32> to vector<10x8xf32>
    %171 = arith.addf %167, %170 : vector<10x8xf32>
    %172 = vector.extract_strided_slice %19 {offsets = [3, 0, 0], sizes = [1, 32, 8], strides = [1, 1, 1]} : vector<4x32x8xbf16> to vector<1x32x8xbf16>
    %173 = vector.shape_cast %172 : vector<1x32x8xbf16> to vector<32x8xbf16>
    %cst_50 = arith.constant dense<0.000000e+00> : vector<10x8xf32>
    %174 = tpu.matmul %26, %173, %cst_50 {dimension_numbers = #tpu.dot_dimension_numbers<[1], [0], [0], [1], [0, 0, 1, 1], [], []>} : vector<10x32xbf16>, vector<32x8xbf16>, vector<10x8xf32> -> vector<10x8xf32>
    %175 = vector.extract_strided_slice %20 {offsets = [3, 0, 0], sizes = [1, 1, 8], strides = [1, 1, 1]} : vector<4x1x8xf32> to vector<1x1x8xf32>
    %176 = vector.shape_cast %175 : vector<1x1x8xf32> to vector<1x8xf32>
    %177 = vector.broadcast %176 : vector<1x8xf32> to vector<10x8xf32>
    %178 = arith.addf %174, %177 : vector<10x8xf32>
    %179 = arith.truncf %164 : vector<10x8xf32> to vector<10x8xbf16>
    %180 = arith.truncf %171 : vector<10x8xf32> to vector<10x8xbf16>
    %cst_51 = arith.constant dense<0.000000e+00> : vector<10x10xf32>
    %181 = tpu.matmul %179, %180, %cst_51 {dimension_numbers = #tpu.dot_dimension_numbers<[1], [1], [0], [0], [0, 0, 1, 0], [], []>} : vector<10x8xbf16>, vector<10x8xbf16>, vector<10x10xf32> -> vector<10x10xf32>
    %cst_52 = arith.constant -1.000000e+10 : f32
    %182 = vector.broadcast %cst_52 : f32 to vector<10x10xf32>
    %183 = arith.select %10, %181, %182 : vector<10x10xi1>, vector<10x10xf32>
    %cst_53 = arith.constant dense<0xFF800000> : vector<10xf32>
    %184 = vector.multi_reduction <maximumf>, %183, %cst_53 [1] : vector<10x10xf32> to vector<10xf32>
    %185 = vector.shape_cast %184 : vector<10xf32> to vector<10x1xf32>
    %186 = vector.broadcast %185 : vector<10x1xf32> to vector<10x10xf32>
    %187 = arith.subf %183, %186 : vector<10x10xf32>
    %188 = math.exp %187 : vector<10x10xf32>
    %cst_54 = arith.constant dense<0.000000e+00> : vector<10xf32>
    %189 = vector.multi_reduction <add>, %188, %cst_54 [1] : vector<10x10xf32> to vector<10xf32>
    %190 = vector.shape_cast %189 : vector<10xf32> to vector<10x1xf32>
    %191 = vector.broadcast %190 : vector<10x1xf32> to vector<10x10xf32>
    %192 = arith.divf %188, %191 : vector<10x10xf32>
    %193 = arith.truncf %192 : vector<10x10xf32> to vector<10x10xbf16>
    %194 = arith.truncf %178 : vector<10x8xf32> to vector<10x8xbf16>
    %cst_55 = arith.constant dense<0.000000e+00> : vector<10x8xf32>
    %195 = tpu.matmul %193, %194, %cst_55 {dimension_numbers = #tpu.dot_dimension_numbers<[1], [0], [0], [1], [0, 0, 1, 1], [], []>} : vector<10x10xbf16>, vector<10x8xbf16>, vector<10x8xf32> -> vector<10x8xf32>
    %196 = arith.truncf %195 : vector<10x8xf32> to vector<10x8xbf16>
    %197 = vector.extract_strided_slice %22 {offsets = [3, 0, 0], sizes = [1, 8, 32], strides = [1, 1, 1]} : vector<4x8x32xbf16> to vector<1x8x32xbf16>
    %198 = vector.shape_cast %197 : vector<1x8x32xbf16> to vector<8x32xbf16>
    %cst_56 = arith.constant dense<0.000000e+00> : vector<10x32xf32>
    %199 = tpu.matmul %196, %198, %cst_56 {dimension_numbers = #tpu.dot_dimension_numbers<[1], [0], [0], [1], [0, 0, 1, 1], [], []>} : vector<10x8xbf16>, vector<8x32xbf16>, vector<10x32xf32> -> vector<10x32xf32>
    %200 = arith.addf %157, %199 : vector<10x32xf32>
    %201 = arith.addf %4, %200 : vector<10x32xf32>
    %c0_57 = arith.constant 0 : index
    %c0_58 = arith.constant 0 : index
    %c0_59 = arith.constant 0 : index
    %202 = vector.load %arg8[%c0_57, %c0_58, %c0_59] : memref<1x1x32xf32, #tpu.memory_space<vmem>>, vector<1x1x32xf32>
    %203 = vector.shape_cast %202 : vector<1x1x32xf32> to vector<1x32xf32>
    %c0_60 = arith.constant 0 : index
    %c0_61 = arith.constant 0 : index
    %c0_62 = arith.constant 0 : index
    %204 = vector.load %arg9[%c0_60, %c0_61, %c0_62] : memref<1x1x32xf32, #tpu.memory_space<vmem>>, vector<1x1x32xf32>
    %205 = vector.shape_cast %204 : vector<1x1x32xf32> to vector<1x32xf32>
    %cst_63 = arith.constant dense<0.000000e+00> : vector<10xf32>
    %206 = vector.multi_reduction <add>, %201, %cst_63 [1] : vector<10x32xf32> to vector<10xf32>
    %207 = vector.shape_cast %206 : vector<10xf32> to vector<10x1xf32>
    %cst_64 = arith.constant 3.200000e+01 : f32
    %208 = vector.broadcast %cst_64 : f32 to vector<10x1xf32>
    %209 = arith.divf %207, %208 : vector<10x1xf32>
    %210 = vector.broadcast %209 : vector<10x1xf32> to vector<10x32xf32>
    %211 = arith.subf %201, %210 : vector<10x32xf32>
    %212 = arith.mulf %211, %211 : vector<10x32xf32>
    %cst_65 = arith.constant dense<0.000000e+00> : vector<10xf32>
    %213 = vector.multi_reduction <add>, %212, %cst_65 [1] : vector<10x32xf32> to vector<10xf32>
    %214 = vector.shape_cast %213 : vector<10xf32> to vector<10x1xf32>
    %cst_66 = arith.constant 3.200000e+01 : f32
    %215 = vector.broadcast %cst_66 : f32 to vector<10x1xf32>
    %216 = arith.divf %214, %215 : vector<10x1xf32>
    %cst_67 = arith.constant 9.99999974E-6 : f32
    %217 = vector.broadcast %cst_67 : f32 to vector<10x1xf32>
    %218 = arith.addf %216, %217 : vector<10x1xf32>
    %219 = math.rsqrt %218 : vector<10x1xf32>
    %220 = vector.broadcast %219 : vector<10x1xf32> to vector<10x32xf32>
    %221 = arith.mulf %211, %220 : vector<10x32xf32>
    %222 = vector.broadcast %203 : vector<1x32xf32> to vector<10x32xf32>
    %223 = arith.mulf %221, %222 : vector<10x32xf32>
    %224 = vector.broadcast %205 : vector<1x32xf32> to vector<10x32xf32>
    %225 = arith.addf %223, %224 : vector<10x32xf32>
    %c0_68 = arith.constant 0 : index
    %c0_69 = arith.constant 0 : index
    %c0_70 = arith.constant 0 : index
    %226 = vector.load %arg10[%c0_68, %c0_69, %c0_70] : memref<1x32x64xbf16, #tpu.memory_space<vmem>>, vector<1x32x64xbf16>
    %227 = vector.shape_cast %226 : vector<1x32x64xbf16> to vector<32x64xbf16>
    %c0_71 = arith.constant 0 : index
    %c0_72 = arith.constant 0 : index
    %c0_73 = arith.constant 0 : index
    %228 = vector.load %arg11[%c0_71, %c0_72, %c0_73] : memref<1x1x64xf32, #tpu.memory_space<vmem>>, vector<1x1x64xf32>
    %229 = vector.shape_cast %228 : vector<1x1x64xf32> to vector<1x64xf32>
    %230 = arith.truncf %225 : vector<10x32xf32> to vector<10x32xbf16>
    %cst_74 = arith.constant dense<0.000000e+00> : vector<10x64xf32>
    %231 = tpu.matmul %230, %227, %cst_74 {dimension_numbers = #tpu.dot_dimension_numbers<[1], [0], [0], [1], [0, 0, 1, 1], [], []>} : vector<10x32xbf16>, vector<32x64xbf16>, vector<10x64xf32> -> vector<10x64xf32>
    %232 = vector.broadcast %229 : vector<1x64xf32> to vector<10x64xf32>
    %233 = arith.addf %231, %232 : vector<10x64xf32>
    %cst_75 = arith.constant 0.000000e+00 : f32
    %234 = vector.broadcast %cst_75 : f32 to vector<10x64xf32>
    %235 = arith.maximumf %233, %234 : vector<10x64xf32>
    %c0_76 = arith.constant 0 : index
    %c0_77 = arith.constant 0 : index
    %c0_78 = arith.constant 0 : index
    %236 = vector.load %arg12[%c0_76, %c0_77, %c0_78] : memref<1x64x32xbf16, #tpu.memory_space<vmem>>, vector<1x64x32xbf16>
    %237 = vector.shape_cast %236 : vector<1x64x32xbf16> to vector<64x32xbf16>
    %c0_79 = arith.constant 0 : index
    %c0_80 = arith.constant 0 : index
    %c0_81 = arith.constant 0 : index
    %238 = vector.load %arg13[%c0_79, %c0_80, %c0_81] : memref<1x1x32xf32, #tpu.memory_space<vmem>>, vector<1x1x32xf32>
    %239 = vector.shape_cast %238 : vector<1x1x32xf32> to vector<1x32xf32>
    %240 = arith.truncf %235 : vector<10x64xf32> to vector<10x64xbf16>
    %cst_82 = arith.constant dense<0.000000e+00> : vector<10x32xf32>
    %241 = tpu.matmul %240, %237, %cst_82 {dimension_numbers = #tpu.dot_dimension_numbers<[1], [0], [0], [1], [0, 0, 1, 1], [], []>} : vector<10x64xbf16>, vector<64x32xbf16>, vector<10x32xf32> -> vector<10x32xf32>
    %242 = vector.broadcast %239 : vector<1x32xf32> to vector<10x32xf32>
    %243 = arith.addf %241, %242 : vector<10x32xf32>
    %244 = arith.addf %225, %243 : vector<10x32xf32>
    %c0_83 = arith.constant 0 : index
    %c0_84 = arith.constant 0 : index
    %c0_85 = arith.constant 0 : index
    %245 = vector.load %arg14[%c0_83, %c0_84, %c0_85] : memref<1x1x32xf32, #tpu.memory_space<vmem>>, vector<1x1x32xf32>
    %246 = vector.shape_cast %245 : vector<1x1x32xf32> to vector<1x32xf32>
    %c0_86 = arith.constant 0 : index
    %c0_87 = arith.constant 0 : index
    %c0_88 = arith.constant 0 : index
    %247 = vector.load %arg15[%c0_86, %c0_87, %c0_88] : memref<1x1x32xf32, #tpu.memory_space<vmem>>, vector<1x1x32xf32>
    %248 = vector.shape_cast %247 : vector<1x1x32xf32> to vector<1x32xf32>
    %cst_89 = arith.constant dense<0.000000e+00> : vector<10xf32>
    %249 = vector.multi_reduction <add>, %244, %cst_89 [1] : vector<10x32xf32> to vector<10xf32>
    %250 = vector.shape_cast %249 : vector<10xf32> to vector<10x1xf32>
    %cst_90 = arith.constant 3.200000e+01 : f32
    %251 = vector.broadcast %cst_90 : f32 to vector<10x1xf32>
    %252 = arith.divf %250, %251 : vector<10x1xf32>
    %253 = vector.broadcast %252 : vector<10x1xf32> to vector<10x32xf32>
    %254 = arith.subf %244, %253 : vector<10x32xf32>
    %255 = arith.mulf %254, %254 : vector<10x32xf32>
    %cst_91 = arith.constant dense<0.000000e+00> : vector<10xf32>
    %256 = vector.multi_reduction <add>, %255, %cst_91 [1] : vector<10x32xf32> to vector<10xf32>
    %257 = vector.shape_cast %256 : vector<10xf32> to vector<10x1xf32>
    %cst_92 = arith.constant 3.200000e+01 : f32
    %258 = vector.broadcast %cst_92 : f32 to vector<10x1xf32>
    %259 = arith.divf %257, %258 : vector<10x1xf32>
    %cst_93 = arith.constant 9.99999974E-6 : f32
    %260 = vector.broadcast %cst_93 : f32 to vector<10x1xf32>
    %261 = arith.addf %259, %260 : vector<10x1xf32>
    %262 = math.rsqrt %261 : vector<10x1xf32>
    %263 = vector.broadcast %262 : vector<10x1xf32> to vector<10x32xf32>
    %264 = arith.mulf %254, %263 : vector<10x32xf32>
    %265 = vector.broadcast %246 : vector<1x32xf32> to vector<10x32xf32>
    %266 = arith.mulf %264, %265 : vector<10x32xf32>
    %267 = vector.broadcast %248 : vector<1x32xf32> to vector<10x32xf32>
    %268 = arith.addf %266, %267 : vector<10x32xf32>
    %c0_94 = arith.constant 0 : index
    %c0_95 = arith.constant 0 : index
    %c0_96 = arith.constant 0 : index
    %269 = vector.load %arg16[%c0_94, %c0_95, %c0_96] : memref<1x10x32xf32, #tpu.memory_space<vmem>>, vector<1x10x32xf32>
    %270 = vector.shape_cast %269 : vector<1x10x32xf32> to vector<10x32xf32>
    %271 = vector.shape_cast %268 : vector<10x32xf32> to vector<1x10x32xf32>
    tpu.vector_store %arg16[%c0_94, %c0_95, %c0_96], %271 {strides = array<i32>} : memref<1x10x32xf32, #tpu.memory_space<vmem>>, vector<1x10x32xf32>,
    return
  }
  func.func @transform_0(%arg0: i32, %arg1: i32) -> (i32, i32, i32) {
    %c0_i32 = arith.constant 0 : i32
    %c0_i32_0 = arith.constant 0 : i32
    %c0_i32_1 = arith.constant 0 : i32
    return %arg0, %c0_i32, %c0_i32_0 : i32, i32, i32
  }
  func.func @transform_1(%arg0: i32, %arg1: i32) -> (i32, i32, i32) {
    %c0_i32 = arith.constant 0 : i32
    %c0_i32_0 = arith.constant 0 : i32
    %c0_i32_1 = arith.constant 0 : i32
    return %arg0, %c0_i32, %c0_i32_0 : i32, i32, i32
  }
  func.func @transform_2(%arg0: i32, %arg1: i32) -> (i32, i32, i32, i32) {
    %c0_i32 = arith.constant 0 : i32
    %c0_i32_0 = arith.constant 0 : i32
    %c0_i32_1 = arith.constant 0 : i32
    %c0_i32_2 = arith.constant 0 : i32
    return %arg1, %c0_i32, %c0_i32_0, %c0_i32_1 : i32, i32, i32, i32
  }
  func.func @transform_3(%arg0: i32, %arg1: i32) -> (i32, i32, i32, i32) {
    %c0_i32 = arith.constant 0 : i32
    %c0_i32_0 = arith.constant 0 : i32
    %c0_i32_1 = arith.constant 0 : i32
    %c0_i32_2 = arith.constant 0 : i32
    return %arg1, %c0_i32, %c0_i32_0, %c0_i32_1 : i32, i32, i32, i32
  }
  func.func @transform_4(%arg0: i32, %arg1: i32) -> (i32, i32, i32, i32) {
    %c0_i32 = arith.constant 0 : i32
    %c0_i32_0 = arith.constant 0 : i32
    %c0_i32_1 = arith.constant 0 : i32
    %c0_i32_2 = arith.constant 0 : i32
    return %arg1, %c0_i32, %c0_i32_0, %c0_i32_1 : i32, i32, i32, i32
  }
  func.func @transform_5(%arg0: i32, %arg1: i32) -> (i32, i32, i32) {
    %c0_i32 = arith.constant 0 : i32
    %c0_i32_0 = arith.constant 0 : i32
    %c0_i32_1 = arith.constant 0 : i32
    return %arg1, %c0_i32, %c0_i32_0 : i32, i32, i32
  }
  func.func @transform_6(%arg0: i32, %arg1: i32) -> (i32, i32, i32) {
    %c0_i32 = arith.constant 0 : i32
    %c0_i32_0 = arith.constant 0 : i32
    %c0_i32_1 = arith.constant 0 : i32
    return %arg1, %c0_i32, %c0_i32_0 : i32, i32, i32
  }
  func.func @transform_7(%arg0: i32, %arg1: i32) -> (i32, i32, i32) {
    %c0_i32 = arith.constant 0 : i32
    %c0_i32_0 = arith.constant 0 : i32
    %c0_i32_1 = arith.constant 0 : i32
    return %arg1, %c0_i32, %c0_i32_0 : i32, i32, i32
  }
  func.func @transform_8(%arg0: i32, %arg1: i32) -> (i32, i32, i32) {
    %c0_i32 = arith.constant 0 : i32
    %c0_i32_0 = arith.constant 0 : i32
    %c0_i32_1 = arith.constant 0 : i32
    return %arg1, %c0_i32, %c0_i32_0 : i32, i32, i32
  }
  func.func @transform_9(%arg0: i32, %arg1: i32) -> (i32, i32, i32) {
    %c0_i32 = arith.constant 0 : i32
    %c0_i32_0 = arith.constant 0 : i32
    %c0_i32_1 = arith.constant 0 : i32
    return %arg1, %c0_i32, %c0_i32_0 : i32, i32, i32
  }
  func.func @transform_10(%arg0: i32, %arg1: i32) -> (i32, i32, i32) {
    %c0_i32 = arith.constant 0 : i32
    %c0_i32_0 = arith.constant 0 : i32
    %c0_i32_1 = arith.constant 0 : i32
    return %arg1, %c0_i32, %c0_i32_0 : i32, i32, i32
  }
  func.func @transform_11(%arg0: i32, %arg1: i32) -> (i32, i32, i32) {
    %c0_i32 = arith.constant 0 : i32
    %c0_i32_0 = arith.constant 0 : i32
    %c0_i32_1 = arith.constant 0 : i32
    return %arg1, %c0_i32, %c0_i32_0 : i32, i32, i32
  }
  func.func @transform_12(%arg0: i32, %arg1: i32) -> (i32, i32, i32) {
    %c0_i32 = arith.constant 0 : i32
    %c0_i32_0 = arith.constant 0 : i32
    %c0_i32_1 = arith.constant 0 : i32
    return %arg1, %c0_i32, %c0_i32_0 : i32, i32, i32
  }
  func.func @transform_13(%arg0: i32, %arg1: i32) -> (i32, i32, i32) {
    %c0_i32 = arith.constant 0 : i32
    %c0_i32_0 = arith.constant 0 : i32
    %c0_i32_1 = arith.constant 0 : i32
    return %arg1, %c0_i32, %c0_i32_0 : i32, i32, i32
  }
  func.func @transform_14(%arg0: i32, %arg1: i32) -> (i32, i32, i32) {
    %c0_i32 = arith.constant 0 : i32
    %c0_i32_0 = arith.constant 0 : i32
    %c0_i32_1 = arith.constant 0 : i32
    return %arg0, %c0_i32, %c0_i32_0 : i32, i32, i32
  }
}

module attributes {stable_mosaic.version = 11 : i64} {
  func.func @_out_proj_kernel(%arg0: i32, %arg1: i32, %arg2: memref<16x32xbf16, #tpu.memory_space<vmem>>, %arg3: memref<32x128xbf16, #tpu.memory_space<vmem>>, %arg4: memref<1x128xf32, #tpu.memory_space<vmem>>, %arg5: memref<16x128xf32, #tpu.memory_space<vmem>>) attributes {dimension_semantics = [#tpu.dimension_semantics<parallel>, #tpu.dimension_semantics<parallel>], iteration_bounds = array<i64: 1, 1>, scalar_prefetch = 0 : i64, scratch_operands = 0 : i64, tpu.core_type = #tpu.core_type<tc>, window_params = [{transform_indices = @transform_0, window_bounds = array<i64: 16, 32>}, {transform_indices = @transform_1, window_bounds = array<i64: 32, 128>}, {transform_indices = @transform_2, window_bounds = array<i64: 1, 128>}, {transform_indices = @transform_3, window_bounds = array<i64: 16, 128>}]} {
    %c0 = arith.constant 0 : index
    %c0_0 = arith.constant 0 : index
    %0 = vector.load %arg2[%c0, %c0_0] : memref<16x32xbf16, #tpu.memory_space<vmem>>, vector<16x32xbf16>
    %c0_1 = arith.constant 0 : index
    %c0_2 = arith.constant 0 : index
    %1 = vector.load %arg3[%c0_1, %c0_2] : memref<32x128xbf16, #tpu.memory_space<vmem>>, vector<32x128xbf16>
    %cst = arith.constant dense<0.000000e+00> : vector<16x128xf32>
    %2 = tpu.matmul %0, %1, %cst {dimension_numbers = #tpu.dot_dimension_numbers<[1], [0], [0], [1], [0, 0, 1, 1], [], []>} : vector<16x32xbf16>, vector<32x128xbf16>, vector<16x128xf32> -> vector<16x128xf32>
    %c0_3 = arith.constant 0 : index
    %c0_4 = arith.constant 0 : index
    %3 = vector.load %arg4[%c0_3, %c0_4] : memref<1x128xf32, #tpu.memory_space<vmem>>, vector<1x128xf32>
    %4 = vector.broadcast %3 : vector<1x128xf32> to vector<16x128xf32>
    %5 = arith.addf %2, %4 : vector<16x128xf32>
    %c0_5 = arith.constant 0 : index
    %c0_6 = arith.constant 0 : index
    %6 = vector.load %arg5[%c0_5, %c0_6] : memref<16x128xf32, #tpu.memory_space<vmem>>, vector<16x128xf32>
    tpu.vector_store %arg5[%c0_5, %c0_6], %5 {strides = array<i32>} : memref<16x128xf32, #tpu.memory_space<vmem>>, vector<16x128xf32>,
    return
  }
  func.func @transform_0(%arg0: i32, %arg1: i32) -> (i32, i32) {
    %c0_i32 = arith.constant 0 : i32
    %c0_i32_0 = arith.constant 0 : i32
    return %arg0, %c0_i32 : i32, i32
  }
  func.func @transform_1(%arg0: i32, %arg1: i32) -> (i32, i32) {
    %c0_i32 = arith.constant 0 : i32
    %c0_i32_0 = arith.constant 0 : i32
    return %c0_i32, %arg1 : i32, i32
  }
  func.func @transform_2(%arg0: i32, %arg1: i32) -> (i32, i32) {
    %c0_i32 = arith.constant 0 : i32
    %c0_i32_0 = arith.constant 0 : i32
    return %c0_i32, %arg1 : i32, i32
  }
  func.func @transform_3(%arg0: i32, %arg1: i32) -> (i32, i32) {
    %c0_i32 = arith.constant 0 : i32
    return %arg0, %arg1 : i32, i32
  }
}

module attributes {stable_mosaic.version = 11 : i64} {
  func.func @_decoder_stack_kernel(%arg0: i32, %arg1: i32, %arg2: memref<1x8x32xf32, #tpu.memory_space<vmem>>, %arg3: memref<1x10x32xf32, #tpu.memory_space<vmem>>, %arg4: memref<1x1x8xf32, #tpu.memory_space<vmem>>, %arg5: memref<1x1x10xf32, #tpu.memory_space<vmem>>, %arg6: memref<1x12x32x8xbf16, #tpu.memory_space<vmem>>, %arg7: memref<1x12x1x8xf32, #tpu.memory_space<vmem>>, %arg8: memref<1x4x8x32xbf16, #tpu.memory_space<vmem>>, %arg9: memref<1x1x32xf32, #tpu.memory_space<vmem>>, %arg10: memref<1x1x32xf32, #tpu.memory_space<vmem>>, %arg11: memref<1x1x32xf32, #tpu.memory_space<vmem>>, %arg12: memref<1x4x32x8xbf16, #tpu.memory_space<vmem>>, %arg13: memref<1x4x1x8xf32, #tpu.memory_space<vmem>>, %arg14: memref<1x8x32x8xbf16, #tpu.memory_space<vmem>>, %arg15: memref<1x8x1x8xf32, #tpu.memory_space<vmem>>, %arg16: memref<1x4x8x32xbf16, #tpu.memory_space<vmem>>, %arg17: memref<1x1x32xf32, #tpu.memory_space<vmem>>, %arg18: memref<1x1x32xf32, #tpu.memory_space<vmem>>, %arg19: memref<1x1x32xf32, #tpu.memory_space<vmem>>, %arg20: memref<1x32x64xbf16, #tpu.memory_space<vmem>>, %arg21: memref<1x1x64xf32, #tpu.memory_space<vmem>>, %arg22: memref<1x64x32xbf16, #tpu.memory_space<vmem>>, %arg23: memref<1x1x32xf32, #tpu.memory_space<vmem>>, %arg24: memref<1x1x32xf32, #tpu.memory_space<vmem>>, %arg25: memref<1x1x32xf32, #tpu.memory_space<vmem>>, %arg26: memref<1x8x32xf32, #tpu.memory_space<vmem>>, %arg27: memref<1x4x8x128xf32, #tpu.memory_space<vmem>>) attributes {dimension_semantics = [#tpu.dimension_semantics<parallel>, #tpu.dimension_semantics<arbitrary>], iteration_bounds = array<i64: 2, 2>, scalar_prefetch = 0 : i64, scratch_operands = 0 : i64, tpu.core_type = #tpu.core_type<tc>, window_params = [{transform_indices = @transform_0, window_bounds = array<i64: 1, 8, 32>}, {transform_indices = @transform_1, window_bounds = array<i64: 1, 10, 32>}, {transform_indices = @transform_2, window_bounds = array<i64: 1, 1, 8>}, {transform_indices = @transform_3, window_bounds = array<i64: 1, 1, 10>}, {transform_indices = @transform_4, window_bounds = array<i64: 1, 12, 32, 8>}, {transform_indices = @transform_5, window_bounds = array<i64: 1, 12, 1, 8>}, {transform_indices = @transform_6, window_bounds = array<i64: 1, 4, 8, 32>}, {transform_indices = @transform_7, window_bounds = array<i64: 1, 1, 32>}, {transform_indices = @transform_8, window_bounds = array<i64: 1, 1, 32>}, {transform_indices = @transform_9, window_bounds = array<i64: 1, 1, 32>}, {transform_indices = @transform_10, window_bounds = array<i64: 1, 4, 32, 8>}, {transform_indices = @transform_11, window_bounds = array<i64: 1, 4, 1, 8>}, {transform_indices = @transform_12, window_bounds = array<i64: 1, 8, 32, 8>}, {transform_indices = @transform_13, window_bounds = array<i64: 1, 8, 1, 8>}, {transform_indices = @transform_14, window_bounds = array<i64: 1, 4, 8, 32>}, {transform_indices = @transform_15, window_bounds = array<i64: 1, 1, 32>}, {transform_indices = @transform_16, window_bounds = array<i64: 1, 1, 32>}, {transform_indices = @transform_17, window_bounds = array<i64: 1, 1, 32>}, {transform_indices = @transform_18, window_bounds = array<i64: 1, 32, 64>}, {transform_indices = @transform_19, window_bounds = array<i64: 1, 1, 64>}, {transform_indices = @transform_20, window_bounds = array<i64: 1, 64, 32>}, {transform_indices = @transform_21, window_bounds = array<i64: 1, 1, 32>}, {transform_indices = @transform_22, window_bounds = array<i64: 1, 1, 32>}, {transform_indices = @transform_23, window_bounds = array<i64: 1, 1, 32>}, {transform_indices = @transform_24, window_bounds = array<i64: 1, 8, 32>}, {transform_indices = @transform_25, window_bounds = array<i64: 1, 4, 8, 128>}]} {
    %c0_i32 = arith.constant 0 : i32
    %0 = arith.cmpi eq, %arg1, %c0_i32 : i32
    %1 = arith.extui %0 : i1 to i32
    %c0_i32_0 = arith.constant 0 : i32
    %2 = arith.cmpi ne, %1, %c0_i32_0 : i32
    scf.if %2 {
      %c0_175 = arith.constant 0 : index
      %c0_176 = arith.constant 0 : index
      %c0_177 = arith.constant 0 : index
      %504 = vector.load %arg2[%c0_175, %c0_176, %c0_177] : memref<1x8x32xf32, #tpu.memory_space<vmem>>, vector<1x8x32xf32>
      %505 = vector.shape_cast %504 : vector<1x8x32xf32> to vector<8x32xf32>
      %c0_178 = arith.constant 0 : index
      %c0_179 = arith.constant 0 : index
      %c0_180 = arith.constant 0 : index
      %506 = vector.load %arg26[%c0_178, %c0_179, %c0_180] : memref<1x8x32xf32, #tpu.memory_space<vmem>>, vector<1x8x32xf32>
      %507 = vector.shape_cast %506 : vector<1x8x32xf32> to vector<8x32xf32>
      %508 = vector.shape_cast %505 : vector<8x32xf32> to vector<1x8x32xf32>
      tpu.vector_store %arg26[%c0_178, %c0_179, %c0_180], %508 {strides = array<i32>} : memref<1x8x32xf32, #tpu.memory_space<vmem>>, vector<1x8x32xf32>,
    } else {
    }
    %c0 = arith.constant 0 : index
    %c0_1 = arith.constant 0 : index
    %c0_2 = arith.constant 0 : index
    %3 = vector.load %arg26[%c0, %c0_1, %c0_2] : memref<1x8x32xf32, #tpu.memory_space<vmem>>, vector<1x8x32xf32>
    %4 = vector.shape_cast %3 : vector<1x8x32xf32> to vector<8x32xf32>
    %c0_3 = arith.constant 0 : index
    %c0_4 = arith.constant 0 : index
    %c0_5 = arith.constant 0 : index
    %5 = vector.load %arg3[%c0_3, %c0_4, %c0_5] : memref<1x10x32xf32, #tpu.memory_space<vmem>>, vector<1x10x32xf32>
    %6 = vector.shape_cast %5 : vector<1x10x32xf32> to vector<10x32xf32>
    %c0_6 = arith.constant 0 : index
    %c0_7 = arith.constant 0 : index
    %c0_8 = arith.constant 0 : index
    %7 = vector.load %arg4[%c0_6, %c0_7, %c0_8] : memref<1x1x8xf32, #tpu.memory_space<vmem>>, vector<1x1x8xf32>
    %8 = vector.shape_cast %7 : vector<1x1x8xf32> to vector<1x8xf32>
    %cst = arith.constant 5.000000e-01 : f32
    %9 = vector.broadcast %cst : f32 to vector<1x8xf32>
    %10 = arith.cmpf ogt, %8, %9 : vector<1x8xf32>
    %11 = tpu.iota {dimensions = array<i32: 0>} : vector<8x8xi32>
    %12 = tpu.iota {dimensions = array<i32: 1>} : vector<8x8xi32>
    %13 = vector.shape_cast %10 : vector<1x8xi1> to vector<1x8xi1>
    %14 = vector.broadcast %13 : vector<1x8xi1> to vector<8x8xi1>
    %15 = arith.cmpi sle, %12, %11 : vector<8x8xi32>
    %16 = arith.andi %14, %15 : vector<8x8xi1>
    %c0_9 = arith.constant 0 : index
    %c0_10 = arith.constant 0 : index
    %c0_11 = arith.constant 0 : index
    %17 = vector.load %arg5[%c0_9, %c0_10, %c0_11] : memref<1x1x10xf32, #tpu.memory_space<vmem>>, vector<1x1x10xf32>
    %18 = vector.shape_cast %17 : vector<1x1x10xf32> to vector<1x10xf32>
    %cst_12 = arith.constant 5.000000e-01 : f32
    %19 = vector.broadcast %cst_12 : f32 to vector<1x10xf32>
    %20 = arith.cmpf ogt, %18, %19 : vector<1x10xf32>
    %21 = vector.shape_cast %20 : vector<1x10xi1> to vector<1x10xi1>
    %22 = vector.broadcast %21 : vector<1x10xi1> to vector<8x10xi1>
    %c0_13 = arith.constant 0 : index
    %c0_14 = arith.constant 0 : index
    %c0_15 = arith.constant 0 : index
    %c0_16 = arith.constant 0 : index
    %23 = vector.load %arg6[%c0_13, %c0_14, %c0_15, %c0_16] : memref<1x12x32x8xbf16, #tpu.memory_space<vmem>>, vector<1x12x32x8xbf16>
    %24 = vector.shape_cast %23 : vector<1x12x32x8xbf16> to vector<12x32x8xbf16>
    %c0_17 = arith.constant 0 : index
    %c0_18 = arith.constant 0 : index
    %c0_19 = arith.constant 0 : index
    %c0_20 = arith.constant 0 : index
    %25 = vector.load %arg7[%c0_17, %c0_18, %c0_19, %c0_20] : memref<1x12x1x8xf32, #tpu.memory_space<vmem>>, vector<1x12x1x8xf32>
    %26 = vector.shape_cast %25 : vector<1x12x1x8xf32> to vector<12x1x8xf32>
    %27 = vector.extract_strided_slice %24 {offsets = [0, 0, 0], sizes = [4, 32, 8], strides = [1, 1, 1]} : vector<12x32x8xbf16> to vector<4x32x8xbf16>
    %28 = vector.extract_strided_slice %26 {offsets = [0, 0, 0], sizes = [4, 1, 8], strides = [1, 1, 1]} : vector<12x1x8xf32> to vector<4x1x8xf32>
    %29 = vector.extract_strided_slice %24 {offsets = [4, 0, 0], sizes = [4, 32, 8], strides = [1, 1, 1]} : vector<12x32x8xbf16> to vector<4x32x8xbf16>
    %30 = vector.extract_strided_slice %26 {offsets = [4, 0, 0], sizes = [4, 1, 8], strides = [1, 1, 1]} : vector<12x1x8xf32> to vector<4x1x8xf32>
    %31 = vector.extract_strided_slice %24 {offsets = [8, 0, 0], sizes = [4, 32, 8], strides = [1, 1, 1]} : vector<12x32x8xbf16> to vector<4x32x8xbf16>
    %32 = vector.extract_strided_slice %26 {offsets = [8, 0, 0], sizes = [4, 1, 8], strides = [1, 1, 1]} : vector<12x1x8xf32> to vector<4x1x8xf32>
    %c0_21 = arith.constant 0 : index
    %c0_22 = arith.constant 0 : index
    %c0_23 = arith.constant 0 : index
    %c0_24 = arith.constant 0 : index
    %33 = vector.load %arg8[%c0_21, %c0_22, %c0_23, %c0_24] : memref<1x4x8x32xbf16, #tpu.memory_space<vmem>>, vector<1x4x8x32xbf16>
    %34 = vector.shape_cast %33 : vector<1x4x8x32xbf16> to vector<4x8x32xbf16>
    %c0_25 = arith.constant 0 : index
    %c0_26 = arith.constant 0 : index
    %c0_27 = arith.constant 0 : index
    %35 = vector.load %arg9[%c0_25, %c0_26, %c0_27] : memref<1x1x32xf32, #tpu.memory_space<vmem>>, vector<1x1x32xf32>
    %36 = vector.shape_cast %35 : vector<1x1x32xf32> to vector<1x32xf32>
    %37 = arith.truncf %4 : vector<8x32xf32> to vector<8x32xbf16>
    %38 = arith.truncf %4 : vector<8x32xf32> to vector<8x32xbf16>
    %39 = vector.shape_cast %36 : vector<1x32xf32> to vector<1x32xf32>
    %40 = vector.broadcast %39 : vector<1x32xf32> to vector<8x32xf32>
    %41 = vector.extract_strided_slice %27 {offsets = [0, 0, 0], sizes = [1, 32, 8], strides = [1, 1, 1]} : vector<4x32x8xbf16> to vector<1x32x8xbf16>
    %42 = vector.shape_cast %41 : vector<1x32x8xbf16> to vector<32x8xbf16>
    %cst_28 = arith.constant dense<0.000000e+00> : vector<8x8xf32>
    %43 = tpu.matmul %37, %42, %cst_28 {dimension_numbers = #tpu.dot_dimension_numbers<[1], [0], [0], [1], [0, 0, 1, 1], [], []>} : vector<8x32xbf16>, vector<32x8xbf16>, vector<8x8xf32> -> vector<8x8xf32>
    %44 = vector.extract_strided_slice %28 {offsets = [0, 0, 0], sizes = [1, 1, 8], strides = [1, 1, 1]} : vector<4x1x8xf32> to vector<1x1x8xf32>
    %45 = vector.shape_cast %44 : vector<1x1x8xf32> to vector<1x8xf32>
    %46 = vector.broadcast %45 : vector<1x8xf32> to vector<8x8xf32>
    %47 = arith.addf %43, %46 : vector<8x8xf32>
    %48 = vector.extract_strided_slice %29 {offsets = [0, 0, 0], sizes = [1, 32, 8], strides = [1, 1, 1]} : vector<4x32x8xbf16> to vector<1x32x8xbf16>
    %49 = vector.shape_cast %48 : vector<1x32x8xbf16> to vector<32x8xbf16>
    %cst_29 = arith.constant dense<0.000000e+00> : vector<8x8xf32>
    %50 = tpu.matmul %38, %49, %cst_29 {dimension_numbers = #tpu.dot_dimension_numbers<[1], [0], [0], [1], [0, 0, 1, 1], [], []>} : vector<8x32xbf16>, vector<32x8xbf16>, vector<8x8xf32> -> vector<8x8xf32>
    %51 = vector.extract_strided_slice %30 {offsets = [0, 0, 0], sizes = [1, 1, 8], strides = [1, 1, 1]} : vector<4x1x8xf32> to vector<1x1x8xf32>
    %52 = vector.shape_cast %51 : vector<1x1x8xf32> to vector<1x8xf32>
    %53 = vector.broadcast %52 : vector<1x8xf32> to vector<8x8xf32>
    %54 = arith.addf %50, %53 : vector<8x8xf32>
    %55 = vector.extract_strided_slice %31 {offsets = [0, 0, 0], sizes = [1, 32, 8], strides = [1, 1, 1]} : vector<4x32x8xbf16> to vector<1x32x8xbf16>
    %56 = vector.shape_cast %55 : vector<1x32x8xbf16> to vector<32x8xbf16>
    %cst_30 = arith.constant dense<0.000000e+00> : vector<8x8xf32>
    %57 = tpu.matmul %38, %56, %cst_30 {dimension_numbers = #tpu.dot_dimension_numbers<[1], [0], [0], [1], [0, 0, 1, 1], [], []>} : vector<8x32xbf16>, vector<32x8xbf16>, vector<8x8xf32> -> vector<8x8xf32>
    %58 = vector.extract_strided_slice %32 {offsets = [0, 0, 0], sizes = [1, 1, 8], strides = [1, 1, 1]} : vector<4x1x8xf32> to vector<1x1x8xf32>
    %59 = vector.shape_cast %58 : vector<1x1x8xf32> to vector<1x8xf32>
    %60 = vector.broadcast %59 : vector<1x8xf32> to vector<8x8xf32>
    %61 = arith.addf %57, %60 : vector<8x8xf32>
    %62 = arith.truncf %47 : vector<8x8xf32> to vector<8x8xbf16>
    %63 = arith.truncf %54 : vector<8x8xf32> to vector<8x8xbf16>
    %cst_31 = arith.constant dense<0.000000e+00> : vector<8x8xf32>
    %64 = tpu.matmul %62, %63, %cst_31 {dimension_numbers = #tpu.dot_dimension_numbers<[1], [1], [0], [0], [0, 0, 1, 0], [], []>} : vector<8x8xbf16>, vector<8x8xbf16>, vector<8x8xf32> -> vector<8x8xf32>
    %cst_32 = arith.constant -1.000000e+10 : f32
    %65 = vector.broadcast %cst_32 : f32 to vector<8x8xf32>
    %66 = arith.select %16, %64, %65 : vector<8x8xi1>, vector<8x8xf32>
    %cst_33 = arith.constant dense<0xFF800000> : vector<8xf32>
    %67 = vector.multi_reduction <maximumf>, %66, %cst_33 [1] : vector<8x8xf32> to vector<8xf32>
    %68 = vector.shape_cast %67 : vector<8xf32> to vector<8x1xf32>
    %69 = vector.broadcast %68 : vector<8x1xf32> to vector<8x8xf32>
    %70 = arith.subf %66, %69 : vector<8x8xf32>
    %71 = math.exp %70 : vector<8x8xf32>
    %cst_34 = arith.constant dense<0.000000e+00> : vector<8xf32>
    %72 = vector.multi_reduction <add>, %71, %cst_34 [1] : vector<8x8xf32> to vector<8xf32>
    %73 = vector.shape_cast %72 : vector<8xf32> to vector<8x1xf32>
    %74 = vector.broadcast %73 : vector<8x1xf32> to vector<8x8xf32>
    %75 = arith.divf %71, %74 : vector<8x8xf32>
    %76 = arith.truncf %75 : vector<8x8xf32> to vector<8x8xbf16>
    %77 = arith.truncf %61 : vector<8x8xf32> to vector<8x8xbf16>
    %cst_35 = arith.constant dense<0.000000e+00> : vector<8x8xf32>
    %78 = tpu.matmul %76, %77, %cst_35 {dimension_numbers = #tpu.dot_dimension_numbers<[1], [0], [0], [1], [0, 0, 1, 1], [], []>} : vector<8x8xbf16>, vector<8x8xbf16>, vector<8x8xf32> -> vector<8x8xf32>
    %79 = arith.truncf %78 : vector<8x8xf32> to vector<8x8xbf16>
    %80 = vector.extract_strided_slice %34 {offsets = [0, 0, 0], sizes = [1, 8, 32], strides = [1, 1, 1]} : vector<4x8x32xbf16> to vector<1x8x32xbf16>
    %81 = vector.shape_cast %80 : vector<1x8x32xbf16> to vector<8x32xbf16>
    %cst_36 = arith.constant dense<0.000000e+00> : vector<8x32xf32>
    %82 = tpu.matmul %79, %81, %cst_36 {dimension_numbers = #tpu.dot_dimension_numbers<[1], [0], [0], [1], [0, 0, 1, 1], [], []>} : vector<8x8xbf16>, vector<8x32xbf16>, vector<8x32xf32> -> vector<8x32xf32>
    %83 = arith.addf %40, %82 : vector<8x32xf32>
    %84 = vector.extract_strided_slice %27 {offsets = [1, 0, 0], sizes = [1, 32, 8], strides = [1, 1, 1]} : vector<4x32x8xbf16> to vector<1x32x8xbf16>
    %85 = vector.shape_cast %84 : vector<1x32x8xbf16> to vector<32x8xbf16>
    %cst_37 = arith.constant dense<0.000000e+00> : vector<8x8xf32>
    %86 = tpu.matmul %37, %85, %cst_37 {dimension_numbers = #tpu.dot_dimension_numbers<[1], [0], [0], [1], [0, 0, 1, 1], [], []>} : vector<8x32xbf16>, vector<32x8xbf16>, vector<8x8xf32> -> vector<8x8xf32>
    %87 = vector.extract_strided_slice %28 {offsets = [1, 0, 0], sizes = [1, 1, 8], strides = [1, 1, 1]} : vector<4x1x8xf32> to vector<1x1x8xf32>
    %88 = vector.shape_cast %87 : vector<1x1x8xf32> to vector<1x8xf32>
    %89 = vector.broadcast %88 : vector<1x8xf32> to vector<8x8xf32>
    %90 = arith.addf %86, %89 : vector<8x8xf32>
    %91 = vector.extract_strided_slice %29 {offsets = [1, 0, 0], sizes = [1, 32, 8], strides = [1, 1, 1]} : vector<4x32x8xbf16> to vector<1x32x8xbf16>
    %92 = vector.shape_cast %91 : vector<1x32x8xbf16> to vector<32x8xbf16>
    %cst_38 = arith.constant dense<0.000000e+00> : vector<8x8xf32>
    %93 = tpu.matmul %38, %92, %cst_38 {dimension_numbers = #tpu.dot_dimension_numbers<[1], [0], [0], [1], [0, 0, 1, 1], [], []>} : vector<8x32xbf16>, vector<32x8xbf16>, vector<8x8xf32> -> vector<8x8xf32>
    %94 = vector.extract_strided_slice %30 {offsets = [1, 0, 0], sizes = [1, 1, 8], strides = [1, 1, 1]} : vector<4x1x8xf32> to vector<1x1x8xf32>
    %95 = vector.shape_cast %94 : vector<1x1x8xf32> to vector<1x8xf32>
    %96 = vector.broadcast %95 : vector<1x8xf32> to vector<8x8xf32>
    %97 = arith.addf %93, %96 : vector<8x8xf32>
    %98 = vector.extract_strided_slice %31 {offsets = [1, 0, 0], sizes = [1, 32, 8], strides = [1, 1, 1]} : vector<4x32x8xbf16> to vector<1x32x8xbf16>
    %99 = vector.shape_cast %98 : vector<1x32x8xbf16> to vector<32x8xbf16>
    %cst_39 = arith.constant dense<0.000000e+00> : vector<8x8xf32>
    %100 = tpu.matmul %38, %99, %cst_39 {dimension_numbers = #tpu.dot_dimension_numbers<[1], [0], [0], [1], [0, 0, 1, 1], [], []>} : vector<8x32xbf16>, vector<32x8xbf16>, vector<8x8xf32> -> vector<8x8xf32>
    %101 = vector.extract_strided_slice %32 {offsets = [1, 0, 0], sizes = [1, 1, 8], strides = [1, 1, 1]} : vector<4x1x8xf32> to vector<1x1x8xf32>
    %102 = vector.shape_cast %101 : vector<1x1x8xf32> to vector<1x8xf32>
    %103 = vector.broadcast %102 : vector<1x8xf32> to vector<8x8xf32>
    %104 = arith.addf %100, %103 : vector<8x8xf32>
    %105 = arith.truncf %90 : vector<8x8xf32> to vector<8x8xbf16>
    %106 = arith.truncf %97 : vector<8x8xf32> to vector<8x8xbf16>
    %cst_40 = arith.constant dense<0.000000e+00> : vector<8x8xf32>
    %107 = tpu.matmul %105, %106, %cst_40 {dimension_numbers = #tpu.dot_dimension_numbers<[1], [1], [0], [0], [0, 0, 1, 0], [], []>} : vector<8x8xbf16>, vector<8x8xbf16>, vector<8x8xf32> -> vector<8x8xf32>
    %cst_41 = arith.constant -1.000000e+10 : f32
    %108 = vector.broadcast %cst_41 : f32 to vector<8x8xf32>
    %109 = arith.select %16, %107, %108 : vector<8x8xi1>, vector<8x8xf32>
    %cst_42 = arith.constant dense<0xFF800000> : vector<8xf32>
    %110 = vector.multi_reduction <maximumf>, %109, %cst_42 [1] : vector<8x8xf32> to vector<8xf32>
    %111 = vector.shape_cast %110 : vector<8xf32> to vector<8x1xf32>
    %112 = vector.broadcast %111 : vector<8x1xf32> to vector<8x8xf32>
    %113 = arith.subf %109, %112 : vector<8x8xf32>
    %114 = math.exp %113 : vector<8x8xf32>
    %cst_43 = arith.constant dense<0.000000e+00> : vector<8xf32>
    %115 = vector.multi_reduction <add>, %114, %cst_43 [1] : vector<8x8xf32> to vector<8xf32>
    %116 = vector.shape_cast %115 : vector<8xf32> to vector<8x1xf32>
    %117 = vector.broadcast %116 : vector<8x1xf32> to vector<8x8xf32>
    %118 = arith.divf %114, %117 : vector<8x8xf32>
    %119 = arith.truncf %118 : vector<8x8xf32> to vector<8x8xbf16>
    %120 = arith.truncf %104 : vector<8x8xf32> to vector<8x8xbf16>
    %cst_44 = arith.constant dense<0.000000e+00> : vector<8x8xf32>
    %121 = tpu.matmul %119, %120, %cst_44 {dimension_numbers = #tpu.dot_dimension_numbers<[1], [0], [0], [1], [0, 0, 1, 1], [], []>} : vector<8x8xbf16>, vector<8x8xbf16>, vector<8x8xf32> -> vector<8x8xf32>
    %122 = arith.truncf %121 : vector<8x8xf32> to vector<8x8xbf16>
    %123 = vector.extract_strided_slice %34 {offsets = [1, 0, 0], sizes = [1, 8, 32], strides = [1, 1, 1]} : vector<4x8x32xbf16> to vector<1x8x32xbf16>
    %124 = vector.shape_cast %123 : vector<1x8x32xbf16> to vector<8x32xbf16>
    %cst_45 = arith.constant dense<0.000000e+00> : vector<8x32xf32>
    %125 = tpu.matmul %122, %124, %cst_45 {dimension_numbers = #tpu.dot_dimension_numbers<[1], [0], [0], [1], [0, 0, 1, 1], [], []>} : vector<8x8xbf16>, vector<8x32xbf16>, vector<8x32xf32> -> vector<8x32xf32>
    %126 = arith.addf %83, %125 : vector<8x32xf32>
    %127 = vector.extract_strided_slice %27 {offsets = [2, 0, 0], sizes = [1, 32, 8], strides = [1, 1, 1]} : vector<4x32x8xbf16> to vector<1x32x8xbf16>
    %128 = vector.shape_cast %127 : vector<1x32x8xbf16> to vector<32x8xbf16>
    %cst_46 = arith.constant dense<0.000000e+00> : vector<8x8xf32>
    %129 = tpu.matmul %37, %128, %cst_46 {dimension_numbers = #tpu.dot_dimension_numbers<[1], [0], [0], [1], [0, 0, 1, 1], [], []>} : vector<8x32xbf16>, vector<32x8xbf16>, vector<8x8xf32> -> vector<8x8xf32>
    %130 = vector.extract_strided_slice %28 {offsets = [2, 0, 0], sizes = [1, 1, 8], strides = [1, 1, 1]} : vector<4x1x8xf32> to vector<1x1x8xf32>
    %131 = vector.shape_cast %130 : vector<1x1x8xf32> to vector<1x8xf32>
    %132 = vector.broadcast %131 : vector<1x8xf32> to vector<8x8xf32>
    %133 = arith.addf %129, %132 : vector<8x8xf32>
    %134 = vector.extract_strided_slice %29 {offsets = [2, 0, 0], sizes = [1, 32, 8], strides = [1, 1, 1]} : vector<4x32x8xbf16> to vector<1x32x8xbf16>
    %135 = vector.shape_cast %134 : vector<1x32x8xbf16> to vector<32x8xbf16>
    %cst_47 = arith.constant dense<0.000000e+00> : vector<8x8xf32>
    %136 = tpu.matmul %38, %135, %cst_47 {dimension_numbers = #tpu.dot_dimension_numbers<[1], [0], [0], [1], [0, 0, 1, 1], [], []>} : vector<8x32xbf16>, vector<32x8xbf16>, vector<8x8xf32> -> vector<8x8xf32>
    %137 = vector.extract_strided_slice %30 {offsets = [2, 0, 0], sizes = [1, 1, 8], strides = [1, 1, 1]} : vector<4x1x8xf32> to vector<1x1x8xf32>
    %138 = vector.shape_cast %137 : vector<1x1x8xf32> to vector<1x8xf32>
    %139 = vector.broadcast %138 : vector<1x8xf32> to vector<8x8xf32>
    %140 = arith.addf %136, %139 : vector<8x8xf32>
    %141 = vector.extract_strided_slice %31 {offsets = [2, 0, 0], sizes = [1, 32, 8], strides = [1, 1, 1]} : vector<4x32x8xbf16> to vector<1x32x8xbf16>
    %142 = vector.shape_cast %141 : vector<1x32x8xbf16> to vector<32x8xbf16>
    %cst_48 = arith.constant dense<0.000000e+00> : vector<8x8xf32>
    %143 = tpu.matmul %38, %142, %cst_48 {dimension_numbers = #tpu.dot_dimension_numbers<[1], [0], [0], [1], [0, 0, 1, 1], [], []>} : vector<8x32xbf16>, vector<32x8xbf16>, vector<8x8xf32> -> vector<8x8xf32>
    %144 = vector.extract_strided_slice %32 {offsets = [2, 0, 0], sizes = [1, 1, 8], strides = [1, 1, 1]} : vector<4x1x8xf32> to vector<1x1x8xf32>
    %145 = vector.shape_cast %144 : vector<1x1x8xf32> to vector<1x8xf32>
    %146 = vector.broadcast %145 : vector<1x8xf32> to vector<8x8xf32>
    %147 = arith.addf %143, %146 : vector<8x8xf32>
    %148 = arith.truncf %133 : vector<8x8xf32> to vector<8x8xbf16>
    %149 = arith.truncf %140 : vector<8x8xf32> to vector<8x8xbf16>
    %cst_49 = arith.constant dense<0.000000e+00> : vector<8x8xf32>
    %150 = tpu.matmul %148, %149, %cst_49 {dimension_numbers = #tpu.dot_dimension_numbers<[1], [1], [0], [0], [0, 0, 1, 0], [], []>} : vector<8x8xbf16>, vector<8x8xbf16>, vector<8x8xf32> -> vector<8x8xf32>
    %cst_50 = arith.constant -1.000000e+10 : f32
    %151 = vector.broadcast %cst_50 : f32 to vector<8x8xf32>
    %152 = arith.select %16, %150, %151 : vector<8x8xi1>, vector<8x8xf32>
    %cst_51 = arith.constant dense<0xFF800000> : vector<8xf32>
    %153 = vector.multi_reduction <maximumf>, %152, %cst_51 [1] : vector<8x8xf32> to vector<8xf32>
    %154 = vector.shape_cast %153 : vector<8xf32> to vector<8x1xf32>
    %155 = vector.broadcast %154 : vector<8x1xf32> to vector<8x8xf32>
    %156 = arith.subf %152, %155 : vector<8x8xf32>
    %157 = math.exp %156 : vector<8x8xf32>
    %cst_52 = arith.constant dense<0.000000e+00> : vector<8xf32>
    %158 = vector.multi_reduction <add>, %157, %cst_52 [1] : vector<8x8xf32> to vector<8xf32>
    %159 = vector.shape_cast %158 : vector<8xf32> to vector<8x1xf32>
    %160 = vector.broadcast %159 : vector<8x1xf32> to vector<8x8xf32>
    %161 = arith.divf %157, %160 : vector<8x8xf32>
    %162 = arith.truncf %161 : vector<8x8xf32> to vector<8x8xbf16>
    %163 = arith.truncf %147 : vector<8x8xf32> to vector<8x8xbf16>
    %cst_53 = arith.constant dense<0.000000e+00> : vector<8x8xf32>
    %164 = tpu.matmul %162, %163, %cst_53 {dimension_numbers = #tpu.dot_dimension_numbers<[1], [0], [0], [1], [0, 0, 1, 1], [], []>} : vector<8x8xbf16>, vector<8x8xbf16>, vector<8x8xf32> -> vector<8x8xf32>
    %165 = arith.truncf %164 : vector<8x8xf32> to vector<8x8xbf16>
    %166 = vector.extract_strided_slice %34 {offsets = [2, 0, 0], sizes = [1, 8, 32], strides = [1, 1, 1]} : vector<4x8x32xbf16> to vector<1x8x32xbf16>
    %167 = vector.shape_cast %166 : vector<1x8x32xbf16> to vector<8x32xbf16>
    %cst_54 = arith.constant dense<0.000000e+00> : vector<8x32xf32>
    %168 = tpu.matmul %165, %167, %cst_54 {dimension_numbers = #tpu.dot_dimension_numbers<[1], [0], [0], [1], [0, 0, 1, 1], [], []>} : vector<8x8xbf16>, vector<8x32xbf16>, vector<8x32xf32> -> vector<8x32xf32>
    %169 = arith.addf %126, %168 : vector<8x32xf32>
    %170 = vector.extract_strided_slice %27 {offsets = [3, 0, 0], sizes = [1, 32, 8], strides = [1, 1, 1]} : vector<4x32x8xbf16> to vector<1x32x8xbf16>
    %171 = vector.shape_cast %170 : vector<1x32x8xbf16> to vector<32x8xbf16>
    %cst_55 = arith.constant dense<0.000000e+00> : vector<8x8xf32>
    %172 = tpu.matmul %37, %171, %cst_55 {dimension_numbers = #tpu.dot_dimension_numbers<[1], [0], [0], [1], [0, 0, 1, 1], [], []>} : vector<8x32xbf16>, vector<32x8xbf16>, vector<8x8xf32> -> vector<8x8xf32>
    %173 = vector.extract_strided_slice %28 {offsets = [3, 0, 0], sizes = [1, 1, 8], strides = [1, 1, 1]} : vector<4x1x8xf32> to vector<1x1x8xf32>
    %174 = vector.shape_cast %173 : vector<1x1x8xf32> to vector<1x8xf32>
    %175 = vector.broadcast %174 : vector<1x8xf32> to vector<8x8xf32>
    %176 = arith.addf %172, %175 : vector<8x8xf32>
    %177 = vector.extract_strided_slice %29 {offsets = [3, 0, 0], sizes = [1, 32, 8], strides = [1, 1, 1]} : vector<4x32x8xbf16> to vector<1x32x8xbf16>
    %178 = vector.shape_cast %177 : vector<1x32x8xbf16> to vector<32x8xbf16>
    %cst_56 = arith.constant dense<0.000000e+00> : vector<8x8xf32>
    %179 = tpu.matmul %38, %178, %cst_56 {dimension_numbers = #tpu.dot_dimension_numbers<[1], [0], [0], [1], [0, 0, 1, 1], [], []>} : vector<8x32xbf16>, vector<32x8xbf16>, vector<8x8xf32> -> vector<8x8xf32>
    %180 = vector.extract_strided_slice %30 {offsets = [3, 0, 0], sizes = [1, 1, 8], strides = [1, 1, 1]} : vector<4x1x8xf32> to vector<1x1x8xf32>
    %181 = vector.shape_cast %180 : vector<1x1x8xf32> to vector<1x8xf32>
    %182 = vector.broadcast %181 : vector<1x8xf32> to vector<8x8xf32>
    %183 = arith.addf %179, %182 : vector<8x8xf32>
    %184 = vector.extract_strided_slice %31 {offsets = [3, 0, 0], sizes = [1, 32, 8], strides = [1, 1, 1]} : vector<4x32x8xbf16> to vector<1x32x8xbf16>
    %185 = vector.shape_cast %184 : vector<1x32x8xbf16> to vector<32x8xbf16>
    %cst_57 = arith.constant dense<0.000000e+00> : vector<8x8xf32>
    %186 = tpu.matmul %38, %185, %cst_57 {dimension_numbers = #tpu.dot_dimension_numbers<[1], [0], [0], [1], [0, 0, 1, 1], [], []>} : vector<8x32xbf16>, vector<32x8xbf16>, vector<8x8xf32> -> vector<8x8xf32>
    %187 = vector.extract_strided_slice %32 {offsets = [3, 0, 0], sizes = [1, 1, 8], strides = [1, 1, 1]} : vector<4x1x8xf32> to vector<1x1x8xf32>
    %188 = vector.shape_cast %187 : vector<1x1x8xf32> to vector<1x8xf32>
    %189 = vector.broadcast %188 : vector<1x8xf32> to vector<8x8xf32>
    %190 = arith.addf %186, %189 : vector<8x8xf32>
    %191 = arith.truncf %176 : vector<8x8xf32> to vector<8x8xbf16>
    %192 = arith.truncf %183 : vector<8x8xf32> to vector<8x8xbf16>
    %cst_58 = arith.constant dense<0.000000e+00> : vector<8x8xf32>
    %193 = tpu.matmul %191, %192, %cst_58 {dimension_numbers = #tpu.dot_dimension_numbers<[1], [1], [0], [0], [0, 0, 1, 0], [], []>} : vector<8x8xbf16>, vector<8x8xbf16>, vector<8x8xf32> -> vector<8x8xf32>
    %cst_59 = arith.constant -1.000000e+10 : f32
    %194 = vector.broadcast %cst_59 : f32 to vector<8x8xf32>
    %195 = arith.select %16, %193, %194 : vector<8x8xi1>, vector<8x8xf32>
    %cst_60 = arith.constant dense<0xFF800000> : vector<8xf32>
    %196 = vector.multi_reduction <maximumf>, %195, %cst_60 [1] : vector<8x8xf32> to vector<8xf32>
    %197 = vector.shape_cast %196 : vector<8xf32> to vector<8x1xf32>
    %198 = vector.broadcast %197 : vector<8x1xf32> to vector<8x8xf32>
    %199 = arith.subf %195, %198 : vector<8x8xf32>
    %200 = math.exp %199 : vector<8x8xf32>
    %cst_61 = arith.constant dense<0.000000e+00> : vector<8xf32>
    %201 = vector.multi_reduction <add>, %200, %cst_61 [1] : vector<8x8xf32> to vector<8xf32>
    %202 = vector.shape_cast %201 : vector<8xf32> to vector<8x1xf32>
    %203 = vector.broadcast %202 : vector<8x1xf32> to vector<8x8xf32>
    %204 = arith.divf %200, %203 : vector<8x8xf32>
    %205 = arith.truncf %204 : vector<8x8xf32> to vector<8x8xbf16>
    %206 = arith.truncf %190 : vector<8x8xf32> to vector<8x8xbf16>
    %cst_62 = arith.constant dense<0.000000e+00> : vector<8x8xf32>
    %207 = tpu.matmul %205, %206, %cst_62 {dimension_numbers = #tpu.dot_dimension_numbers<[1], [0], [0], [1], [0, 0, 1, 1], [], []>} : vector<8x8xbf16>, vector<8x8xbf16>, vector<8x8xf32> -> vector<8x8xf32>
    %208 = arith.truncf %207 : vector<8x8xf32> to vector<8x8xbf16>
    %209 = vector.extract_strided_slice %34 {offsets = [3, 0, 0], sizes = [1, 8, 32], strides = [1, 1, 1]} : vector<4x8x32xbf16> to vector<1x8x32xbf16>
    %210 = vector.shape_cast %209 : vector<1x8x32xbf16> to vector<8x32xbf16>
    %cst_63 = arith.constant dense<0.000000e+00> : vector<8x32xf32>
    %211 = tpu.matmul %208, %210, %cst_63 {dimension_numbers = #tpu.dot_dimension_numbers<[1], [0], [0], [1], [0, 0, 1, 1], [], []>} : vector<8x8xbf16>, vector<8x32xbf16>, vector<8x32xf32> -> vector<8x32xf32>
    %212 = arith.addf %169, %211 : vector<8x32xf32>
    %213 = arith.addf %4, %212 : vector<8x32xf32>
    %c0_64 = arith.constant 0 : index
    %c0_65 = arith.constant 0 : index
    %c0_66 = arith.constant 0 : index
    %214 = vector.load %arg10[%c0_64, %c0_65, %c0_66] : memref<1x1x32xf32, #tpu.memory_space<vmem>>, vector<1x1x32xf32>
    %215 = vector.shape_cast %214 : vector<1x1x32xf32> to vector<1x32xf32>
    %c0_67 = arith.constant 0 : index
    %c0_68 = arith.constant 0 : index
    %c0_69 = arith.constant 0 : index
    %216 = vector.load %arg11[%c0_67, %c0_68, %c0_69] : memref<1x1x32xf32, #tpu.memory_space<vmem>>, vector<1x1x32xf32>
    %217 = vector.shape_cast %216 : vector<1x1x32xf32> to vector<1x32xf32>
    %cst_70 = arith.constant dense<0.000000e+00> : vector<8xf32>
    %218 = vector.multi_reduction <add>, %213, %cst_70 [1] : vector<8x32xf32> to vector<8xf32>
    %219 = vector.shape_cast %218 : vector<8xf32> to vector<8x1xf32>
    %cst_71 = arith.constant 3.200000e+01 : f32
    %220 = vector.broadcast %cst_71 : f32 to vector<8x1xf32>
    %221 = arith.divf %219, %220 : vector<8x1xf32>
    %222 = vector.broadcast %221 : vector<8x1xf32> to vector<8x32xf32>
    %223 = arith.subf %213, %222 : vector<8x32xf32>
    %224 = arith.mulf %223, %223 : vector<8x32xf32>
    %cst_72 = arith.constant dense<0.000000e+00> : vector<8xf32>
    %225 = vector.multi_reduction <add>, %224, %cst_72 [1] : vector<8x32xf32> to vector<8xf32>
    %226 = vector.shape_cast %225 : vector<8xf32> to vector<8x1xf32>
    %cst_73 = arith.constant 3.200000e+01 : f32
    %227 = vector.broadcast %cst_73 : f32 to vector<8x1xf32>
    %228 = arith.divf %226, %227 : vector<8x1xf32>
    %cst_74 = arith.constant 9.99999974E-6 : f32
    %229 = vector.broadcast %cst_74 : f32 to vector<8x1xf32>
    %230 = arith.addf %228, %229 : vector<8x1xf32>
    %231 = math.rsqrt %230 : vector<8x1xf32>
    %232 = vector.broadcast %231 : vector<8x1xf32> to vector<8x32xf32>
    %233 = arith.mulf %223, %232 : vector<8x32xf32>
    %234 = vector.broadcast %215 : vector<1x32xf32> to vector<8x32xf32>
    %235 = arith.mulf %233, %234 : vector<8x32xf32>
    %236 = vector.broadcast %217 : vector<1x32xf32> to vector<8x32xf32>
    %237 = arith.addf %235, %236 : vector<8x32xf32>
    %c0_75 = arith.constant 0 : index
    %c0_76 = arith.constant 0 : index
    %c0_77 = arith.constant 0 : index
    %c0_78 = arith.constant 0 : index
    %238 = vector.load %arg14[%c0_75, %c0_76, %c0_77, %c0_78] : memref<1x8x32x8xbf16, #tpu.memory_space<vmem>>, vector<1x8x32x8xbf16>
    %239 = vector.shape_cast %238 : vector<1x8x32x8xbf16> to vector<8x32x8xbf16>
    %c0_79 = arith.constant 0 : index
    %c0_80 = arith.constant 0 : index
    %c0_81 = arith.constant 0 : index
    %c0_82 = arith.constant 0 : index
    %240 = vector.load %arg15[%c0_79, %c0_80, %c0_81, %c0_82] : memref<1x8x1x8xf32, #tpu.memory_space<vmem>>, vector<1x8x1x8xf32>
    %241 = vector.shape_cast %240 : vector<1x8x1x8xf32> to vector<8x1x8xf32>
    %c0_83 = arith.constant 0 : index
    %c0_84 = arith.constant 0 : index
    %c0_85 = arith.constant 0 : index
    %c0_86 = arith.constant 0 : index
    %242 = vector.load %arg12[%c0_83, %c0_84, %c0_85, %c0_86] : memref<1x4x32x8xbf16, #tpu.memory_space<vmem>>, vector<1x4x32x8xbf16>
    %243 = vector.shape_cast %242 : vector<1x4x32x8xbf16> to vector<4x32x8xbf16>
    %c0_87 = arith.constant 0 : index
    %c0_88 = arith.constant 0 : index
    %c0_89 = arith.constant 0 : index
    %c0_90 = arith.constant 0 : index
    %244 = vector.load %arg13[%c0_87, %c0_88, %c0_89, %c0_90] : memref<1x4x1x8xf32, #tpu.memory_space<vmem>>, vector<1x4x1x8xf32>
    %245 = vector.shape_cast %244 : vector<1x4x1x8xf32> to vector<4x1x8xf32>
    %246 = vector.extract_strided_slice %239 {offsets = [0, 0, 0], sizes = [4, 32, 8], strides = [1, 1, 1]} : vector<8x32x8xbf16> to vector<4x32x8xbf16>
    %247 = vector.extract_strided_slice %241 {offsets = [0, 0, 0], sizes = [4, 1, 8], strides = [1, 1, 1]} : vector<8x1x8xf32> to vector<4x1x8xf32>
    %248 = vector.extract_strided_slice %239 {offsets = [4, 0, 0], sizes = [4, 32, 8], strides = [1, 1, 1]} : vector<8x32x8xbf16> to vector<4x32x8xbf16>
    %249 = vector.extract_strided_slice %241 {offsets = [4, 0, 0], sizes = [4, 1, 8], strides = [1, 1, 1]} : vector<8x1x8xf32> to vector<4x1x8xf32>
    %c0_91 = arith.constant 0 : index
    %c0_92 = arith.constant 0 : index
    %c0_93 = arith.constant 0 : index
    %c0_94 = arith.constant 0 : index
    %250 = vector.load %arg16[%c0_91, %c0_92, %c0_93, %c0_94] : memref<1x4x8x32xbf16, #tpu.memory_space<vmem>>, vector<1x4x8x32xbf16>
    %251 = vector.shape_cast %250 : vector<1x4x8x32xbf16> to vector<4x8x32xbf16>
    %c0_95 = arith.constant 0 : index
    %c0_96 = arith.constant 0 : index
    %c0_97 = arith.constant 0 : index
    %252 = vector.load %arg17[%c0_95, %c0_96, %c0_97] : memref<1x1x32xf32, #tpu.memory_space<vmem>>, vector<1x1x32xf32>
    %253 = vector.shape_cast %252 : vector<1x1x32xf32> to vector<1x32xf32>
    %254 = arith.truncf %237 : vector<8x32xf32> to vector<8x32xbf16>
    %255 = arith.truncf %6 : vector<10x32xf32> to vector<10x32xbf16>
    %256 = vector.shape_cast %253 : vector<1x32xf32> to vector<1x32xf32>
    %257 = vector.broadcast %256 : vector<1x32xf32> to vector<8x32xf32>
    %258 = vector.extract_strided_slice %243 {offsets = [0, 0, 0], sizes = [1, 32, 8], strides = [1, 1, 1]} : vector<4x32x8xbf16> to vector<1x32x8xbf16>
    %259 = vector.shape_cast %258 : vector<1x32x8xbf16> to vector<32x8xbf16>
    %cst_98 = arith.constant dense<0.000000e+00> : vector<8x8xf32>
    %260 = tpu.matmul %254, %259, %cst_98 {dimension_numbers = #tpu.dot_dimension_numbers<[1], [0], [0], [1], [0, 0, 1, 1], [], []>} : vector<8x32xbf16>, vector<32x8xbf16>, vector<8x8xf32> -> vector<8x8xf32>
    %261 = vector.extract_strided_slice %245 {offsets = [0, 0, 0], sizes = [1, 1, 8], strides = [1, 1, 1]} : vector<4x1x8xf32> to vector<1x1x8xf32>
    %262 = vector.shape_cast %261 : vector<1x1x8xf32> to vector<1x8xf32>
    %263 = vector.broadcast %262 : vector<1x8xf32> to vector<8x8xf32>
    %264 = arith.addf %260, %263 : vector<8x8xf32>
    %265 = vector.extract_strided_slice %246 {offsets = [0, 0, 0], sizes = [1, 32, 8], strides = [1, 1, 1]} : vector<4x32x8xbf16> to vector<1x32x8xbf16>
    %266 = vector.shape_cast %265 : vector<1x32x8xbf16> to vector<32x8xbf16>
    %cst_99 = arith.constant dense<0.000000e+00> : vector<10x8xf32>
    %267 = tpu.matmul %255, %266, %cst_99 {dimension_numbers = #tpu.dot_dimension_numbers<[1], [0], [0], [1], [0, 0, 1, 1], [], []>} : vector<10x32xbf16>, vector<32x8xbf16>, vector<10x8xf32> -> vector<10x8xf32>
    %268 = vector.extract_strided_slice %247 {offsets = [0, 0, 0], sizes = [1, 1, 8], strides = [1, 1, 1]} : vector<4x1x8xf32> to vector<1x1x8xf32>
    %269 = vector.shape_cast %268 : vector<1x1x8xf32> to vector<1x8xf32>
    %270 = vector.broadcast %269 : vector<1x8xf32> to vector<10x8xf32>
    %271 = arith.addf %267, %270 : vector<10x8xf32>
    %272 = vector.extract_strided_slice %248 {offsets = [0, 0, 0], sizes = [1, 32, 8], strides = [1, 1, 1]} : vector<4x32x8xbf16> to vector<1x32x8xbf16>
    %273 = vector.shape_cast %272 : vector<1x32x8xbf16> to vector<32x8xbf16>
    %cst_100 = arith.constant dense<0.000000e+00> : vector<10x8xf32>
    %274 = tpu.matmul %255, %273, %cst_100 {dimension_numbers = #tpu.dot_dimension_numbers<[1], [0], [0], [1], [0, 0, 1, 1], [], []>} : vector<10x32xbf16>, vector<32x8xbf16>, vector<10x8xf32> -> vector<10x8xf32>
    %275 = vector.extract_strided_slice %249 {offsets = [0, 0, 0], sizes = [1, 1, 8], strides = [1, 1, 1]} : vector<4x1x8xf32> to vector<1x1x8xf32>
    %276 = vector.shape_cast %275 : vector<1x1x8xf32> to vector<1x8xf32>
    %277 = vector.broadcast %276 : vector<1x8xf32> to vector<10x8xf32>
    %278 = arith.addf %274, %277 : vector<10x8xf32>
    %279 = arith.truncf %264 : vector<8x8xf32> to vector<8x8xbf16>
    %280 = arith.truncf %271 : vector<10x8xf32> to vector<10x8xbf16>
    %cst_101 = arith.constant dense<0.000000e+00> : vector<8x10xf32>
    %281 = tpu.matmul %279, %280, %cst_101 {dimension_numbers = #tpu.dot_dimension_numbers<[1], [1], [0], [0], [0, 0, 1, 0], [], []>} : vector<8x8xbf16>, vector<10x8xbf16>, vector<8x10xf32> -> vector<8x10xf32>
    %cst_102 = arith.constant -1.000000e+10 : f32
    %282 = vector.broadcast %cst_102 : f32 to vector<8x10xf32>
    %283 = arith.select %22, %281, %282 : vector<8x10xi1>, vector<8x10xf32>
    %cst_103 = arith.constant dense<0xFF800000> : vector<8xf32>
    %284 = vector.multi_reduction <maximumf>, %283, %cst_103 [1] : vector<8x10xf32> to vector<8xf32>
    %285 = vector.shape_cast %284 : vector<8xf32> to vector<8x1xf32>
    %286 = vector.broadcast %285 : vector<8x1xf32> to vector<8x10xf32>
    %287 = arith.subf %283, %286 : vector<8x10xf32>
    %288 = math.exp %287 : vector<8x10xf32>
    %cst_104 = arith.constant dense<0.000000e+00> : vector<8xf32>
    %289 = vector.multi_reduction <add>, %288, %cst_104 [1] : vector<8x10xf32> to vector<8xf32>
    %290 = vector.shape_cast %289 : vector<8xf32> to vector<8x1xf32>
    %291 = vector.broadcast %290 : vector<8x1xf32> to vector<8x10xf32>
    %292 = arith.divf %288, %291 : vector<8x10xf32>
    %293 = arith.truncf %292 : vector<8x10xf32> to vector<8x10xbf16>
    %294 = arith.truncf %278 : vector<10x8xf32> to vector<10x8xbf16>
    %cst_105 = arith.constant dense<0.000000e+00> : vector<8x8xf32>
    %295 = tpu.matmul %293, %294, %cst_105 {dimension_numbers = #tpu.dot_dimension_numbers<[1], [0], [0], [1], [0, 0, 1, 1], [], []>} : vector<8x10xbf16>, vector<10x8xbf16>, vector<8x8xf32> -> vector<8x8xf32>
    %296 = arith.truncf %295 : vector<8x8xf32> to vector<8x8xbf16>
    %297 = vector.extract_strided_slice %251 {offsets = [0, 0, 0], sizes = [1, 8, 32], strides = [1, 1, 1]} : vector<4x8x32xbf16> to vector<1x8x32xbf16>
    %298 = vector.shape_cast %297 : vector<1x8x32xbf16> to vector<8x32xbf16>
    %cst_106 = arith.constant dense<0.000000e+00> : vector<8x32xf32>
    %299 = tpu.matmul %296, %298, %cst_106 {dimension_numbers = #tpu.dot_dimension_numbers<[1], [0], [0], [1], [0, 0, 1, 1], [], []>} : vector<8x8xbf16>, vector<8x32xbf16>, vector<8x32xf32> -> vector<8x32xf32>
    %300 = arith.addf %257, %299 : vector<8x32xf32>
    %301 = vector.extract_strided_slice %243 {offsets = [1, 0, 0], sizes = [1, 32, 8], strides = [1, 1, 1]} : vector<4x32x8xbf16> to vector<1x32x8xbf16>
    %302 = vector.shape_cast %301 : vector<1x32x8xbf16> to vector<32x8xbf16>
    %cst_107 = arith.constant dense<0.000000e+00> : vector<8x8xf32>
    %303 = tpu.matmul %254, %302, %cst_107 {dimension_numbers = #tpu.dot_dimension_numbers<[1], [0], [0], [1], [0, 0, 1, 1], [], []>} : vector<8x32xbf16>, vector<32x8xbf16>, vector<8x8xf32> -> vector<8x8xf32>
    %304 = vector.extract_strided_slice %245 {offsets = [1, 0, 0], sizes = [1, 1, 8], strides = [1, 1, 1]} : vector<4x1x8xf32> to vector<1x1x8xf32>
    %305 = vector.shape_cast %304 : vector<1x1x8xf32> to vector<1x8xf32>
    %306 = vector.broadcast %305 : vector<1x8xf32> to vector<8x8xf32>
    %307 = arith.addf %303, %306 : vector<8x8xf32>
    %308 = vector.extract_strided_slice %246 {offsets = [1, 0, 0], sizes = [1, 32, 8], strides = [1, 1, 1]} : vector<4x32x8xbf16> to vector<1x32x8xbf16>
    %309 = vector.shape_cast %308 : vector<1x32x8xbf16> to vector<32x8xbf16>
    %cst_108 = arith.constant dense<0.000000e+00> : vector<10x8xf32>
    %310 = tpu.matmul %255, %309, %cst_108 {dimension_numbers = #tpu.dot_dimension_numbers<[1], [0], [0], [1], [0, 0, 1, 1], [], []>} : vector<10x32xbf16>, vector<32x8xbf16>, vector<10x8xf32> -> vector<10x8xf32>
    %311 = vector.extract_strided_slice %247 {offsets = [1, 0, 0], sizes = [1, 1, 8], strides = [1, 1, 1]} : vector<4x1x8xf32> to vector<1x1x8xf32>
    %312 = vector.shape_cast %311 : vector<1x1x8xf32> to vector<1x8xf32>
    %313 = vector.broadcast %312 : vector<1x8xf32> to vector<10x8xf32>
    %314 = arith.addf %310, %313 : vector<10x8xf32>
    %315 = vector.extract_strided_slice %248 {offsets = [1, 0, 0], sizes = [1, 32, 8], strides = [1, 1, 1]} : vector<4x32x8xbf16> to vector<1x32x8xbf16>
    %316 = vector.shape_cast %315 : vector<1x32x8xbf16> to vector<32x8xbf16>
    %cst_109 = arith.constant dense<0.000000e+00> : vector<10x8xf32>
    %317 = tpu.matmul %255, %316, %cst_109 {dimension_numbers = #tpu.dot_dimension_numbers<[1], [0], [0], [1], [0, 0, 1, 1], [], []>} : vector<10x32xbf16>, vector<32x8xbf16>, vector<10x8xf32> -> vector<10x8xf32>
    %318 = vector.extract_strided_slice %249 {offsets = [1, 0, 0], sizes = [1, 1, 8], strides = [1, 1, 1]} : vector<4x1x8xf32> to vector<1x1x8xf32>
    %319 = vector.shape_cast %318 : vector<1x1x8xf32> to vector<1x8xf32>
    %320 = vector.broadcast %319 : vector<1x8xf32> to vector<10x8xf32>
    %321 = arith.addf %317, %320 : vector<10x8xf32>
    %322 = arith.truncf %307 : vector<8x8xf32> to vector<8x8xbf16>
    %323 = arith.truncf %314 : vector<10x8xf32> to vector<10x8xbf16>
    %cst_110 = arith.constant dense<0.000000e+00> : vector<8x10xf32>
    %324 = tpu.matmul %322, %323, %cst_110 {dimension_numbers = #tpu.dot_dimension_numbers<[1], [1], [0], [0], [0, 0, 1, 0], [], []>} : vector<8x8xbf16>, vector<10x8xbf16>, vector<8x10xf32> -> vector<8x10xf32>
    %cst_111 = arith.constant -1.000000e+10 : f32
    %325 = vector.broadcast %cst_111 : f32 to vector<8x10xf32>
    %326 = arith.select %22, %324, %325 : vector<8x10xi1>, vector<8x10xf32>
    %cst_112 = arith.constant dense<0xFF800000> : vector<8xf32>
    %327 = vector.multi_reduction <maximumf>, %326, %cst_112 [1] : vector<8x10xf32> to vector<8xf32>
    %328 = vector.shape_cast %327 : vector<8xf32> to vector<8x1xf32>
    %329 = vector.broadcast %328 : vector<8x1xf32> to vector<8x10xf32>
    %330 = arith.subf %326, %329 : vector<8x10xf32>
    %331 = math.exp %330 : vector<8x10xf32>
    %cst_113 = arith.constant dense<0.000000e+00> : vector<8xf32>
    %332 = vector.multi_reduction <add>, %331, %cst_113 [1] : vector<8x10xf32> to vector<8xf32>
    %333 = vector.shape_cast %332 : vector<8xf32> to vector<8x1xf32>
    %334 = vector.broadcast %333 : vector<8x1xf32> to vector<8x10xf32>
    %335 = arith.divf %331, %334 : vector<8x10xf32>
    %336 = arith.truncf %335 : vector<8x10xf32> to vector<8x10xbf16>
    %337 = arith.truncf %321 : vector<10x8xf32> to vector<10x8xbf16>
    %cst_114 = arith.constant dense<0.000000e+00> : vector<8x8xf32>
    %338 = tpu.matmul %336, %337, %cst_114 {dimension_numbers = #tpu.dot_dimension_numbers<[1], [0], [0], [1], [0, 0, 1, 1], [], []>} : vector<8x10xbf16>, vector<10x8xbf16>, vector<8x8xf32> -> vector<8x8xf32>
    %339 = arith.truncf %338 : vector<8x8xf32> to vector<8x8xbf16>
    %340 = vector.extract_strided_slice %251 {offsets = [1, 0, 0], sizes = [1, 8, 32], strides = [1, 1, 1]} : vector<4x8x32xbf16> to vector<1x8x32xbf16>
    %341 = vector.shape_cast %340 : vector<1x8x32xbf16> to vector<8x32xbf16>
    %cst_115 = arith.constant dense<0.000000e+00> : vector<8x32xf32>
    %342 = tpu.matmul %339, %341, %cst_115 {dimension_numbers = #tpu.dot_dimension_numbers<[1], [0], [0], [1], [0, 0, 1, 1], [], []>} : vector<8x8xbf16>, vector<8x32xbf16>, vector<8x32xf32> -> vector<8x32xf32>
    %343 = arith.addf %300, %342 : vector<8x32xf32>
    %344 = vector.extract_strided_slice %243 {offsets = [2, 0, 0], sizes = [1, 32, 8], strides = [1, 1, 1]} : vector<4x32x8xbf16> to vector<1x32x8xbf16>
    %345 = vector.shape_cast %344 : vector<1x32x8xbf16> to vector<32x8xbf16>
    %cst_116 = arith.constant dense<0.000000e+00> : vector<8x8xf32>
    %346 = tpu.matmul %254, %345, %cst_116 {dimension_numbers = #tpu.dot_dimension_numbers<[1], [0], [0], [1], [0, 0, 1, 1], [], []>} : vector<8x32xbf16>, vector<32x8xbf16>, vector<8x8xf32> -> vector<8x8xf32>
    %347 = vector.extract_strided_slice %245 {offsets = [2, 0, 0], sizes = [1, 1, 8], strides = [1, 1, 1]} : vector<4x1x8xf32> to vector<1x1x8xf32>
    %348 = vector.shape_cast %347 : vector<1x1x8xf32> to vector<1x8xf32>
    %349 = vector.broadcast %348 : vector<1x8xf32> to vector<8x8xf32>
    %350 = arith.addf %346, %349 : vector<8x8xf32>
    %351 = vector.extract_strided_slice %246 {offsets = [2, 0, 0], sizes = [1, 32, 8], strides = [1, 1, 1]} : vector<4x32x8xbf16> to vector<1x32x8xbf16>
    %352 = vector.shape_cast %351 : vector<1x32x8xbf16> to vector<32x8xbf16>
    %cst_117 = arith.constant dense<0.000000e+00> : vector<10x8xf32>
    %353 = tpu.matmul %255, %352, %cst_117 {dimension_numbers = #tpu.dot_dimension_numbers<[1], [0], [0], [1], [0, 0, 1, 1], [], []>} : vector<10x32xbf16>, vector<32x8xbf16>, vector<10x8xf32> -> vector<10x8xf32>
    %354 = vector.extract_strided_slice %247 {offsets = [2, 0, 0], sizes = [1, 1, 8], strides = [1, 1, 1]} : vector<4x1x8xf32> to vector<1x1x8xf32>
    %355 = vector.shape_cast %354 : vector<1x1x8xf32> to vector<1x8xf32>
    %356 = vector.broadcast %355 : vector<1x8xf32> to vector<10x8xf32>
    %357 = arith.addf %353, %356 : vector<10x8xf32>
    %358 = vector.extract_strided_slice %248 {offsets = [2, 0, 0], sizes = [1, 32, 8], strides = [1, 1, 1]} : vector<4x32x8xbf16> to vector<1x32x8xbf16>
    %359 = vector.shape_cast %358 : vector<1x32x8xbf16> to vector<32x8xbf16>
    %cst_118 = arith.constant dense<0.000000e+00> : vector<10x8xf32>
    %360 = tpu.matmul %255, %359, %cst_118 {dimension_numbers = #tpu.dot_dimension_numbers<[1], [0], [0], [1], [0, 0, 1, 1], [], []>} : vector<10x32xbf16>, vector<32x8xbf16>, vector<10x8xf32> -> vector<10x8xf32>
    %361 = vector.extract_strided_slice %249 {offsets = [2, 0, 0], sizes = [1, 1, 8], strides = [1, 1, 1]} : vector<4x1x8xf32> to vector<1x1x8xf32>
    %362 = vector.shape_cast %361 : vector<1x1x8xf32> to vector<1x8xf32>
    %363 = vector.broadcast %362 : vector<1x8xf32> to vector<10x8xf32>
    %364 = arith.addf %360, %363 : vector<10x8xf32>
    %365 = arith.truncf %350 : vector<8x8xf32> to vector<8x8xbf16>
    %366 = arith.truncf %357 : vector<10x8xf32> to vector<10x8xbf16>
    %cst_119 = arith.constant dense<0.000000e+00> : vector<8x10xf32>
    %367 = tpu.matmul %365, %366, %cst_119 {dimension_numbers = #tpu.dot_dimension_numbers<[1], [1], [0], [0], [0, 0, 1, 0], [], []>} : vector<8x8xbf16>, vector<10x8xbf16>, vector<8x10xf32> -> vector<8x10xf32>
    %cst_120 = arith.constant -1.000000e+10 : f32
    %368 = vector.broadcast %cst_120 : f32 to vector<8x10xf32>
    %369 = arith.select %22, %367, %368 : vector<8x10xi1>, vector<8x10xf32>
    %cst_121 = arith.constant dense<0xFF800000> : vector<8xf32>
    %370 = vector.multi_reduction <maximumf>, %369, %cst_121 [1] : vector<8x10xf32> to vector<8xf32>
    %371 = vector.shape_cast %370 : vector<8xf32> to vector<8x1xf32>
    %372 = vector.broadcast %371 : vector<8x1xf32> to vector<8x10xf32>
    %373 = arith.subf %369, %372 : vector<8x10xf32>
    %374 = math.exp %373 : vector<8x10xf32>
    %cst_122 = arith.constant dense<0.000000e+00> : vector<8xf32>
    %375 = vector.multi_reduction <add>, %374, %cst_122 [1] : vector<8x10xf32> to vector<8xf32>
    %376 = vector.shape_cast %375 : vector<8xf32> to vector<8x1xf32>
    %377 = vector.broadcast %376 : vector<8x1xf32> to vector<8x10xf32>
    %378 = arith.divf %374, %377 : vector<8x10xf32>
    %379 = arith.truncf %378 : vector<8x10xf32> to vector<8x10xbf16>
    %380 = arith.truncf %364 : vector<10x8xf32> to vector<10x8xbf16>
    %cst_123 = arith.constant dense<0.000000e+00> : vector<8x8xf32>
    %381 = tpu.matmul %379, %380, %cst_123 {dimension_numbers = #tpu.dot_dimension_numbers<[1], [0], [0], [1], [0, 0, 1, 1], [], []>} : vector<8x10xbf16>, vector<10x8xbf16>, vector<8x8xf32> -> vector<8x8xf32>
    %382 = arith.truncf %381 : vector<8x8xf32> to vector<8x8xbf16>
    %383 = vector.extract_strided_slice %251 {offsets = [2, 0, 0], sizes = [1, 8, 32], strides = [1, 1, 1]} : vector<4x8x32xbf16> to vector<1x8x32xbf16>
    %384 = vector.shape_cast %383 : vector<1x8x32xbf16> to vector<8x32xbf16>
    %cst_124 = arith.constant dense<0.000000e+00> : vector<8x32xf32>
    %385 = tpu.matmul %382, %384, %cst_124 {dimension_numbers = #tpu.dot_dimension_numbers<[1], [0], [0], [1], [0, 0, 1, 1], [], []>} : vector<8x8xbf16>, vector<8x32xbf16>, vector<8x32xf32> -> vector<8x32xf32>
    %386 = arith.addf %343, %385 : vector<8x32xf32>
    %387 = vector.extract_strided_slice %243 {offsets = [3, 0, 0], sizes = [1, 32, 8], strides = [1, 1, 1]} : vector<4x32x8xbf16> to vector<1x32x8xbf16>
    %388 = vector.shape_cast %387 : vector<1x32x8xbf16> to vector<32x8xbf16>
    %cst_125 = arith.constant dense<0.000000e+00> : vector<8x8xf32>
    %389 = tpu.matmul %254, %388, %cst_125 {dimension_numbers = #tpu.dot_dimension_numbers<[1], [0], [0], [1], [0, 0, 1, 1], [], []>} : vector<8x32xbf16>, vector<32x8xbf16>, vector<8x8xf32> -> vector<8x8xf32>
    %390 = vector.extract_strided_slice %245 {offsets = [3, 0, 0], sizes = [1, 1, 8], strides = [1, 1, 1]} : vector<4x1x8xf32> to vector<1x1x8xf32>
    %391 = vector.shape_cast %390 : vector<1x1x8xf32> to vector<1x8xf32>
    %392 = vector.broadcast %391 : vector<1x8xf32> to vector<8x8xf32>
    %393 = arith.addf %389, %392 : vector<8x8xf32>
    %394 = vector.extract_strided_slice %246 {offsets = [3, 0, 0], sizes = [1, 32, 8], strides = [1, 1, 1]} : vector<4x32x8xbf16> to vector<1x32x8xbf16>
    %395 = vector.shape_cast %394 : vector<1x32x8xbf16> to vector<32x8xbf16>
    %cst_126 = arith.constant dense<0.000000e+00> : vector<10x8xf32>
    %396 = tpu.matmul %255, %395, %cst_126 {dimension_numbers = #tpu.dot_dimension_numbers<[1], [0], [0], [1], [0, 0, 1, 1], [], []>} : vector<10x32xbf16>, vector<32x8xbf16>, vector<10x8xf32> -> vector<10x8xf32>
    %397 = vector.extract_strided_slice %247 {offsets = [3, 0, 0], sizes = [1, 1, 8], strides = [1, 1, 1]} : vector<4x1x8xf32> to vector<1x1x8xf32>
    %398 = vector.shape_cast %397 : vector<1x1x8xf32> to vector<1x8xf32>
    %399 = vector.broadcast %398 : vector<1x8xf32> to vector<10x8xf32>
    %400 = arith.addf %396, %399 : vector<10x8xf32>
    %401 = vector.extract_strided_slice %248 {offsets = [3, 0, 0], sizes = [1, 32, 8], strides = [1, 1, 1]} : vector<4x32x8xbf16> to vector<1x32x8xbf16>
    %402 = vector.shape_cast %401 : vector<1x32x8xbf16> to vector<32x8xbf16>
    %cst_127 = arith.constant dense<0.000000e+00> : vector<10x8xf32>
    %403 = tpu.matmul %255, %402, %cst_127 {dimension_numbers = #tpu.dot_dimension_numbers<[1], [0], [0], [1], [0, 0, 1, 1], [], []>} : vector<10x32xbf16>, vector<32x8xbf16>, vector<10x8xf32> -> vector<10x8xf32>
    %404 = vector.extract_strided_slice %249 {offsets = [3, 0, 0], sizes = [1, 1, 8], strides = [1, 1, 1]} : vector<4x1x8xf32> to vector<1x1x8xf32>
    %405 = vector.shape_cast %404 : vector<1x1x8xf32> to vector<1x8xf32>
    %406 = vector.broadcast %405 : vector<1x8xf32> to vector<10x8xf32>
    %407 = arith.addf %403, %406 : vector<10x8xf32>
    %408 = arith.truncf %393 : vector<8x8xf32> to vector<8x8xbf16>
    %409 = arith.truncf %400 : vector<10x8xf32> to vector<10x8xbf16>
    %cst_128 = arith.constant dense<0.000000e+00> : vector<8x10xf32>
    %410 = tpu.matmul %408, %409, %cst_128 {dimension_numbers = #tpu.dot_dimension_numbers<[1], [1], [0], [0], [0, 0, 1, 0], [], []>} : vector<8x8xbf16>, vector<10x8xbf16>, vector<8x10xf32> -> vector<8x10xf32>
    %cst_129 = arith.constant -1.000000e+10 : f32
    %411 = vector.broadcast %cst_129 : f32 to vector<8x10xf32>
    %412 = arith.select %22, %410, %411 : vector<8x10xi1>, vector<8x10xf32>
    %cst_130 = arith.constant dense<0xFF800000> : vector<8xf32>
    %413 = vector.multi_reduction <maximumf>, %412, %cst_130 [1] : vector<8x10xf32> to vector<8xf32>
    %414 = vector.shape_cast %413 : vector<8xf32> to vector<8x1xf32>
    %415 = vector.broadcast %414 : vector<8x1xf32> to vector<8x10xf32>
    %416 = arith.subf %412, %415 : vector<8x10xf32>
    %417 = math.exp %416 : vector<8x10xf32>
    %cst_131 = arith.constant dense<0.000000e+00> : vector<8xf32>
    %418 = vector.multi_reduction <add>, %417, %cst_131 [1] : vector<8x10xf32> to vector<8xf32>
    %419 = vector.shape_cast %418 : vector<8xf32> to vector<8x1xf32>
    %420 = vector.broadcast %419 : vector<8x1xf32> to vector<8x10xf32>
    %421 = arith.divf %417, %420 : vector<8x10xf32>
    %422 = arith.truncf %421 : vector<8x10xf32> to vector<8x10xbf16>
    %423 = arith.truncf %407 : vector<10x8xf32> to vector<10x8xbf16>
    %cst_132 = arith.constant dense<0.000000e+00> : vector<8x8xf32>
    %424 = tpu.matmul %422, %423, %cst_132 {dimension_numbers = #tpu.dot_dimension_numbers<[1], [0], [0], [1], [0, 0, 1, 1], [], []>} : vector<8x10xbf16>, vector<10x8xbf16>, vector<8x8xf32> -> vector<8x8xf32>
    %425 = arith.truncf %424 : vector<8x8xf32> to vector<8x8xbf16>
    %426 = vector.extract_strided_slice %251 {offsets = [3, 0, 0], sizes = [1, 8, 32], strides = [1, 1, 1]} : vector<4x8x32xbf16> to vector<1x8x32xbf16>
    %427 = vector.shape_cast %426 : vector<1x8x32xbf16> to vector<8x32xbf16>
    %cst_133 = arith.constant dense<0.000000e+00> : vector<8x32xf32>
    %428 = tpu.matmul %425, %427, %cst_133 {dimension_numbers = #tpu.dot_dimension_numbers<[1], [0], [0], [1], [0, 0, 1, 1], [], []>} : vector<8x8xbf16>, vector<8x32xbf16>, vector<8x32xf32> -> vector<8x32xf32>
    %429 = arith.addf %386, %428 : vector<8x32xf32>
    %430 = arith.addf %237, %429 : vector<8x32xf32>
    %c0_134 = arith.constant 0 : index
    %c0_135 = arith.constant 0 : index
    %c0_136 = arith.constant 0 : index
    %431 = vector.load %arg18[%c0_134, %c0_135, %c0_136] : memref<1x1x32xf32, #tpu.memory_space<vmem>>, vector<1x1x32xf32>
    %432 = vector.shape_cast %431 : vector<1x1x32xf32> to vector<1x32xf32>
    %c0_137 = arith.constant 0 : index
    %c0_138 = arith.constant 0 : index
    %c0_139 = arith.constant 0 : index
    %433 = vector.load %arg19[%c0_137, %c0_138, %c0_139] : memref<1x1x32xf32, #tpu.memory_space<vmem>>, vector<1x1x32xf32>
    %434 = vector.shape_cast %433 : vector<1x1x32xf32> to vector<1x32xf32>
    %cst_140 = arith.constant dense<0.000000e+00> : vector<8xf32>
    %435 = vector.multi_reduction <add>, %430, %cst_140 [1] : vector<8x32xf32> to vector<8xf32>
    %436 = vector.shape_cast %435 : vector<8xf32> to vector<8x1xf32>
    %cst_141 = arith.constant 3.200000e+01 : f32
    %437 = vector.broadcast %cst_141 : f32 to vector<8x1xf32>
    %438 = arith.divf %436, %437 : vector<8x1xf32>
    %439 = vector.broadcast %438 : vector<8x1xf32> to vector<8x32xf32>
    %440 = arith.subf %430, %439 : vector<8x32xf32>
    %441 = arith.mulf %440, %440 : vector<8x32xf32>
    %cst_142 = arith.constant dense<0.000000e+00> : vector<8xf32>
    %442 = vector.multi_reduction <add>, %441, %cst_142 [1] : vector<8x32xf32> to vector<8xf32>
    %443 = vector.shape_cast %442 : vector<8xf32> to vector<8x1xf32>
    %cst_143 = arith.constant 3.200000e+01 : f32
    %444 = vector.broadcast %cst_143 : f32 to vector<8x1xf32>
    %445 = arith.divf %443, %444 : vector<8x1xf32>
    %cst_144 = arith.constant 9.99999974E-6 : f32
    %446 = vector.broadcast %cst_144 : f32 to vector<8x1xf32>
    %447 = arith.addf %445, %446 : vector<8x1xf32>
    %448 = math.rsqrt %447 : vector<8x1xf32>
    %449 = vector.broadcast %448 : vector<8x1xf32> to vector<8x32xf32>
    %450 = arith.mulf %440, %449 : vector<8x32xf32>
    %451 = vector.broadcast %432 : vector<1x32xf32> to vector<8x32xf32>
    %452 = arith.mulf %450, %451 : vector<8x32xf32>
    %453 = vector.broadcast %434 : vector<1x32xf32> to vector<8x32xf32>
    %454 = arith.addf %452, %453 : vector<8x32xf32>
    %c0_145 = arith.constant 0 : index
    %c0_146 = arith.constant 0 : index
    %c0_147 = arith.constant 0 : index
    %455 = vector.load %arg20[%c0_145, %c0_146, %c0_147] : memref<1x32x64xbf16, #tpu.memory_space<vmem>>, vector<1x32x64xbf16>
    %456 = vector.shape_cast %455 : vector<1x32x64xbf16> to vector<32x64xbf16>
    %c0_148 = arith.constant 0 : index
    %c0_149 = arith.constant 0 : index
    %c0_150 = arith.constant 0 : index
    %457 = vector.load %arg21[%c0_148, %c0_149, %c0_150] : memref<1x1x64xf32, #tpu.memory_space<vmem>>, vector<1x1x64xf32>
    %458 = vector.shape_cast %457 : vector<1x1x64xf32> to vector<1x64xf32>
    %459 = arith.truncf %454 : vector<8x32xf32> to vector<8x32xbf16>
    %cst_151 = arith.constant dense<0.000000e+00> : vector<8x64xf32>
    %460 = tpu.matmul %459, %456, %cst_151 {dimension_numbers = #tpu.dot_dimension_numbers<[1], [0], [0], [1], [0, 0, 1, 1], [], []>} : vector<8x32xbf16>, vector<32x64xbf16>, vector<8x64xf32> -> vector<8x64xf32>
    %461 = vector.broadcast %458 : vector<1x64xf32> to vector<8x64xf32>
    %462 = arith.addf %460, %461 : vector<8x64xf32>
    %cst_152 = arith.constant 0.000000e+00 : f32
    %463 = vector.broadcast %cst_152 : f32 to vector<8x64xf32>
    %464 = arith.maximumf %462, %463 : vector<8x64xf32>
    %c0_153 = arith.constant 0 : index
    %c0_154 = arith.constant 0 : index
    %c0_155 = arith.constant 0 : index
    %465 = vector.load %arg22[%c0_153, %c0_154, %c0_155] : memref<1x64x32xbf16, #tpu.memory_space<vmem>>, vector<1x64x32xbf16>
    %466 = vector.shape_cast %465 : vector<1x64x32xbf16> to vector<64x32xbf16>
    %c0_156 = arith.constant 0 : index
    %c0_157 = arith.constant 0 : index
    %c0_158 = arith.constant 0 : index
    %467 = vector.load %arg23[%c0_156, %c0_157, %c0_158] : memref<1x1x32xf32, #tpu.memory_space<vmem>>, vector<1x1x32xf32>
    %468 = vector.shape_cast %467 : vector<1x1x32xf32> to vector<1x32xf32>
    %469 = arith.truncf %464 : vector<8x64xf32> to vector<8x64xbf16>
    %cst_159 = arith.constant dense<0.000000e+00> : vector<8x32xf32>
    %470 = tpu.matmul %469, %466, %cst_159 {dimension_numbers = #tpu.dot_dimension_numbers<[1], [0], [0], [1], [0, 0, 1, 1], [], []>} : vector<8x64xbf16>, vector<64x32xbf16>, vector<8x32xf32> -> vector<8x32xf32>
    %471 = vector.broadcast %468 : vector<1x32xf32> to vector<8x32xf32>
    %472 = arith.addf %470, %471 : vector<8x32xf32>
    %473 = arith.addf %454, %472 : vector<8x32xf32>
    %c0_160 = arith.constant 0 : index
    %c0_161 = arith.constant 0 : index
    %c0_162 = arith.constant 0 : index
    %474 = vector.load %arg24[%c0_160, %c0_161, %c0_162] : memref<1x1x32xf32, #tpu.memory_space<vmem>>, vector<1x1x32xf32>
    %475 = vector.shape_cast %474 : vector<1x1x32xf32> to vector<1x32xf32>
    %c0_163 = arith.constant 0 : index
    %c0_164 = arith.constant 0 : index
    %c0_165 = arith.constant 0 : index
    %476 = vector.load %arg25[%c0_163, %c0_164, %c0_165] : memref<1x1x32xf32, #tpu.memory_space<vmem>>, vector<1x1x32xf32>
    %477 = vector.shape_cast %476 : vector<1x1x32xf32> to vector<1x32xf32>
    %cst_166 = arith.constant dense<0.000000e+00> : vector<8xf32>
    %478 = vector.multi_reduction <add>, %473, %cst_166 [1] : vector<8x32xf32> to vector<8xf32>
    %479 = vector.shape_cast %478 : vector<8xf32> to vector<8x1xf32>
    %cst_167 = arith.constant 3.200000e+01 : f32
    %480 = vector.broadcast %cst_167 : f32 to vector<8x1xf32>
    %481 = arith.divf %479, %480 : vector<8x1xf32>
    %482 = vector.broadcast %481 : vector<8x1xf32> to vector<8x32xf32>
    %483 = arith.subf %473, %482 : vector<8x32xf32>
    %484 = arith.mulf %483, %483 : vector<8x32xf32>
    %cst_168 = arith.constant dense<0.000000e+00> : vector<8xf32>
    %485 = vector.multi_reduction <add>, %484, %cst_168 [1] : vector<8x32xf32> to vector<8xf32>
    %486 = vector.shape_cast %485 : vector<8xf32> to vector<8x1xf32>
    %cst_169 = arith.constant 3.200000e+01 : f32
    %487 = vector.broadcast %cst_169 : f32 to vector<8x1xf32>
    %488 = arith.divf %486, %487 : vector<8x1xf32>
    %cst_170 = arith.constant 9.99999974E-6 : f32
    %489 = vector.broadcast %cst_170 : f32 to vector<8x1xf32>
    %490 = arith.addf %488, %489 : vector<8x1xf32>
    %491 = math.rsqrt %490 : vector<8x1xf32>
    %492 = vector.broadcast %491 : vector<8x1xf32> to vector<8x32xf32>
    %493 = arith.mulf %483, %492 : vector<8x32xf32>
    %494 = vector.broadcast %475 : vector<1x32xf32> to vector<8x32xf32>
    %495 = arith.mulf %493, %494 : vector<8x32xf32>
    %496 = vector.broadcast %477 : vector<1x32xf32> to vector<8x32xf32>
    %497 = arith.addf %495, %496 : vector<8x32xf32>
    %c0_171 = arith.constant 0 : index
    %c0_172 = arith.constant 0 : index
    %c0_173 = arith.constant 0 : index
    %498 = vector.load %arg26[%c0_171, %c0_172, %c0_173] : memref<1x8x32xf32, #tpu.memory_space<vmem>>, vector<1x8x32xf32>
    %499 = vector.shape_cast %498 : vector<1x8x32xf32> to vector<8x32xf32>
    %500 = vector.shape_cast %497 : vector<8x32xf32> to vector<1x8x32xf32>
    tpu.vector_store %arg26[%c0_171, %c0_172, %c0_173], %500 {strides = array<i32>} : memref<1x8x32xf32, #tpu.memory_space<vmem>>, vector<1x8x32xf32>,
    %c1_i32 = arith.constant 1 : i32
    %501 = arith.cmpi eq, %arg1, %c1_i32 : i32
    %502 = arith.extui %501 : i1 to i32
    %c0_i32_174 = arith.constant 0 : i32
    %503 = arith.cmpi ne, %502, %c0_i32_174 : i32
    scf.if %503 {
      %cst_175 = arith.constant 0.000000e+00 : f32
      %504 = vector.broadcast %cst_175 : f32 to vector<8x118xf32>
      %505 = tpu.concatenate %292, %504 in 1 : vector<8x10xf32>, vector<8x118xf32> -> vector<8x128xf32>
      %c0_176 = arith.constant 0 : index
      %c0_177 = arith.constant 0 : index
      %c0_178 = arith.constant 0 : index
      %c0_179 = arith.constant 0 : index
      %506 = vector.load %arg27[%c0_176, %c0_177, %c0_178, %c0_179] : memref<1x4x8x128xf32, #tpu.memory_space<vmem>>, vector<1x1x8x128xf32>
      %507 = vector.shape_cast %506 : vector<1x1x8x128xf32> to vector<8x128xf32>
      %508 = vector.shape_cast %505 : vector<8x128xf32> to vector<1x1x8x128xf32>
      tpu.vector_store %arg27[%c0_176, %c0_177, %c0_178, %c0_179], %508 {strides = array<i32>} : memref<1x4x8x128xf32, #tpu.memory_space<vmem>>, vector<1x1x8x128xf32>,
      %cst_180 = arith.constant 0.000000e+00 : f32
      %509 = vector.broadcast %cst_180 : f32 to vector<8x118xf32>
      %510 = tpu.concatenate %335, %509 in 1 : vector<8x10xf32>, vector<8x118xf32> -> vector<8x128xf32>
      %c0_181 = arith.constant 0 : index
      %c1 = arith.constant 1 : index
      %c0_182 = arith.constant 0 : index
      %c0_183 = arith.constant 0 : index
      %511 = vector.load %arg27[%c0_181, %c1, %c0_182, %c0_183] : memref<1x4x8x128xf32, #tpu.memory_space<vmem>>, vector<1x1x8x128xf32>
      %512 = vector.shape_cast %511 : vector<1x1x8x128xf32> to vector<8x128xf32>
      %513 = vector.shape_cast %510 : vector<8x128xf32> to vector<1x1x8x128xf32>
      tpu.vector_store %arg27[%c0_181, %c1, %c0_182, %c0_183], %513 {strides = array<i32>} : memref<1x4x8x128xf32, #tpu.memory_space<vmem>>, vector<1x1x8x128xf32>,
      %cst_184 = arith.constant 0.000000e+00 : f32
      %514 = vector.broadcast %cst_184 : f32 to vector<8x118xf32>
      %515 = tpu.concatenate %378, %514 in 1 : vector<8x10xf32>, vector<8x118xf32> -> vector<8x128xf32>
      %c0_185 = arith.constant 0 : index
      %c2 = arith.constant 2 : index
      %c0_186 = arith.constant 0 : index
      %c0_187 = arith.constant 0 : index
      %516 = vector.load %arg27[%c0_185, %c2, %c0_186, %c0_187] : memref<1x4x8x128xf32, #tpu.memory_space<vmem>>, vector<1x1x8x128xf32>
      %517 = vector.shape_cast %516 : vector<1x1x8x128xf32> to vector<8x128xf32>
      %518 = vector.shape_cast %515 : vector<8x128xf32> to vector<1x1x8x128xf32>
      tpu.vector_store %arg27[%c0_185, %c2, %c0_186, %c0_187], %518 {strides = array<i32>} : memref<1x4x8x128xf32, #tpu.memory_space<vmem>>, vector<1x1x8x128xf32>,
      %cst_188 = arith.constant 0.000000e+00 : f32
      %519 = vector.broadcast %cst_188 : f32 to vector<8x118xf32>
      %520 = tpu.concatenate %421, %519 in 1 : vector<8x10xf32>, vector<8x118xf32> -> vector<8x128xf32>
      %c0_189 = arith.constant 0 : index
      %c3 = arith.constant 3 : index
      %c0_190 = arith.constant 0 : index
      %c0_191 = arith.constant 0 : index
      %521 = vector.load %arg27[%c0_189, %c3, %c0_190, %c0_191] : memref<1x4x8x128xf32, #tpu.memory_space<vmem>>, vector<1x1x8x128xf32>
      %522 = vector.shape_cast %521 : vector<1x1x8x128xf32> to vector<8x128xf32>
      %523 = vector.shape_cast %520 : vector<8x128xf32> to vector<1x1x8x128xf32>
      tpu.vector_store %arg27[%c0_189, %c3, %c0_190, %c0_191], %523 {strides = array<i32>} : memref<1x4x8x128xf32, #tpu.memory_space<vmem>>, vector<1x1x8x128xf32>,
    } else {
    }
    return
  }
  func.func @transform_0(%arg0: i32, %arg1: i32) -> (i32, i32, i32) {
    %c0_i32 = arith.constant 0 : i32
    %c0_i32_0 = arith.constant 0 : i32
    %c0_i32_1 = arith.constant 0 : i32
    return %arg0, %c0_i32, %c0_i32_0 : i32, i32, i32
  }
  func.func @transform_1(%arg0: i32, %arg1: i32) -> (i32, i32, i32) {
    %c0_i32 = arith.constant 0 : i32
    %c0_i32_0 = arith.constant 0 : i32
    %c0_i32_1 = arith.constant 0 : i32
    return %arg0, %c0_i32, %c0_i32_0 : i32, i32, i32
  }
  func.func @transform_2(%arg0: i32, %arg1: i32) -> (i32, i32, i32) {
    %c0_i32 = arith.constant 0 : i32
    %c0_i32_0 = arith.constant 0 : i32
    %c0_i32_1 = arith.constant 0 : i32
    return %arg0, %c0_i32, %c0_i32_0 : i32, i32, i32
  }
  func.func @transform_3(%arg0: i32, %arg1: i32) -> (i32, i32, i32) {
    %c0_i32 = arith.constant 0 : i32
    %c0_i32_0 = arith.constant 0 : i32
    %c0_i32_1 = arith.constant 0 : i32
    return %arg0, %c0_i32, %c0_i32_0 : i32, i32, i32
  }
  func.func @transform_4(%arg0: i32, %arg1: i32) -> (i32, i32, i32, i32) {
    %c0_i32 = arith.constant 0 : i32
    %c0_i32_0 = arith.constant 0 : i32
    %c0_i32_1 = arith.constant 0 : i32
    %c0_i32_2 = arith.constant 0 : i32
    return %arg1, %c0_i32, %c0_i32_0, %c0_i32_1 : i32, i32, i32, i32
  }
  func.func @transform_5(%arg0: i32, %arg1: i32) -> (i32, i32, i32, i32) {
    %c0_i32 = arith.constant 0 : i32
    %c0_i32_0 = arith.constant 0 : i32
    %c0_i32_1 = arith.constant 0 : i32
    %c0_i32_2 = arith.constant 0 : i32
    return %arg1, %c0_i32, %c0_i32_0, %c0_i32_1 : i32, i32, i32, i32
  }
  func.func @transform_6(%arg0: i32, %arg1: i32) -> (i32, i32, i32, i32) {
    %c0_i32 = arith.constant 0 : i32
    %c0_i32_0 = arith.constant 0 : i32
    %c0_i32_1 = arith.constant 0 : i32
    %c0_i32_2 = arith.constant 0 : i32
    return %arg1, %c0_i32, %c0_i32_0, %c0_i32_1 : i32, i32, i32, i32
  }
  func.func @transform_7(%arg0: i32, %arg1: i32) -> (i32, i32, i32) {
    %c0_i32 = arith.constant 0 : i32
    %c0_i32_0 = arith.constant 0 : i32
    %c0_i32_1 = arith.constant 0 : i32
    return %arg1, %c0_i32, %c0_i32_0 : i32, i32, i32
  }
  func.func @transform_8(%arg0: i32, %arg1: i32) -> (i32, i32, i32) {
    %c0_i32 = arith.constant 0 : i32
    %c0_i32_0 = arith.constant 0 : i32
    %c0_i32_1 = arith.constant 0 : i32
    return %arg1, %c0_i32, %c0_i32_0 : i32, i32, i32
  }
  func.func @transform_9(%arg0: i32, %arg1: i32) -> (i32, i32, i32) {
    %c0_i32 = arith.constant 0 : i32
    %c0_i32_0 = arith.constant 0 : i32
    %c0_i32_1 = arith.constant 0 : i32
    return %arg1, %c0_i32, %c0_i32_0 : i32, i32, i32
  }
  func.func @transform_10(%arg0: i32, %arg1: i32) -> (i32, i32, i32, i32) {
    %c0_i32 = arith.constant 0 : i32
    %c0_i32_0 = arith.constant 0 : i32
    %c0_i32_1 = arith.constant 0 : i32
    %c0_i32_2 = arith.constant 0 : i32
    return %arg1, %c0_i32, %c0_i32_0, %c0_i32_1 : i32, i32, i32, i32
  }
  func.func @transform_11(%arg0: i32, %arg1: i32) -> (i32, i32, i32, i32) {
    %c0_i32 = arith.constant 0 : i32
    %c0_i32_0 = arith.constant 0 : i32
    %c0_i32_1 = arith.constant 0 : i32
    %c0_i32_2 = arith.constant 0 : i32
    return %arg1, %c0_i32, %c0_i32_0, %c0_i32_1 : i32, i32, i32, i32
  }
  func.func @transform_12(%arg0: i32, %arg1: i32) -> (i32, i32, i32, i32) {
    %c0_i32 = arith.constant 0 : i32
    %c0_i32_0 = arith.constant 0 : i32
    %c0_i32_1 = arith.constant 0 : i32
    %c0_i32_2 = arith.constant 0 : i32
    return %arg1, %c0_i32, %c0_i32_0, %c0_i32_1 : i32, i32, i32, i32
  }
  func.func @transform_13(%arg0: i32, %arg1: i32) -> (i32, i32, i32, i32) {
    %c0_i32 = arith.constant 0 : i32
    %c0_i32_0 = arith.constant 0 : i32
    %c0_i32_1 = arith.constant 0 : i32
    %c0_i32_2 = arith.constant 0 : i32
    return %arg1, %c0_i32, %c0_i32_0, %c0_i32_1 : i32, i32, i32, i32
  }
  func.func @transform_14(%arg0: i32, %arg1: i32) -> (i32, i32, i32, i32) {
    %c0_i32 = arith.constant 0 : i32
    %c0_i32_0 = arith.constant 0 : i32
    %c0_i32_1 = arith.constant 0 : i32
    %c0_i32_2 = arith.constant 0 : i32
    return %arg1, %c0_i32, %c0_i32_0, %c0_i32_1 : i32, i32, i32, i32
  }
  func.func @transform_15(%arg0: i32, %arg1: i32) -> (i32, i32, i32) {
    %c0_i32 = arith.constant 0 : i32
    %c0_i32_0 = arith.constant 0 : i32
    %c0_i32_1 = arith.constant 0 : i32
    return %arg1, %c0_i32, %c0_i32_0 : i32, i32, i32
  }
  func.func @transform_16(%arg0: i32, %arg1: i32) -> (i32, i32, i32) {
    %c0_i32 = arith.constant 0 : i32
    %c0_i32_0 = arith.constant 0 : i32
    %c0_i32_1 = arith.constant 0 : i32
    return %arg1, %c0_i32, %c0_i32_0 : i32, i32, i32
  }
  func.func @transform_17(%arg0: i32, %arg1: i32) -> (i32, i32, i32) {
    %c0_i32 = arith.constant 0 : i32
    %c0_i32_0 = arith.constant 0 : i32
    %c0_i32_1 = arith.constant 0 : i32
    return %arg1, %c0_i32, %c0_i32_0 : i32, i32, i32
  }
  func.func @transform_18(%arg0: i32, %arg1: i32) -> (i32, i32, i32) {
    %c0_i32 = arith.constant 0 : i32
    %c0_i32_0 = arith.constant 0 : i32
    %c0_i32_1 = arith.constant 0 : i32
    return %arg1, %c0_i32, %c0_i32_0 : i32, i32, i32
  }
  func.func @transform_19(%arg0: i32, %arg1: i32) -> (i32, i32, i32) {
    %c0_i32 = arith.constant 0 : i32
    %c0_i32_0 = arith.constant 0 : i32
    %c0_i32_1 = arith.constant 0 : i32
    return %arg1, %c0_i32, %c0_i32_0 : i32, i32, i32
  }
  func.func @transform_20(%arg0: i32, %arg1: i32) -> (i32, i32, i32) {
    %c0_i32 = arith.constant 0 : i32
    %c0_i32_0 = arith.constant 0 : i32
    %c0_i32_1 = arith.constant 0 : i32
    return %arg1, %c0_i32, %c0_i32_0 : i32, i32, i32
  }
  func.func @transform_21(%arg0: i32, %arg1: i32) -> (i32, i32, i32) {
    %c0_i32 = arith.constant 0 : i32
    %c0_i32_0 = arith.constant 0 : i32
    %c0_i32_1 = arith.constant 0 : i32
    return %arg1, %c0_i32, %c0_i32_0 : i32, i32, i32
  }
  func.func @transform_22(%arg0: i32, %arg1: i32) -> (i32, i32, i32) {
    %c0_i32 = arith.constant 0 : i32
    %c0_i32_0 = arith.constant 0 : i32
    %c0_i32_1 = arith.constant 0 : i32
    return %arg1, %c0_i32, %c0_i32_0 : i32, i32, i32
  }
  func.func @transform_23(%arg0: i32, %arg1: i32) -> (i32, i32, i32) {
    %c0_i32 = arith.constant 0 : i32
    %c0_i32_0 = arith.constant 0 : i32
    %c0_i32_1 = arith.constant 0 : i32
    return %arg1, %c0_i32, %c0_i32_0 : i32, i32, i32
  }
  func.func @transform_24(%arg0: i32, %arg1: i32) -> (i32, i32, i32) {
    %c0_i32 = arith.constant 0 : i32
    %c0_i32_0 = arith.constant 0 : i32
    %c0_i32_1 = arith.constant 0 : i32
    return %arg0, %c0_i32, %c0_i32_0 : i32, i32, i32
  }
  func.func @transform_25(%arg0: i32, %arg1: i32) -> (i32, i32, i32, i32) {
    %c0_i32 = arith.constant 0 : i32
    %c0_i32_0 = arith.constant 0 : i32
    %c0_i32_1 = arith.constant 0 : i32
    %c0_i32_2 = arith.constant 0 : i32
    return %arg0, %c0_i32, %c0_i32_0, %c0_i32_1 : i32, i32, i32, i32
  }
}

</mosaic_0001>

<bundles_post_ra>
// kernel: seq2seq_forward.5
= control target key start
LH: loop header
LB: loop body
LE: loop exit
PB: predicated region body
PF: predicated region fallthrough
CT: control target
= control target key end

     0   :  { %vm42_vm0 = vcmask 261120   ;;  %s121_s1 = inlined_call_operand.vmem [shape: bf16[32,128], index: 1, kind: input, shape index: {}]   ;;  %s122_s2 = inlined_call_operand.vmem [shape: f32[1,128], index: 2, kind: input, shape index: {}]   ;;  %s123_s0 = inlined_call_operand.vmem [shape: bf16[16,32], index: 0, kind: input, shape index: {}]   ;;  %s124_s3 = inlined_call_operand.vmem [shape: f32[16,128], index: 3, kind: output, shape index: {}]  }
   0x1   :  { %v81_v0 = vld [vmem:[%s121_s1 + $0x8] sm:$0xff]  ;;  %v80_v1 = vld [vmem:[%s121_s1] sm:$0xff] }
   0x2   :  { %52 = vmatpush.bf16.msra.mxu0 %v81_v0  ;;  %v79_v2 = vld [vmem:[%s123_s0] sm:$0xff] }
   0x3   :  { %v82_v3 = vld [vmem:[%s122_s2] ss:$0 sm:$0xff] }
   0x6   :  { %53 = vmatpush.bf16.msra.mxu0 %v80_v1 }
   0x9   :  { %78 = vmatmul.msk.bf16.vlgmr.msra.gmra.mxu0 %vm42_vm0, %v79_v2 }
  0x86   :  { %v55_v4 = vpop.f32.mrf.mxu0 }
  0x87   :  { %v56_v5 = vadd.f32 %v82_v3, %v55_v4 }
  0x89   :  { %60 = vst [vmem:[%s124_s3] sm:$0xff] %v56_v5 }
  0x8e   :  { %v57_v6 = vpop.f32.mrf.mxu0 }
  0x8f   :  { %v58_v7 = vadd.f32 %v82_v3, %v57_v6 }
  0x91   :  { %61 = vst [vmem:[%s124_s3 + $0x8] sm:$0xff] %v58_v7 }

// kernel: seq2seq_forward.3
= control target key start
LH: loop header
LB: loop body
LE: loop exit
PB: predicated region body
PF: predicated region fallthrough
CT: control target
= control target key end

     0   :  { %s2442_s29 = smov 0   ;;  %s2444_s30 = smov 0   ;;  %s2791_s0 = inlined_call_operand.vmem [shape: f32[2,10,32], index: 0, kind: input, shape index: {}]   ;;  %s2792_s1 = inlined_call_operand.vmem [shape: f32[2,1,10], index: 1, kind: input, shape index: {}]   ;;  %s2793_s2 = inlined_call_operand.vmem [shape: bf16[2,12,32,8], index: 2, kind: input, shape index: {}]   ;;  %s2794_s3 = inlined_call_operand.vmem [shape: f32[2,12,1,8], index: 3, kind: input, shape index: {}]   ;;  %s2795_s4 = inlined_call_operand.vmem [shape: bf16[2,4,8,32], index: 4, kind: input, shape index: {}]   ;;  %s2796_s5 = inlined_call_operand.vmem [shape: f32[2,1,32], index: 5, kind: input, shape index: {}]   ;;  %s2797_s6 = inlined_call_operand.vmem [shape: f32[2,1,32], index: 6, kind: input, shape index: {}]   ;;  %s2798_s7 = inlined_call_operand.vmem [shape: f32[2,1,32], index: 7, kind: input, shape index: {}]   ;;  %s2799_s8 = inlined_call_operand.vmem [shape: bf16[2,32,64], index: 8, kind: input, shape index: {}]   ;;  %s2800_s9 = inlined_call_operand.vmem [shape: f32[2,1,64], index: 9, kind: input, shape index: {}]   ;;  %s2801_s10 = inlined_call_operand.vmem [shape: bf16[2,64,32], index: 10, kind: input, shape index: {}]   ;;  %s2802_s11 = inlined_call_operand.vmem [shape: f32[2,1,32], index: 11, kind: input, shape index: {}]   ;;  %s2803_s12 = inlined_call_operand.vmem [shape: f32[2,1,32], index: 12, kind: input, shape index: {}]   ;;  %s2804_s13 = inlined_call_operand.vmem [shape: f32[2,1,32], index: 13, kind: input, shape index: {}]   ;;  %s2805_s14 = inlined_call_operand.vmem [shape: f32[2,10,32], index: 14, kind: output, shape index: {}]  }
   0x1   :  { %2811 = sst [smem:[#allocation9_spill]] %s2791_s0  ;;  %s2446_s15 = smov 0  }
   0x2   :  { %2812 = sst [smem:[#allocation10_spill]] %s2792_s1  ;;  %s2448_s16 = smov 0  }
   0x3   :  { %2813 = sst [smem:[#allocation11_spill]] %s2793_s2  ;;  %s2450_s17 = smov 0  }
   0x4   :  { %2814 = sst [smem:[#allocation12_spill]] %s2794_s3 }
   0x5   :  { %2815 = sst [smem:[#allocation13_spill]] %s2795_s4 }
   0x6   :  { %2816 = sst [smem:[#allocation14_spill]] %s2799_s8 }
   0x7   :  { %2817 = sst [smem:[#allocation15_spill]] %s2800_s9 }
   0x8   :  { %2818 = sst [smem:[#allocation16_spill]] %s2804_s13 }
   0x9   :  { %2819 = sst [smem:[#allocation17_spill]] %s2805_s14 }
   0xa LB: > { %2820 = sst [smem:[#allocation2_spill]] %s2347_s29  ;;  %s33_s18 = sadd.s32 1, %s2355_s15  ;;  %s2363_s17 = sphi %s2450_s17, %s24_s17   ;;  %s2359_s16 = sphi %s2448_s16, %s2852_s16   ;;  %s2355_s15 = sphi %s2446_s15, %s2851_s15   ;;  %s2351_s30 = sphi %s2444_s30, %s2850_s30   ;;  %s2347_s29 = sphi %s2442_s29, %s2849_s29  }
   0xb   : > { %2821 = sst [smem:[#allocation3_spill]] %s2355_s15  ;;  %s36_s19 = sadd.s32 1, %s2359_s16 }
   0xc   : > { %2822 = sst [smem:[#allocation4_spill]] %s2359_s16  ;;  %p34_p0 = scmp.ge.s32.totalorder %s33_s18, 2 }
   0xd   : > { %2823 = sst [smem:[#allocation5_spill]] %s2363_s17  ;;  %p2024_p1 = scmp.ge.s32.totalorder %s2363_s17, 1 }
   0xe   : > { %p537_p2 = scmp.lt.s32.totalorder %s2363_s17, 5  ;;  %s2854_s18 = smov (%p34_p0, %s33_s18), 0 }
   0xf   : > { %2824 = sst [smem:[#allocation6_spill]] %s2854_s18  ;;  %s2856_s19 = smov (!%p34_p0, %s36_s19), %s2359_s16 }
  0x10   : > { %p538_p3 = pnand %p2024_p1, %p537_p2  ;;  %p38_p4 = scmp.ge.s32.totalorder %s2856_s19, 2 }
  0x12   : > { %s2858_s19 = smov (%p38_p4, %s2856_s19), 0  ;;  %541 = sbr.rel (%p538_p3) target bundleno = 3387 (0xd3b), region = 76 }
  0x13   : > { %2825 = sst [smem:[#allocation7_spill]] %s2858_s19 }
  0x17   : > { %p631_p5 = scmp.lt.s32.totalorder %s2351_s30, 1  ;;  %p639_p6 = scmp.lt.s32.totalorder %s2347_s29, 1 }
  0x18   : > { %s2828_s0 = sld [smem:[#allocation9_spill]] }
  0x19   : > { %s2860_s30 = smov (!%p631_p5, %s2351_s30), 1  ;;  %s2829_s2 = sld [smem:[#allocation11_spill]] }
  0x1a   : > { %2826 = sst [smem:[#allocation8_spill]] %s2860_s30  ;;  %s2185_s21 = sshll.u32 %s2860_s30, 4 }
  0x1b   : > { %s2478_s20 = scalar_select %p639_p6, %s2347_s29, 1 }
  0x1c   : > { %s2830_s4 = sld [smem:[#allocation13_spill]] }
  0x1d   : > { %s2220_s28 = smul.u32 192, %s2478_s20  ;;  %s2186_s18 = sshll.u32 %s2478_s20, 4 }
  0x1e   : > { %s635_s27 = scalar_lea.vmem %s2828_s0, %s2185_s21  ;;  %s2221_s19 = smul.u32 12, %s2478_s20 }
  0x1f   : > { %s2494_s17 = scalar_lea.vmem %s2829_s2, %s2220_s28  ;;  %s2831_s3 = sld [smem:[#allocation12_spill]] }
  0x20   : > { %s2832_s8 = sld [smem:[#allocation14_spill]]  ;;  %s677_s0 = scalar_lea.vmem %s2802_s11, %s2478_s20 }
  0x21   : > { %s680_s14 = scalar_lea.vmem %s2803_s12, %s2478_s20  ;;  %s2834_s2 = sld [smem:[#allocation16_spill]] }
  0x22   : > { %s2499_s13 = scalar_lea.vmem %s2830_s4, %s2186_s18  ;;  %s2835_s23 = sld [smem:[#allocation17_spill]] }
  0x23   : > { %s2836_s24 = sld [smem:[#allocation2_spill]] }
  0x25   : > { %s2504_s25 = scalar_lea.vmem %s2831_s3, %s2221_s19  ;;  %s2188_s3 = sshll.u32 %s2478_s20, 5 }
  0x26   : > { %s2521_s4 = scalar_lea.vmem %s2832_s8, %s2186_s18  ;;  %s2535_s15 = scalar_lea.vmem %s2801_s10, %s2188_s3 }
  0x27   : > { %s683_s8 = scalar_lea.vmem %s2834_s2, %s2478_s20 }
  0x28   : > { %s2548_s9 = scalar_lea.vmem %s2835_s23, %s2185_s21 }
  0x29   : > { %p2036_p7 = scmp.ne.s32.totalorder %s2836_s24, 0 }
  0x2b   : > { %693 = sbr.rel (%p2036_p7) target bundleno = 51 (0x33), region = 80 }
  0x30   : > { %v694_v0 = vld [vmem:[%s635_s27] sm:$0xff]  ;;  %vm696_vm0 = vcmask 261120   ;;  %v695_v1 = vld [vmem:[%s635_s27 + $0x8] sm:$0x3]  ;;  %vm698_vm1 = vcmask 254976  }
  0x31   : > { %697 = vst.msk [vmem:[%s2548_s9] sm:$0xff] %vm696_vm0, %v694_v0 }
  0x32   : > { %699 = vst.msk [vmem:[%s2548_s9 + $0x8] sm:$0x3] %vm698_vm1, %v695_v1 }
  0x33 PF: > { %v2191_v2 = vld [vmem:[%s2494_s17 + $0x8] sm:$0xff]  ;;  %v2190_v4 = vld [vmem:[%s2494_s17] sm:$0xff]  ;;  %vm791_vm2 = vcmask 261120   ;;  %s2837_s2 = sld [smem:[#allocation8_spill]]  ;;  %vm869_vm3 = vcmask 64512   ;;  %v2365_v25 = vmov 0   ;;  %s2842_s30 = scalar_lea.vmem %s2796_s5, %s2478_s20 }
  0x34   : > { %v2199_v3 = vld [vmem:[%s2494_s17 + $0x48] sm:$0xff]  ;;  %v2198_v5 = vld [vmem:[%s2494_s17 + $0x40] sm:$0xff]  ;;  %801 = vmatpush.bf16.msra.mxu0 %v2191_v2  ;;  %s2838_s27 = sld [smem:[#allocation10_spill]]  ;;  %vm892_vm6 = vcmask 80896   ;;  %vm896_vm7 = vcmask 74752   ;;  %v2201_v50 = vld [vmem:[%s2494_s17 + $0x58] sm:$0xff]  ;;  %s2844_s28 = scalar_lea.vmem %s2798_s7, %s2478_s20 }
  0x35   : > { %830 = vmatpush.bf16.msra.mxu1 %v2199_v3  ;;  %v2265_v11 = vld [vmem:[%s2504_s25 + $0x4] ss:$0 sm:$0xff]  ;;  %v2264_v15 = vld [vmem:[%s2504_s25] ss:$0 sm:$0xff]  ;;  %v2207_v22 = vld [vmem:[%s2494_s17 + $0x88] sm:$0xff]  ;;  %vm947_vm8 = vcmask 1044480  }
  0x36   : > { %859 = vmatpush.bf16.msra.mxu2 %v2207_v22  ;;  %v2206_v23 = vld [vmem:[%s2494_s17 + $0x80] sm:$0xff]  ;;  %v2266_v46 = vld [vmem:[%s2504_s25 + $0x8] ss:$0 sm:$0xff]  ;;  %v2200_v52 = vld [vmem:[%s2494_s17 + $0x50] sm:$0xff]  ;;  %vm969_vm1 = vcmask 1043456   ;;  %s2845_s22 = sld [smem:[#allocation15_spill]] }
  0x37   : > { %v2193_v54 = vld [vmem:[%s2494_s17 + $0x18] sm:$0xff]  ;;  %v2192_v55 = vld [vmem:[%s2494_s17 + $0x10] sm:$0xff] }
  0x38   : > { %v2558_v6 = vld [vmem:[%s2548_s9] sm:$0xff]  ;;  %802 = vmatpush.bf16.msra.mxu0 %v2190_v4 }
  0x39   : > { %v2561_v7 = vld [vmem:[%s2548_s9 + $0x8] sm:$0x3]  ;;  %831 = vmatpush.bf16.msra.mxu1 %v2198_v5 }
  0x3a   : > { %v2565_v8 = vpack.c.bf16 %v2561_v7, %v2558_v6  ;;  %s2839_s23 = scalar_lea.vmem %s2838_s27, %s2837_s2  ;;  %860 = vmatpush.bf16.msra.mxu2 %v2206_v23  ;;  %v2267_v23 = vld [vmem:[%s2504_s25 + $0x5] ss:$0 sm:$0xff] }
  0x3b   : > { %v702_v24 = vld [vmem:[%s2839_s23] sm:$0x1] }
  0x3c   : > { %2045 = vmatmul.msk.bf16.vlgmr.msra.gmra.mxu0 %vm791_vm2, %v2565_v8  ;;  %2054 = vmatmul.msk.bf16.vlgmr.msra.gmra.mxu1 %vm791_vm2, %v2565_v8  ;;  %vm703_vm4 = vcmp.gt.f32.partialorder %v702_v24, 0.5  ;;  %s2846_s19 = scalar_lea.vmem %s2845_s22, %s2478_s20 }
  0x3d   : > { %2063 = vmatmul.msk.bf16.vlgmr.msra.gmra.mxu2 %vm791_vm2, %v2565_v8  ;;  %v704_v26 = vsel %vm703_vm4, 1, %v2365_v25 }
  0x3e   : > { %v705_v27 = vperm.slane %v704_v26, 0  ;;  %1010 = vmatpush.bf16.msrb.mxu2 %v2193_v54 }
  0x40   : > { %vm2584_vm5 = vcmp.eq.s32.totalorder %v705_v27, 1 }
  0x42   : > { %1011 = vmatpush.bf16.msrb.mxu2 %v2192_v55 }
  0x4d   : > { %2075 = vmatmul.msk.bf16.vlgmr.msrb.gmra.mxu2 %vm791_vm2, %v2565_v8 }
  0xb9   : > { %v833_v9 = vpop.f32.mrf.mxu1  ;;  %v804_v10 = vpop.f32.mrf.mxu0 }
  0xba   : > { %v834_v13 = vadd.f32 %v2265_v11, %v833_v9  ;;  %v805_v19 = vadd.f32 %v2264_v15, %v804_v10 }
  0xc0   : > { %v862_v45 = vpop.f32.mrf.mxu2 }
  0xc1   : > { %v835_v12 = vpop.f32.mrf.mxu1  ;;  %v806_v17 = vpop.f32.mrf.mxu0  ;;  %v863_v48 = vadd.f32 %v2266_v46, %v862_v45 }
  0xc2   : > { %v836_v14 = vadd.f32 %v2265_v11, %v835_v12  ;;  %v807_v20 = vadd.f32 %v2264_v15, %v806_v17 }
  0xc4   : > { %v868_v16 = vpack.c.bf16 %v836_v14, %v834_v13  ;;  %v867_v21 = vpack.c.bf16 %v807_v20, %v805_v19  ;;  %v767_v20 = vld [vmem:[%s2499_s13] sm:$0xf] }
  0xc6   : > { %v874_v18 = vsel %vm869_vm3, %v868_v16, 0 }
  0xc7   : > { %883 = vmatpush.bf16.xpose.msra.mxu3 %v874_v18 }
  0xc8   : > { %v864_v47 = vpop.f32.mrf.mxu2 }
  0xc9   : > { %v865_v49 = vadd.f32 %v2266_v46, %v864_v47 }
  0xcb   : > { %v943_v51 = vpack.c.bf16 %v865_v49, %v863_v48 }
  0xcd   : > { %v949_v53 = vsel %vm947_vm8, %v943_v51, 0 }
  0xce   : > { %2064 = vmatmul.msk.bf16.vlgmr.msra.gmra.mxu3 %vm869_vm3, %v867_v21  ;;  %958 = vmatpush.bf16.msrb.mxu0 %v949_v53  ;;  %v971_v21 = vsel %vm969_vm1, %v767_v20, 0 }
  0xcf   : > { %1039 = vmatpush.bf16.msrb.mxu3 %v2201_v50  ;;  %980 = vmatpush.bf16.msrb.mxu1 %v971_v21 }
  0xd3   : > { %1040 = vmatpush.bf16.msrb.mxu3 %v2200_v52 }
  0xde   : > { %2084 = vmatmul.msk.bf16.vlgmr.msrb.gmra.mxu3 %vm791_vm2, %v2565_v8 }
 0x151   : > { %v885_v29 = vpop.f32.mrf.mxu3 }
 0x152   : > { %v890_v30 = vsel %vm2584_vm5, %v885_v29, -1e+10 }
 0x153   : > { %v893_v31 = vsel %vm892_vm6, %v890_v30, -inf }
 0x154   : > { %894 = vmax.xlane.f32.xlu0 %v893_v31  ;;  %v1013_v31 = vpop.f32.mrf.mxu2 }
 0x159   : > { %v887_v32 = vpop.f32.mrf.mxu3 }
 0x15a   : > { %v891_v33 = vsel %vm2584_vm5, %v887_v32, -1e+10 }
 0x15b   : > { %v897_v34 = vsel %vm896_vm7, %v891_v33, -inf }
 0x15c   : > { %898 = vmax.xlane.f32.xlu0 %v897_v34  ;;  %v2268_v34 = vld [vmem:[%s2504_s25 + $0x1] ss:$0 sm:$0xff] }
 0x161   : > { %v1042_v22 = vpop.f32.mrf.mxu3 }
 0x162   : > { %v1043_v24 = vadd.f32 %v2267_v23, %v1042_v22 }
 0x169   : > { %v1044_v25 = vpop.f32.mrf.mxu3 }
 0x16a   : > { %v1045_v26 = vadd.f32 %v2267_v23, %v1044_v25 }
 0x16c   : > { %v1077_v27 = vpack.c.bf16 %v1045_v26, %v1043_v24 }
 0x16e   : > { %v1082_v29 = vsel %vm869_vm3, %v1077_v27, 0 }
 0x16f   : > { %1091 = vmatpush.bf16.xpose.msra.mxu1 %v1082_v29 }
 0x1c7   : > { %v895_v35 = vpop.xlane.xlu0 %894 }
 0x1c8   : > { %v900_v36 = vsub.f32 %v890_v30, %v895_v35  ;;  %v1015_v35 = vpop.f32.mrf.mxu2 }
 0x1ca   : > { %v902_v37 = vmul.f32 1.442695, %v900_v36  ;;  %v1014_v36 = vadd.f32 %v2268_v34, %v1013_v31 }
 0x1cc   : > { %2283 = vpow2.f32 %v902_v37  ;;  %v1016_v37 = vadd.f32 %v2268_v34, %v1015_v35  ;;  %v768_v35 = vld [vmem:[%s2499_s13 + $0x4] sm:$0xf] }
 0x1cf   : > { %v899_v38 = vpop.xlane.xlu0 %898 }
 0x1d0   : > { %v901_v39 = vsub.f32 %v891_v33, %v899_v38  ;;  %v1076_v38 = vpack.c.bf16 %v1016_v37, %v1014_v36  ;;  %v1175_v36 = vsel %vm969_vm1, %v768_v35, 0 }
 0x1d1   : > { %1184 = vmatpush.bf16.msra.mxu3 %v1175_v36 }
 0x1d2   : > { %v2284_v40 = vpop.eup %2283  ;;  %v904_v41 = vmul.f32 1.442695, %v901_v39  ;;  %v2209_v39 = vld [vmem:[%s2494_s17 + $0x98] sm:$0xff] }
 0x1d3   : > { %v906_v42 = vsel %vm892_vm6, %v2284_v40, 0.0  ;;  %1068 = vmatpush.bf16.msra.mxu0 %v2209_v39 }
 0x1d4   : > { %2285 = vpow2.f32 %v904_v41  ;;  %907 = vadd.xlane.f32.xlu1 %v906_v42 }
 0x1da   : > { %v2286_v43 = vpop.eup %2285 }
 0x1db   : > { %v909_v44 = vsel %vm896_vm7, %v2286_v43, 0.0 }
 0x1dc   : > { %910 = vadd.xlane.f32.xlu1 %v909_v44 }
 0x247   : > { %v908_v56 = vpop.xlane.xlu1 %907 }
 0x248   : > { %2287 = vrcp.f32 %v908_v56  ;;  %v923_v1 = vand.u32 2147483648, %v908_v56  ;;  %vm917_vm10 = vweird.f32 %v908_v56  ;;  %v921_v2 = vand.u32 2147483647, %v908_v56 }
 0x24a   : > { %v924_v11 = vor.u32 1.1754944e-38, %v923_v1  ;;  %vm922_vm13 = vcmp.eq.f32.partialorder %v921_v2, 8.507059e+37  ;;  %v2203_v2 = vld [vmem:[%s2494_s17 + $0x68] sm:$0xff] }
 0x24e   : > { %v2288_v57 = vpop.eup %2287 }
 0x24f   : > { %v913_v58 = vmul.f32 %v2288_v57, %v908_v56  ;;  %v911_v59 = vpop.xlane.xlu1 %910  ;;  %vm918_vm9 = vweird.f32 %v2288_v57 }
 0x250   : > { %2289 = vrcp.f32 %v911_v59  ;;  %vm919_vm11 = vmor %vm917_vm10, %vm918_vm9  ;;  %v938_v4 = vand.u32 2147483648, %v911_v59  ;;  %v936_v10 = vand.u32 2147483647, %v911_v59  ;;  %vm932_vm14 = vweird.f32 %v911_v59 }
 0x251   : > { %v914_v60 = vsub.f32 1.0, %v913_v58 }
 0x252   : > { %v939_v13 = vor.u32 1.1754944e-38, %v938_v4  ;;  %vm937_vm0 = vcmp.eq.f32.partialorder %v936_v10, 8.507059e+37  ;;  %v2195_v4 = vld [vmem:[%s2494_s17 + $0x28] sm:$0xff] }
 0x253   : > { %v915_v61 = vmul.f32 %v2288_v57, %v914_v60  ;;  %v2270_v60 = vld [vmem:[%s2504_s25 + $0x9] ss:$0 sm:$0xff] }
 0x255   : > { %v916_v63 = vadd.f32 %v2288_v57, %v915_v61 }
 0x256   : > { %v2290_v62 = vpop.eup %2289 }
 0x257   : > { %v928_v0 = vmul.f32 %v2290_v62, %v911_v59  ;;  %v920_v5 = vsel %vm919_vm11, %v2288_v57, %v916_v63  ;;  %vm933_vm12 = vweird.f32 %v2290_v62 }
 0x258   : > { %vm934_vm15 = vmor %vm932_vm14, %vm933_vm12  ;;  %v925_v14 = vsel %vm922_vm13, %v924_v11, %v920_v5 }
 0x259   : > { %v929_v3 = vsub.f32 1.0, %v928_v0  ;;  %v926_v17 = vmul.f32 %v2284_v40, %v925_v14  ;;  %v2208_v40 = vld [vmem:[%s2494_s17 + $0x90] sm:$0xff] }
 0x25a   : > { %1069 = vmatpush.bf16.msra.mxu0 %v2208_v40 }
 0x25b   : > { %v930_v9 = vmul.f32 %v2290_v62, %v929_v3  ;;  %v2202_v3 = vld [vmem:[%s2494_s17 + $0x60] sm:$0xff] }
 0x25d   : > { %v931_v12 = vadd.f32 %v2290_v62, %v930_v9  ;;  %v2194_v9 = vld [vmem:[%s2494_s17 + $0x20] sm:$0xff] }
 0x25f   : > { %v935_v15 = vsel %vm934_vm15, %v2290_v62, %v931_v12 }
 0x260   : > { %v940_v16 = vsel %vm937_vm0, %v939_v13, %v935_v15 }
 0x261   : > { %v941_v18 = vmul.f32 %v2286_v43, %v940_v16 }
 0x263   : > { %v942_v19 = vpack.c.bf16 %v941_v18, %v926_v17 }
 0x265   : > { %2065 = vmatmul.msk.bf16.vlgmr.msrb.gmra.mxu0 %vm892_vm6, %v942_v19 }
 0x266   : > { %1214 = vmatpush.bf16.msrb.mxu0 %v2195_v4 }
 0x26a   : > { %1215 = vmatpush.bf16.msrb.mxu0 %v2194_v9 }
 0x275   : > { %2093 = vmatmul.msk.bf16.vlgmr.msra.gmra.mxu0 %vm791_vm2, %v2565_v8 }
 0x285   : > { %2105 = vmatmul.msk.bf16.vlgmr.msrb.gmra.mxu0 %vm791_vm2, %v2565_v8 }
 0x2e2   : > { %v960_v30 = vpop.f32.mrf.mxu0 }
 0x2ea   : > { %v962_v32 = vpop.f32.mrf.mxu0 }
 0x2eb   : > { %v965_v33 = vpack.c.bf16 %v962_v32, %v960_v30 }
 0x2ed   : > { %2066 = vmatmul.msk.bf16.vlgmr.msrb.gmra.mxu1 %vm869_vm3, %v965_v33 }
 0x2ee   : > { %1243 = vmatpush.bf16.msrb.mxu1 %v2203_v2 }
 0x2f2   : > { %v1071_v59 = vpop.f32.mrf.mxu0  ;;  %1244 = vmatpush.bf16.msrb.mxu1 %v2202_v3 }
 0x2f3   : > { %v1072_v62 = vadd.f32 %v2270_v60, %v1071_v59 }
 0x2fa   : > { %v1073_v61 = vpop.f32.mrf.mxu0 }
 0x2fb   : > { %v1074_v63 = vadd.f32 %v2270_v60, %v1073_v61 }
 0x2fd   : > { %2094 = vmatmul.msk.bf16.vlgmr.msra.gmra.mxu1 %vm869_vm3, %v1076_v38  ;;  %v1149_v0 = vpack.c.bf16 %v1074_v63, %v1072_v62  ;;  %v2271_v38 = vld [vmem:[%s2504_s25 + $0x6] ss:$0 sm:$0xff] }
 0x2ff   : > { %v1154_v1 = vsel %vm947_vm8, %v1149_v0, 0 }
 0x300   : > { %1163 = vmatpush.bf16.msra.mxu2 %v1154_v1 }
 0x30d   : > { %2114 = vmatmul.msk.bf16.vlgmr.msrb.gmra.mxu1 %vm791_vm2, %v2565_v8 }
 0x36a   : > { %v2616_v41 = vpop.f32.mrf.mxu1 }
 0x372   : > { %v2620_v42 = vpop.f32.mrf.mxu1 }
 0x37a   : > { %v1093_v43 = vpop.f32.mrf.mxu1 }
 0x37b   : > { %v1098_v44 = vsel %vm2584_vm5, %v1093_v43, -1e+10 }
 0x37c   : > { %v1100_v45 = vsel %vm892_vm6, %v1098_v44, -inf }
 0x37d   : > { %1101 = vmax.xlane.f32.xlu2 %v1100_v45 }
 0x382   : > { %v1095_v46 = vpop.f32.mrf.mxu1 }
 0x383   : > { %v1099_v47 = vsel %vm2584_vm5, %v1095_v46, -1e+10 }
 0x384   : > { %v1103_v48 = vsel %vm896_vm7, %v1099_v47, -inf }
 0x385   : > { %1104 = vmax.xlane.f32.xlu2 %v1103_v48 }
 0x38a   : > { %v1246_v37 = vpop.f32.mrf.mxu1 }
 0x38b   : > { %v1247_v39 = vadd.f32 %v2271_v38, %v1246_v37 }
 0x392   : > { %v1248_v40 = vpop.f32.mrf.mxu1 }
 0x393   : > { %v1249_v43 = vadd.f32 %v2271_v38, %v1248_v40 }
 0x3f0   : > { %v1102_v49 = vpop.xlane.xlu2 %1101 }
 0x3f1   : > { %v1106_v50 = vsub.f32 %v1098_v44, %v1102_v49  ;;  %v1281_v44 = vpack.c.bf16 %v1249_v43, %v1247_v39 }
 0x3f3   : > { %v1108_v51 = vmul.f32 1.442695, %v1106_v50  ;;  %v1286_v45 = vsel %vm869_vm3, %v1281_v44, 0  ;;  %v2272_v50 = vld [vmem:[%s2504_s25 + $0x2] ss:$0 sm:$0xff] }
 0x3f4   : > { %1295 = vmatpush.bf16.xpose.msrb.mxu3 %v1286_v45 }
 0x3f5   : > { %2291 = vpow2.f32 %v1108_v51 }
 0x3f8   : > { %v1105_v52 = vpop.xlane.xlu2 %1104 }
 0x3f9   : > { %v1107_v53 = vsub.f32 %v1099_v47, %v1105_v52  ;;  %v1217_v47 = vpop.f32.mrf.mxu0 }
 0x3fa   : > { %v1218_v52 = vadd.f32 %v2272_v50, %v1217_v47 }
 0x3fb   : > { %v2292_v54 = vpop.eup %2291  ;;  %v1110_v55 = vmul.f32 1.442695, %v1107_v53 }
 0x3fc   : > { %v1112_v56 = vsel %vm892_vm6, %v2292_v54, 0.0 }
 0x3fd   : > { %2293 = vpow2.f32 %v1110_v55  ;;  %1113 = vadd.xlane.f32.xlu0 %v1112_v56  ;;  %v2269_v55 = vld [vmem:[%s2842_s30] ss:$0 sm:$0xff]  ;;  %v2211_v56 = vld [vmem:[%s2494_s17 + $0xa8] sm:$0xff] }
 0x3fe   : > { %1272 = vmatpush.bf16.msrb.mxu2 %v2211_v56  ;;  %v988_v61 = vadd.f32 %v2269_v55, %v2620_v42  ;;  %v769_v56 = vld [vmem:[%s2499_s13 + $0x8] sm:$0xf] }
 0x401   : > { %v1219_v51 = vpop.f32.mrf.mxu0 }
 0x402   : > { %v1220_v53 = vadd.f32 %v2272_v50, %v1219_v51 }
 0x403   : > { %v2294_v57 = vpop.eup %2293 }
 0x404   : > { %v1115_v58 = vsel %vm896_vm7, %v2294_v57, 0.0 }
 0x405   : > { %1116 = vadd.xlane.f32.xlu1 %v1115_v58  ;;  %v987_v58 = vadd.f32 %v2269_v55, %v2616_v41 }
 0x470   : > { %v1114_v5 = vpop.xlane.xlu0 %1113 }
 0x471   : > { %2295 = vrcp.f32 %v1114_v5  ;;  %v1129_v18 = vand.u32 2147483648, %v1114_v5  ;;  %vm1123_vm9 = vweird.f32 %v1114_v5  ;;  %v1127_v19 = vand.u32 2147483647, %v1114_v5 }
 0x473   : > { %v1130_v25 = vor.u32 1.1754944e-38, %v1129_v18  ;;  %vm1128_vm12 = vcmp.eq.f32.partialorder %v1127_v19, 8.507059e+37  ;;  %v2273_v18 = vld [vmem:[%s2504_s25 + $0xa] ss:$0 sm:$0xff] }
 0x477   : > { %v2296_v10 = vpop.eup %2295 }
 0x478   : > { %v1119_v11 = vmul.f32 %v2296_v10, %v1114_v5  ;;  %v1117_v12 = vpop.xlane.xlu1 %1116  ;;  %vm1124_vm4 = vweird.f32 %v2296_v10 }
 0x479   : > { %2297 = vrcp.f32 %v1117_v12  ;;  %vm1125_vm10 = vmor %vm1123_vm9, %vm1124_vm4  ;;  %v1144_v21 = vand.u32 2147483648, %v1117_v12  ;;  %v1142_v24 = vand.u32 2147483647, %v1117_v12  ;;  %vm1138_vm13 = vweird.f32 %v1117_v12 }
 0x47a   : > { %v1120_v13 = vsub.f32 1.0, %v1119_v11 }
 0x47b   : > { %v1145_v29 = vor.u32 1.1754944e-38, %v1144_v21  ;;  %vm1143_vm15 = vcmp.eq.f32.partialorder %v1142_v24, 8.507059e+37  ;;  %v2204_v24 = vld [vmem:[%s2494_s17 + $0x70] sm:$0xff] }
 0x47c   : > { %v1121_v14 = vmul.f32 %v2296_v10, %v1120_v13 }
 0x47e   : > { %v1122_v16 = vadd.f32 %v2296_v10, %v1121_v14 }
 0x47f   : > { %v2298_v15 = vpop.eup %2297 }
 0x480   : > { %v1134_v17 = vmul.f32 %v2298_v15, %v1117_v12  ;;  %v1126_v22 = vsel %vm1125_vm10, %v2296_v10, %v1122_v16  ;;  %vm1139_vm11 = vweird.f32 %v2298_v15 }
 0x481   : > { %v1131_v27 = vsel %vm1128_vm12, %v1130_v25, %v1126_v22  ;;  %vm1140_vm14 = vmor %vm1138_vm13, %vm1139_vm11  ;;  %v2205_v22 = vld [vmem:[%s2494_s17 + $0x78] sm:$0xff] }
 0x482   : > { %v1135_v20 = vsub.f32 1.0, %v1134_v17  ;;  %v1132_v32 = vmul.f32 %v2292_v54, %v1131_v27  ;;  %v1280_v54 = vpack.c.bf16 %v1220_v53, %v1218_v52  ;;  %v2196_v27 = vld [vmem:[%s2494_s17 + $0x30] sm:$0xff] }
 0x484   : > { %v1136_v23 = vmul.f32 %v2298_v15, %v1135_v20 }
 0x486   : > { %v1137_v26 = vadd.f32 %v2298_v15, %v1136_v23 }
 0x488   : > { %v1141_v30 = vsel %vm1140_vm14, %v2298_v15, %v1137_v26  ;;  %v2197_v26 = vld [vmem:[%s2494_s17 + $0x38] sm:$0xff] }
 0x489   : > { %v1146_v31 = vsel %vm1143_vm15, %v1145_v29, %v1141_v30 }
 0x48a   : > { %v1147_v33 = vmul.f32 %v2294_v57, %v1146_v31  ;;  %v2210_v57 = vld [vmem:[%s2494_s17 + $0xa0] sm:$0xff] }
 0x48b   : > { %1273 = vmatpush.bf16.msrb.mxu2 %v2210_v57  ;;  %v1379_v57 = vsel %vm969_vm1, %v769_v56, 0 }
 0x48c   : > { %v1148_v34 = vpack.c.bf16 %v1147_v33, %v1132_v32  ;;  %1388 = vmatpush.bf16.msra.mxu1 %v1379_v57 }
 0x48e   : > { %2095 = vmatmul.msk.bf16.vlgmr.msra.gmra.mxu2 %vm892_vm6, %v1148_v34 }
 0x48f   : > { %1418 = vmatpush.bf16.msra.mxu2 %v2197_v26 }
 0x493   : > { %1419 = vmatpush.bf16.msra.mxu2 %v2196_v27 }
 0x49e   : > { %2123 = vmatmul.msk.bf16.vlgmr.msrb.gmra.mxu2 %vm791_vm2, %v2565_v8 }
 0x4ae   : > { %2135 = vmatmul.msk.bf16.vlgmr.msra.gmra.mxu2 %vm791_vm2, %v2565_v8 }
 0x511   : > { %v1165_v46 = vpop.f32.mrf.mxu2 }
 0x519   : > { %v1167_v48 = vpop.f32.mrf.mxu2 }
 0x51a   : > { %v1170_v49 = vpack.c.bf16 %v1167_v48, %v1165_v46 }
 0x51c   : > { %2096 = vmatmul.msk.bf16.vlgmr.msra.gmra.mxu3 %vm869_vm3, %v1170_v49 }
 0x51d   : > { %1447 = vmatpush.bf16.msra.mxu3 %v2205_v22 }
 0x521   : > { %v1275_v17 = vpop.f32.mrf.mxu2  ;;  %1448 = vmatpush.bf16.msra.mxu3 %v2204_v24 }
 0x522   : > { %v1276_v20 = vadd.f32 %v2273_v18, %v1275_v17 }
 0x529   : > { %v1277_v19 = vpop.f32.mrf.mxu2 }
 0x52a   : > { %v1278_v21 = vadd.f32 %v2273_v18, %v1277_v19 }
 0x52c   : > { %2124 = vmatmul.msk.bf16.vlgmr.msrb.gmra.mxu3 %vm869_vm3, %v1280_v54  ;;  %v1353_v23 = vpack.c.bf16 %v1278_v21, %v1276_v20 }
 0x52e   : > { %v1358_v25 = vsel %vm947_vm8, %v1353_v23, 0 }
 0x52f   : > { %1367 = vmatpush.bf16.msra.mxu0 %v1358_v25 }
 0x53c   : > { %2144 = vmatmul.msk.bf16.vlgmr.msra.gmra.mxu3 %vm791_vm2, %v2565_v8 }
 0x59f   : > { %v1186_v59 = vpop.f32.mrf.mxu3 }
 0x5a0   : > { %v2656_v60 = vadd.f32 %v1186_v59, %v987_v58  ;;  %v2274_v59 = vld [vmem:[%s2504_s25 + $0x7] ss:$0 sm:$0xff] }
 0x5a7   : > { %v1188_v62 = vpop.f32.mrf.mxu3 }
 0x5a8   : > { %v2661_v63 = vadd.f32 %v1188_v62, %v988_v61 }
 0x5af   : > { %v1297_v0 = vpop.f32.mrf.mxu3 }
 0x5b0   : > { %v1302_v1 = vsel %vm2584_vm5, %v1297_v0, -1e+10 }
 0x5b1   : > { %v1304_v2 = vsel %vm892_vm6, %v1302_v1, -inf }
 0x5b2   : > { %1305 = vmax.xlane.f32.xlu2 %v1304_v2 }
 0x5b7   : > { %v1299_v41 = vpop.f32.mrf.mxu3 }
 0x5b8   : > { %v1303_v3 = vsel %vm2584_vm5, %v1299_v41, -1e+10 }
 0x5b9   : > { %v1307_v4 = vsel %vm896_vm7, %v1303_v3, -inf }
 0x5ba   : > { %1308 = vmax.xlane.f32.xlu0 %v1307_v4 }
 0x5bf   : > { %v1450_v58 = vpop.f32.mrf.mxu3 }
 0x5c0   : > { %v1451_v61 = vadd.f32 %v2274_v59, %v1450_v58 }
 0x5c7   : > { %v1452_v62 = vpop.f32.mrf.mxu3 }
 0x5c8   : > { %v1453_v0 = vadd.f32 %v2274_v59, %v1452_v62 }
 0x625   : > { %v1306_v5 = vpop.xlane.xlu2 %1305 }
 0x626   : > { %v1310_v42 = vsub.f32 %v1302_v1, %v1306_v5  ;;  %v1485_v1 = vpack.c.bf16 %v1453_v0, %v1451_v61 }
 0x628   : > { %v1312_v9 = vmul.f32 1.442695, %v1310_v42  ;;  %v1490_v2 = vsel %vm869_vm3, %v1485_v1, 0  ;;  %v2275_v42 = vld [vmem:[%s2504_s25 + $0x3] ss:$0 sm:$0xff] }
 0x629   : > { %1499 = vmatpush.bf16.xpose.msrb.mxu1 %v1490_v2 }
 0x62a   : > { %2299 = vpow2.f32 %v1312_v9 }
 0x62d   : > { %v1309_v10 = vpop.xlane.xlu0 %1308 }
 0x62e   : > { %v1311_v11 = vsub.f32 %v1303_v3, %v1309_v10  ;;  %v1421_v3 = vpop.f32.mrf.mxu2 }
 0x62f   : > { %v1422_v10 = vadd.f32 %v2275_v42, %v1421_v3 }
 0x630   : > { %v2300_v12 = vpop.eup %2299  ;;  %v1314_v13 = vmul.f32 1.442695, %v1311_v11 }
 0x631   : > { %v1316_v14 = vsel %vm892_vm6, %v2300_v12, 0.0 }
 0x632   : > { %2301 = vpow2.f32 %v1314_v13  ;;  %1317 = vadd.xlane.f32.xlu1 %v1316_v14  ;;  %v2213_v13 = vld [vmem:[%s2494_s17 + $0xb8] sm:$0xff]  ;;  %v2212_v14 = vld [vmem:[%s2494_s17 + $0xb0] sm:$0xff]  ;;  %s2843_s17 = scalar_lea.vmem %s2797_s6, %s2478_s20 }
 0x633   : > { %1476 = vmatpush.bf16.msrb.mxu0 %v2213_v13 }
 0x636   : > { %v1423_v9 = vpop.f32.mrf.mxu2 }
 0x637   : > { %v1424_v11 = vadd.f32 %v2275_v42, %v1423_v9  ;;  %1477 = vmatpush.bf16.msrb.mxu0 %v2212_v14 }
 0x638   : > { %v2302_v15 = vpop.eup %2301 }
 0x639   : > { %v1319_v16 = vsel %vm896_vm7, %v2302_v15, 0.0 }
 0x63a   : > { %1320 = vadd.xlane.f32.xlu2 %v1319_v16 }
 0x6a5   : > { %v1318_v29 = vpop.xlane.xlu1 %1317 }
 0x6a6   : > { %2303 = vrcp.f32 %v1318_v29  ;;  %v1333_v38 = vand.u32 2147483648, %v1318_v29  ;;  %vm1327_vm4 = vweird.f32 %v1318_v29  ;;  %v1331_v39 = vand.u32 2147483647, %v1318_v29 }
 0x6a8   : > { %v1334_v47 = vor.u32 1.1754944e-38, %v1333_v38  ;;  %vm1332_vm11 = vcmp.eq.f32.partialorder %v1331_v39, 8.507059e+37  ;;  %v770_v39 = vld [vmem:[%s2499_s13 + $0xc] sm:$0xf] }
 0x6ac   : > { %v2304_v30 = vpop.eup %2303 }
 0x6ad   : > { %v1323_v31 = vmul.f32 %v2304_v30, %v1318_v29  ;;  %v1321_v32 = vpop.xlane.xlu2 %1320  ;;  %vm1328_vm0 = vweird.f32 %v2304_v30 }
 0x6ae   : > { %2305 = vrcp.f32 %v1321_v32  ;;  %vm1329_vm9 = vmor %vm1327_vm4, %vm1328_vm0  ;;  %v1348_v43 = vand.u32 2147483648, %v1321_v32  ;;  %v1346_v46 = vand.u32 2147483647, %v1321_v32  ;;  %vm1342_vm12 = vweird.f32 %v1321_v32 }
 0x6af   : > { %v1324_v33 = vsub.f32 1.0, %v1323_v31 }
 0x6b0   : > { %v1349_v50 = vor.u32 1.1754944e-38, %v1348_v43  ;;  %vm1347_vm14 = vcmp.eq.f32.partialorder %v1346_v46, 8.507059e+37 }
 0x6b1   : > { %v1325_v34 = vmul.f32 %v2304_v30, %v1324_v33  ;;  %v2276_v33 = vld [vmem:[%s2504_s25 + $0xb] ss:$0 sm:$0xff] }
 0x6b3   : > { %v1326_v36 = vadd.f32 %v2304_v30, %v1325_v34 }
 0x6b4   : > { %v2306_v35 = vpop.eup %2305 }
 0x6b5   : > { %v1338_v37 = vmul.f32 %v2306_v35, %v1321_v32  ;;  %v1330_v44 = vsel %vm1329_vm9, %v2304_v30, %v1326_v36  ;;  %vm1343_vm10 = vweird.f32 %v2306_v35 }
 0x6b6   : > { %v1335_v49 = vsel %vm1332_vm11, %v1334_v47, %v1330_v44  ;;  %vm1344_vm13 = vmor %vm1342_vm12, %vm1343_vm10  ;;  %vm1608_vm10 = vcmask 254976  }
 0x6b7   : > { %v1339_v40 = vsub.f32 1.0, %v1338_v37  ;;  %v1336_v53 = vmul.f32 %v2300_v12, %v1335_v49  ;;  %v1484_v12 = vpack.c.bf16 %v1424_v11, %v1422_v10 }
 0x6b9   : > { %v1340_v45 = vmul.f32 %v2306_v35, %v1339_v40  ;;  %v1583_v40 = vsel %vm969_vm1, %v770_v39, 0 }
 0x6ba   : > { %1592 = vmatpush.bf16.msrb.mxu3 %v1583_v40 }
 0x6bb   : > { %v1341_v48 = vadd.f32 %v2306_v35, %v1340_v45 }
 0x6bd   : > { %v1345_v51 = vsel %vm1344_vm13, %v2306_v35, %v1341_v48 }
 0x6be   : > { %v1350_v52 = vsel %vm1347_vm14, %v1349_v50, %v1345_v51 }
 0x6bf   : > { %v1351_v54 = vmul.f32 %v2302_v15, %v1350_v52 }
 0x6c1   : > { %v1352_v55 = vpack.c.bf16 %v1351_v54, %v1336_v53 }
 0x6c3   : > { %2125 = vmatmul.msk.bf16.vlgmr.msra.gmra.mxu0 %vm892_vm6, %v1352_v55 }
 0x6d3   : > { %2153 = vmatmul.msk.bf16.vlgmr.msrb.gmra.mxu0 %vm791_vm2, %v2565_v8 }
 0x740   : > { %v1369_v41 = vpop.f32.mrf.mxu0 }
 0x748   : > { %v1371_v4 = vpop.f32.mrf.mxu0 }
 0x749   : > { %v1374_v5 = vpack.c.bf16 %v1371_v4, %v1369_v41 }
 0x74b   : > { %2126 = vmatmul.msk.bf16.vlgmr.msra.gmra.mxu1 %vm869_vm3, %v1374_v5 }
 0x750   : > { %v1479_v32 = vpop.f32.mrf.mxu0 }
 0x751   : > { %v1480_v35 = vadd.f32 %v2276_v33, %v1479_v32 }
 0x758   : > { %v1481_v34 = vpop.f32.mrf.mxu0 }
 0x759   : > { %v1482_v36 = vadd.f32 %v2276_v33, %v1481_v34  ;;  %v2214_v33 = vld [vmem:[%s2521_s4] sm:$0xff] }
 0x75b   : > { %2154 = vmatmul.msk.bf16.vlgmr.msrb.gmra.mxu1 %vm869_vm3, %v1484_v12  ;;  %v1557_v37 = vpack.c.bf16 %v1482_v36, %v1480_v35  ;;  %v2219_v35 = vld [vmem:[%s2535_s15 + $0x18] sm:$0xff] }
 0x75c   : > { %1752 = vmatpush.bf16.msra.mxu1 %v2219_v35 }
 0x75d   : > { %v1562_v38 = vsel %vm947_vm8, %v1557_v37, 0 }
 0x75e   : > { %1571 = vmatpush.bf16.msrb.mxu2 %v1562_v38 }
 0x7c8   : > { %v1390_v15 = vpop.f32.mrf.mxu1 }
 0x7c9   : > { %v2692_v16 = vadd.f32 %v1390_v15, %v2656_v60 }
 0x7d0   : > { %v1392_v17 = vpop.f32.mrf.mxu1 }
 0x7d1   : > { %v2697_v18 = vadd.f32 %v1392_v17, %v2661_v63 }
 0x7d8   : > { %v1501_v19 = vpop.f32.mrf.mxu1 }
 0x7d9   : > { %v1506_v20 = vsel %vm2584_vm5, %v1501_v19, -1e+10 }
 0x7da   : > { %v1508_v21 = vsel %vm892_vm6, %v1506_v20, -inf }
 0x7db   : > { %1509 = vmax.xlane.f32.xlu0 %v1508_v21 }
 0x7e0   : > { %v1503_v22 = vpop.f32.mrf.mxu1 }
 0x7e1   : > { %v1507_v60 = vsel %vm2584_vm5, %v1503_v22, -1e+10 }
 0x7e2   : > { %v1511_v23 = vsel %vm896_vm7, %v1507_v60, -inf }
 0x7e3   : > { %1512 = vmax.xlane.f32.xlu1 %v1511_v23 }
 0x84e   : > { %v1510_v8 = vpop.xlane.xlu0 %1509 }
 0x84f   : > { %v1514_v24 = vsub.f32 %v1506_v20, %v1510_v8  ;;  %v2366_v20 = vmov 32.0  }
 0x851   : > { %v1516_v25 = vmul.f32 1.442695, %v1514_v24 }
 0x853   : > { %2307 = vpow2.f32 %v1516_v25 }
 0x856   : > { %v1513_v63 = vpop.xlane.xlu1 %1512 }
 0x857   : > { %v1515_v26 = vsub.f32 %v1507_v60, %v1513_v63 }
 0x859   : > { %v2308_v27 = vpop.eup %2307  ;;  %v1518_v29 = vmul.f32 1.442695, %v1515_v26 }
 0x85a   : > { %v1520_v30 = vsel %vm892_vm6, %v2308_v27, 0.0 }
 0x85b   : > { %2309 = vpow2.f32 %v1518_v29  ;;  %1521 = vadd.xlane.f32.xlu2 %v1520_v30 }
 0x861   : > { %v2310_v31 = vpop.eup %2309 }
 0x862   : > { %v1523_v28 = vsel %vm896_vm7, %v2310_v31, 0.0 }
 0x863   : > { %1524 = vadd.xlane.f32.xlu0 %v1523_v28 }
 0x8ce   : > { %v1522_v43 = vpop.xlane.xlu2 %1521 }
 0x8cf   : > { %2311 = vrcp.f32 %v1522_v43  ;;  %v1537_v52 = vand.u32 2147483648, %v1522_v43  ;;  %vm1531_vm7 = vweird.f32 %v1522_v43  ;;  %v1535_v53 = vand.u32 2147483647, %v1522_v43 }
 0x8d1   : > { %v1538_v59 = vor.u32 1.1754944e-38, %v1537_v52  ;;  %vm1536_vm15 = vcmp.eq.f32.partialorder %v1535_v53, 8.507059e+37  ;;  %v2277_v53 = vld [vmem:[%s2843_s17] ss:$0 sm:$0xff] }
 0x8d5   : > { %v2312_v44 = vpop.eup %2311 }
 0x8d6   : > { %v1527_v45 = vmul.f32 %v2312_v44, %v1522_v43  ;;  %v1525_v46 = vpop.xlane.xlu0 %1524  ;;  %vm1532_vm5 = vweird.f32 %v2312_v44 }
 0x8d7   : > { %2313 = vrcp.f32 %v1525_v46  ;;  %vm1533_vm8 = vmor %vm1531_vm7, %vm1532_vm5  ;;  %v1552_v55 = vand.u32 2147483648, %v1525_v46  ;;  %v1550_v58 = vand.u32 2147483647, %v1525_v46  ;;  %vm1546_vm0 = vweird.f32 %v1525_v46 }
 0x8d8   : > { %v1528_v47 = vsub.f32 1.0, %v1527_v45  ;;  %2315 = vrcp.f32 %v2366_v20  ;;  %vm1744_vm7 = vcmask 523264  }
 0x8d9   : > { %v1553_v0 = vor.u32 1.1754944e-38, %v1552_v55  ;;  %vm1551_vm9 = vcmp.eq.f32.partialorder %v1550_v58, 8.507059e+37 }
 0x8da   : > { %v1529_v48 = vmul.f32 %v2312_v44, %v1528_v47 }
 0x8dc   : > { %v1530_v50 = vadd.f32 %v2312_v44, %v1529_v48 }
 0x8dd   : > { %v2314_v49 = vpop.eup %2313 }
 0x8de   : > { %v1542_v51 = vmul.f32 %v2314_v49, %v1525_v46  ;;  %v1534_v56 = vsel %vm1533_vm8, %v2312_v44, %v1530_v50  ;;  %vm1547_vm1 = vweird.f32 %v2314_v49  ;;  %v2316_v21 = vpop.eup %2315 }
 0x8df   : > { %v1539_v62 = vsel %vm1536_vm15, %v1538_v59, %v1534_v56  ;;  %vm1548_vm4 = vmor %vm1546_vm0, %vm1547_vm1  ;;  %v1613_v22 = vmul.f32 32.0, %v2316_v21 }
 0x8e0   : > { %v1543_v54 = vsub.f32 1.0, %v1542_v51  ;;  %v1540_v41 = vmul.f32 %v2308_v27, %v1539_v62 }
 0x8e1   : > { %v1614_v60 = vsub.f32 1.0, %v1613_v22 }
 0x8e2   : > { %v1544_v57 = vmul.f32 %v2314_v49, %v1543_v54 }
 0x8e4   : > { %v1545_v61 = vadd.f32 %v2314_v49, %v1544_v57  ;;  %v2278_v57 = vld [vmem:[%s2844_s28] ss:$0 sm:$0xff] }
 0x8e6   : > { %v1549_v1 = vsel %vm1548_vm4, %v2314_v49, %v1545_v61 }
 0x8e7   : > { %v1554_v2 = vsel %vm1551_vm9, %v1553_v0, %v1549_v1 }
 0x8e8   : > { %v1555_v3 = vmul.f32 %v2310_v31, %v1554_v2  ;;  %v2215_v31 = vld [vmem:[%s2521_s4 + $0x8] sm:$0xff]  ;;  %v2218_v2 = vld [vmem:[%s2535_s15 + $0x10] sm:$0xff] }
 0x8e9   : > { %1697 = vmatpush.bf16.msra.mxu0 %v2215_v31  ;;  %1753 = vmatpush.bf16.msra.mxu1 %v2218_v2 }
 0x8ea   : > { %v1556_v4 = vpack.c.bf16 %v1555_v3, %v1540_v41  ;;  %v2217_v41 = vld [vmem:[%s2535_s15 + $0x8] sm:$0xff]  ;;  %v2216_v3 = vld [vmem:[%s2535_s15] sm:$0xff] }
 0x8ec   : > { %2155 = vmatmul.msk.bf16.vlgmr.msrb.gmra.mxu2 %vm892_vm6, %v1556_v4 }
 0x8ed   : > { %1698 = vmatpush.bf16.msra.mxu0 %v2214_v33  ;;  %1754 = vmatpush.bf16.msra.mxu1 %v2217_v41 }
 0x8f1   : > { %1755 = vmatpush.bf16.msra.mxu1 %v2216_v3 }
 0x96f   : > { %v1573_v5 = vpop.f32.mrf.mxu2 }
 0x977   : > { %v1575_v42 = vpop.f32.mrf.mxu2 }
 0x978   : > { %v1578_v9 = vpack.c.bf16 %v1575_v42, %v1573_v5  ;;  %v2279_v5 = vld [vmem:[%s2846_s19] ss:$0 sm:$0xff] }
 0x97a   : > { %2156 = vmatmul.msk.bf16.vlgmr.msrb.gmra.mxu3 %vm869_vm3, %v1578_v9  ;;  %vm1617_vm3 = vweird.f32 %v2316_v21 }
 0x9fd   : > { %v1594_v10 = vpop.f32.mrf.mxu3 }
 0x9fe   : > { %v1599_v11 = vadd.f32 %v1594_v10, %v2692_v16  ;;  %v1615_v16 = vmul.f32 %v2316_v21, %v1614_v60 }
 0xa00   : > { %v1601_v12 = vadd.f32 %v1599_v11, %v2558_v6  ;;  %v1616_v6 = vadd.f32 %v2316_v21, %v1615_v16 }
 0xa02   : > { %v1605_v13 = vsel %vm791_vm2, %v1601_v12, 0.0  ;;  %v2719_v23 = vsel %vm1617_vm3, %v2316_v21, %v1616_v6 }
 0xa03   : > { %1606 = vadd.xlane.f32.xlu1 %v1605_v13 }
 0xa05   : > { %v1596_v14 = vpop.f32.mrf.mxu3 }
 0xa06   : > { %v1600_v15 = vadd.f32 %v1596_v14, %v2697_v18  ;;  %v2280_v14 = vld [vmem:[%s677_s0] ss:$0 sm:$0xff] }
 0xa08   : > { %v1602_v17 = vadd.f32 %v1600_v15, %v2561_v7 }
 0xa0a   : > { %v1609_v19 = vsel %vm1608_vm10, %v1602_v17, 0.0 }
 0xa0b   : > { %1610 = vadd.xlane.f32.xlu2 %v1609_v19 }
 0xa76   : > { %v1607_v8 = vpop.xlane.xlu1 %1606 }
 0xa77   : > { %v1619_v18 = vmul.f32 %v2719_v23, %v1607_v8 }
 0xa79   : > { %v1621_v24 = vsub.f32 %v1601_v12, %v1619_v18 }
 0xa7b   : > { %v1623_v7 = vmul.f32 %v1621_v24, %v1621_v24 }
 0xa7d   : > { %v1625_v25 = vsel %vm791_vm2, %v1623_v7, 0.0 }
 0xa7e   : > { %1626 = vadd.xlane.f32.xlu0 %v1625_v25  ;;  %v1611_v63 = vpop.xlane.xlu2 %1610 }
 0xa7f   : > { %v1620_v26 = vmul.f32 %v2719_v23, %v1611_v63 }
 0xa81   : > { %v1622_v27 = vsub.f32 %v1602_v17, %v1620_v26 }
 0xa83   : > { %v1624_v29 = vmul.f32 %v1622_v27, %v1622_v27 }
 0xa85   : > { %v1628_v30 = vsel %vm1608_vm10, %v1624_v29, 0.0 }
 0xa86   : > { %1629 = vadd.xlane.f32.xlu1 %v1628_v30 }
 0xaf1   : > { %v1627_v28 = vpop.xlane.xlu0 %1626 }
 0xaf2   : > { %v1631_v32 = vmul.f32 %v1627_v28, %v2719_v23 }
 0xaf4   : > { %v1633_v34 = vadd.f32 1e-05, %v1631_v32 }
 0xaf6   : > { %2317 = vrsqrt.f32 %v1633_v34  ;;  %vm1641_vm11 = vweird.f32 %v1633_v34 }
 0xaf9   : > { %v1630_v36 = vpop.xlane.xlu1 %1629 }
 0xafa   : > { %v1632_v37 = vmul.f32 %v1630_v36, %v2719_v23 }
 0xafc   : > { %v2318_v38 = vpop.eup %2317  ;;  %v1634_v39 = vadd.f32 1e-05, %v1632_v37 }
 0xafd   : > { %v1636_v40 = vmul.f32 %v2318_v38, %v1633_v34  ;;  %vm1642_vm6 = vweird.f32 %v2318_v38 }
 0xafe   : > { %2319 = vrsqrt.f32 %v1634_v39  ;;  %vm1643_vm12 = vmor %vm1641_vm11, %vm1642_vm6  ;;  %vm1651_vm14 = vweird.f32 %v1634_v39 }
 0xaff   : > { %v1637_v43 = vmul.f32 %v2318_v38, %v1636_v40 }
 0xb01   : > { %v1638_v44 = vmul.f32 0.5, %v1637_v43 }
 0xb03   : > { %v1639_v45 = vsub.f32 1.5, %v1638_v44 }
 0xb04   : > { %v2320_v46 = vpop.eup %2319 }
 0xb05   : > { %v1640_v47 = vmul.f32 %v2318_v38, %v1639_v45  ;;  %v1646_v48 = vmul.f32 %v2320_v46, %v1634_v39  ;;  %vm1652_vm13 = vweird.f32 %v2320_v46  ;;  %v2281_v45 = vld [vmem:[%s680_s14] ss:$0 sm:$0xff] }
 0xb06   : > { %vm1653_vm5 = vmor %vm1651_vm14, %vm1652_vm13 }
 0xb07   : > { %v1647_v49 = vmul.f32 %v2320_v46, %v1646_v48  ;;  %v1644_v50 = vsel %vm1643_vm12, %v2318_v38, %v1640_v47  ;;  %v2282_v47 = vld [vmem:[%s683_s8] ss:$0 sm:$0xff] }
 0xb08   : > { %v1655_v54 = vmul.f32 %v1644_v50, %v1621_v24 }
 0xb09   : > { %v1648_v51 = vmul.f32 0.5, %v1647_v49 }
 0xb0a   : > { %v1660_v58 = vmul.f32 %v2277_v53, %v1655_v54 }
 0xb0b   : > { %v1649_v52 = vsub.f32 1.5, %v1648_v51 }
 0xb0c   : > { %v1665_v62 = vadd.f32 %v2278_v57, %v1660_v58 }
 0xb0d   : > { %v1650_v55 = vmul.f32 %v2320_v46, %v1649_v52 }
 0xb0f   : > { %v1654_v56 = vsel %vm1653_vm5, %v2320_v46, %v1650_v55 }
 0xb10   : > { %v1656_v59 = vmul.f32 %v1654_v56, %v1622_v27 }
 0xb12   : > { %v1661_v61 = vmul.f32 %v2277_v53, %v1656_v59 }
 0xb14   : > { %v1666_v0 = vadd.f32 %v2278_v57, %v1661_v61 }
 0xb16   : > { %v1672_v1 = vpack.c.bf16 %v1666_v0, %v1665_v62 }
 0xb18   : > { %2165 = vmatmul.msk.bf16.vlgmr.msra.gmra.mxu0 %vm791_vm2, %v1672_v1 }
 0xb95   : > { %v1700_v4 = vpop.f32.mrf.mxu0 }
 0xb96   : > { %v1701_v42 = vadd.f32 %v2279_v5, %v1700_v4 }
 0xb98   : > { %v1705_v11 = vmax.f32 %v1701_v42, 0.0 }
 0xb9d   : > { %v1702_v9 = vpop.f32.mrf.mxu0 }
 0xb9e   : > { %v1703_v10 = vadd.f32 %v2279_v5, %v1702_v9 }
 0xba0   : > { %v1706_v12 = vmax.f32 %v1703_v10, 0.0 }
 0xba2   : > { %v1716_v13 = vpack.c.bf16 %v1706_v12, %v1705_v11 }
 0xba4   : > { %2182 = vmatmul.msk.bf16.vlgmr.msra.gmra.mxu1 %vm1744_vm7, %v1716_v13 }
 0xc21   : > { %v1757_v15 = vpop.f32.mrf.mxu1 }
 0xc22   : > { %v1758_v17 = vadd.f32 %v2280_v14, %v1757_v15 }
 0xc24   : > { %v1762_v19 = vadd.f32 %v1758_v17, %v1665_v62 }
 0xc26   : > { %v1766_v20 = vsel %vm791_vm2, %v1762_v19, 0.0 }
 0xc27   : > { %1767 = vadd.xlane.f32.xlu2 %v1766_v20 }
 0xc29   : > { %v1759_v21 = vpop.f32.mrf.mxu1 }
 0xc2a   : > { %v1760_v22 = vadd.f32 %v2280_v14, %v1759_v21 }
 0xc2c   : > { %v1763_v60 = vadd.f32 %v1760_v22, %v1666_v0 }
 0xc2e   : > { %v1769_v16 = vsel %vm1608_vm10, %v1763_v60, 0.0 }
 0xc2f   : > { %1770 = vadd.xlane.f32.xlu0 %v1769_v16 }
 0xc9a   : > { %v1768_v6 = vpop.xlane.xlu2 %1767 }
 0xc9b   : > { %v1772_v8 = vmul.f32 %v1768_v6, %v2719_v23 }
 0xc9d   : > { %v1774_v18 = vsub.f32 %v1762_v19, %v1772_v8 }
 0xc9f   : > { %v1776_v24 = vmul.f32 %v1774_v18, %v1774_v18 }
 0xca1   : > { %v1778_v7 = vsel %vm791_vm2, %v1776_v24, 0.0 }
 0xca2   : > { %v1771_v25 = vpop.xlane.xlu0 %1770  ;;  %1779 = vadd.xlane.f32.xlu1 %v1778_v7 }
 0xca3   : > { %v1773_v63 = vmul.f32 %v1771_v25, %v2719_v23 }
 0xca5   : > { %v1775_v26 = vsub.f32 %v1763_v60, %v1773_v63 }
 0xca7   : > { %v1777_v27 = vmul.f32 %v1775_v26, %v1775_v26 }
 0xca9   : > { %v1781_v29 = vsel %vm1608_vm10, %v1777_v27, 0.0 }
 0xcaa   : > { %1782 = vadd.xlane.f32.xlu2 %v1781_v29 }
 0xd15   : > { %v1780_v30 = vpop.xlane.xlu1 %1779 }
 0xd16   : > { %v1784_v31 = vmul.f32 %v1780_v30, %v2719_v23 }
 0xd18   : > { %v1786_v28 = vadd.f32 1e-05, %v1784_v31 }
 0xd1a   : > { %2321 = vrsqrt.f32 %v1786_v28  ;;  %vm1794_vm1 = vweird.f32 %v1786_v28 }
 0xd1d   : > { %v1783_v32 = vpop.xlane.xlu2 %1782 }
 0xd1e   : > { %v1785_v33 = vmul.f32 %v1783_v32, %v2719_v23 }
 0xd20   : > { %v2322_v34 = vpop.eup %2321  ;;  %v1787_v35 = vadd.f32 1e-05, %v1785_v33 }
 0xd21   : > { %v1789_v36 = vmul.f32 %v2322_v34, %v1786_v28  ;;  %vm1795_vm8 = vweird.f32 %v2322_v34 }
 0xd22   : > { %2323 = vrsqrt.f32 %v1787_v35  ;;  %vm1796_vm15 = vmor %vm1794_vm1, %vm1795_vm8  ;;  %vm1804_vm4 = vweird.f32 %v1787_v35 }
 0xd23   : > { %v1790_v37 = vmul.f32 %v2322_v34, %v1789_v36 }
 0xd25   : > { %v1791_v38 = vmul.f32 0.5, %v1790_v37 }
 0xd27   : > { %v1792_v39 = vsub.f32 1.5, %v1791_v38 }
 0xd28   : > { %v2324_v40 = vpop.eup %2323 }
 0xd29   : > { %v1793_v43 = vmul.f32 %v2322_v34, %v1792_v39  ;;  %v1799_v44 = vmul.f32 %v2324_v40, %v1787_v35  ;;  %vm1805_vm0 = vweird.f32 %v2324_v40 }
 0xd2a   : > { %vm1806_vm9 = vmor %vm1804_vm4, %vm1805_vm0 }
 0xd2b   : > { %v1797_v23 = vsel %vm1796_vm15, %v2322_v34, %v1793_v43  ;;  %v1800_v46 = vmul.f32 %v2324_v40, %v1799_v44 }
 0xd2c   : > { %v1808_v48 = vmul.f32 %v1797_v23, %v1774_v18 }
 0xd2d   : > { %v1801_v49 = vmul.f32 0.5, %v1800_v46 }
 0xd2e   : > { %v1813_v50 = vmul.f32 %v2281_v45, %v1808_v48 }
 0xd2f   : > { %v1802_v51 = vsub.f32 1.5, %v1801_v49 }
 0xd30   : > { %v1818_v52 = vadd.f32 %v2282_v47, %v1813_v50 }
 0xd31   : > { %v1803_v53 = vmul.f32 %v2324_v40, %v1802_v51 }
 0xd32   : > { %1820 = vst.msk [vmem:[%s2548_s9] sm:$0xff] %vm791_vm2, %v1818_v52 }
 0xd33   : > { %v1807_v54 = vsel %vm1806_vm9, %v2324_v40, %v1803_v53 }
 0xd34   : > { %v1809_v55 = vmul.f32 %v1807_v54, %v1775_v26 }
 0xd36   : > { %v1814_v56 = vmul.f32 %v2281_v45, %v1809_v55 }
 0xd38   : > { %v1819_v57 = vadd.f32 %v2282_v47, %v1814_v56 }
 0xd3a   : > { %1821 = vst.msk [vmem:[%s2548_s9 + $0x8] sm:$0x3] %vm1608_vm10, %v1819_v57 }
 0xd3b PF: > { %s2848_s20 = sld [smem:[#allocation5_spill]] }
 0xd3c   : > { %s2849_s29 = sld [smem:[#allocation3_spill]] }
 0xd3d   : > { %s2850_s30 = sld [smem:[#allocation4_spill]] }
 0xd3e   : > { %s2851_s15 = sld [smem:[#allocation6_spill]] }
 0xd3f   : > { %s2852_s16 = sld [smem:[#allocation7_spill]] }
 0xd41   : > { %s24_s17 = sadd.s32 1, %s2848_s20  }
 0xd42   : > { %p21_p8 = scmp.ge.s32.totalorder %s24_s17, 6  }
 0xd44   :  { %23 = sbr.rel (!%p21_p8) target bundleno = 10 (0xa), region = 149 }

// kernel: seq2seq_forward.4
= control target key start
LH: loop header
LB: loop body
LE: loop exit
PB: predicated region body
PF: predicated region fallthrough
CT: control target
= control target key end

     0   :  { %s4671_s0 = inlined_call_operand.vmem [shape: f32[2,8,32], index: 0, kind: input, shape index: {}]   ;;  %s4672_s1 = inlined_call_operand.vmem [shape: f32[2,10,32], index: 1, kind: input, shape index: {}]   ;;  %s4673_s2 = inlined_call_operand.vmem [shape: f32[2,1,8], index: 2, kind: input, shape index: {}]   ;;  %s4674_s3 = inlined_call_operand.vmem [shape: f32[2,1,10], index: 3, kind: input, shape index: {}]   ;;  %s4675_s4 = inlined_call_operand.vmem [shape: bf16[2,12,32,8], index: 4, kind: input, shape index: {}]   ;;  %s4676_s5 = inlined_call_operand.vmem [shape: f32[2,12,1,8], index: 5, kind: input, shape index: {}]   ;;  %s4677_s6 = inlined_call_operand.vmem [shape: bf16[2,4,8,32], index: 6, kind: input, shape index: {}]   ;;  %s4678_s7 = inlined_call_operand.vmem [shape: f32[2,1,32], index: 7, kind: input, shape index: {}]   ;;  %s4679_s8 = inlined_call_operand.vmem [shape: f32[2,1,32], index: 8, kind: input, shape index: {}]   ;;  %s4680_s9 = inlined_call_operand.vmem [shape: f32[2,1,32], index: 9, kind: input, shape index: {}]   ;;  %s4681_s10 = inlined_call_operand.vmem [shape: bf16[2,4,32,8], index: 10, kind: input, shape index: {}]   ;;  %s4682_s11 = inlined_call_operand.vmem [shape: f32[2,4,1,8], index: 11, kind: input, shape index: {}]   ;;  %s4683_s12 = inlined_call_operand.vmem [shape: bf16[2,8,32,8], index: 12, kind: input, shape index: {}]   ;;  %s4684_s13 = inlined_call_operand.vmem [shape: f32[2,8,1,8], index: 13, kind: input, shape index: {}]   ;;  %s4685_s14 = inlined_call_operand.vmem [shape: bf16[2,4,8,32], index: 14, kind: input, shape index: {}]   ;;  %s4686_s15 = inlined_call_operand.vmem [shape: f32[2,1,32], index: 15, kind: input, shape index: {}]   ;;  %s4687_s16 = inlined_call_operand.vmem [shape: f32[2,1,32], index: 16, kind: input, shape index: {}]   ;;  %s4688_s17 = inlined_call_operand.vmem [shape: f32[2,1,32], index: 17, kind: input, shape index: {}]   ;;  %s4689_s18 = inlined_call_operand.vmem [shape: bf16[2,32,64], index: 18, kind: input, shape index: {}]   ;;  %s4690_s19 = inlined_call_operand.vmem [shape: f32[2,1,64], index: 19, kind: input, shape index: {}]   ;;  %s4691_s20 = inlined_call_operand.vmem [shape: bf16[2,64,32], index: 20, kind: input, shape index: {}]   ;;  %s4692_s21 = inlined_call_operand.vmem [shape: f32[2,1,32], index: 21, kind: input, shape index: {}]   ;;  %s4693_s22 = inlined_call_operand.vmem [shape: f32[2,1,32], index: 22, kind: input, shape index: {}]   ;;  %s4694_s23 = inlined_call_operand.vmem [shape: f32[2,1,32], index: 23, kind: input, shape index: {}]   ;;  %s4695_s24 = inlined_call_operand.vmem [shape: f32[2,8,32], index: 24, kind: output, shape index: {0}]   ;;  %s4696_s25 = inlined_call_operand.hbm [shape: f32[2,4,8,128], index: 25, kind: output, shape index: {1}]  }
   0x1   :  { %4717 = sst [smem:[#allocation23_spill]] %s4671_s0 }
   0x2   :  { %4718 = sst [smem:[#allocation24_spill]] %s4672_s1 }
   0x3   :  { %4719 = sst [smem:[#allocation25_spill]] %s4673_s2 }
   0x4   :  { %4720 = sst [smem:[#allocation26_spill]] %s4674_s3 }
   0x5   :  { %4721 = sst [smem:[#allocation27_spill]] %s4675_s4 }
   0x6   :  { %4722 = sst [smem:[#allocation28_spill]] %s4676_s5 }
   0x7   :  { %4723 = sst [smem:[#allocation29_spill]] %s4677_s6 }
   0x8   :  { %4724 = sst [smem:[#allocation30_spill]] %s4678_s7 }
   0x9   :  { %4725 = sst [smem:[#allocation31_spill]] %s4679_s8 }
   0xa   :  { %4726 = sst [smem:[#allocation32_spill]] %s4680_s9 }
   0xb   :  { %4727 = sst [smem:[#allocation33_spill]] %s4681_s10 }
   0xc   :  { %4728 = sst [smem:[#allocation34_spill]] %s4682_s11 }
   0xd   :  { %4729 = sst [smem:[#allocation35_spill]] %s4683_s12 }
   0xe   :  { %4730 = sst [smem:[#allocation36_spill]] %s4684_s13 }
   0xf   :  { %4731 = sst [smem:[#allocation37_spill]] %s4685_s14 }
  0x10   :  { %4732 = sst [smem:[#allocation38_spill]] %s4686_s15 }
  0x11   :  { %4733 = sst [smem:[#allocation39_spill]] %s4687_s16 }
  0x12   :  { %4734 = sst [smem:[#allocation40_spill]] %s4688_s17 }
  0x13   :  { %4735 = sst [smem:[#allocation41_spill]] %s4689_s18 }
  0x14   :  { %4736 = sst [smem:[#allocation42_spill]] %s4690_s19 }
  0x15   :  { %4737 = sst [smem:[#allocation43_spill]] %s4691_s20 }
  0x16   :  { %4738 = sst [smem:[#allocation44_spill]] %s4692_s21 }
  0x17   :  { %4739 = sst [smem:[#allocation45_spill]] %s4693_s22 }
  0x18   :  { %4740 = sst [smem:[#allocation46_spill]] %s4694_s23 }
  0x19   :  { %4741 = sst [smem:[#allocation47_spill]] %s4695_s24 }
  0x1a   :  { %4742 = sst [smem:[#allocation48_spill]] %s4696_s25 }
  0x1b   :  { %31 = vsyncpa [#allocation3], 0 }
  0x1c   :  { %33 = vsyncpa [#allocation3 + $0x1], 0  ;;  %s4044_s29 = smov 0   ;;  %s4046_s2 = smov 0  }
  0x1d   :  { %s4048_s6 = smov 0   ;;  %s4050_s30 = smov 0  }
  0x1e   :  { %s4052_s7 = smov 0   ;;  %s4054_s3 = smov 0  }
  0x1f   :  { %s4056_s26 = smov 0   ;;  %s4058_s1 = smov 0  }
  0x20 LB: > { %4743 = sst [smem:[#allocation5_spill]] %s3880_s29  ;;  %s3300_s8 = sadd.s32 4294967295, %s3908_s1   ;;  %s3908_s1 = sphi %s4058_s1, %s39_s1   ;;  %s3904_s26 = sphi %s4056_s26, %s4836_s26   ;;  %s3900_s3 = sphi %s4054_s3, %s4835_s3   ;;  %s3896_s7 = sphi %s4052_s7, %s4834_s7   ;;  %s3892_s30 = sphi %s4050_s30, %s4833_s30   ;;  %s3888_s6 = sphi %s4048_s6, %s4832_s6   ;;  %s3884_s2 = sphi %s4046_s2, %s4831_s2   ;;  %s3880_s29 = sphi %s4044_s29, %s4830_s29  }
  0x21   : > { %4744 = sst [smem:[#allocation6_spill]] %s3884_s2  ;;  %s3301_s27 = sadd.s32 4294967294, %s3908_s1  }
  0x22   : > { %4745 = sst [smem:[#allocation7_spill]] %s3888_s6  ;;  %s48_s4 = sadd.s32 1, %s3900_s3 }
  0x23   : > { %4746 = sst [smem:[#allocation8_spill]] %s3892_s30  ;;  %p49_p0 = scmp.ge.s32.totalorder %s48_s4, 2 }
  0x24   : > { %4747 = sst [smem:[#allocation9_spill]] %s3896_s7  ;;  %s51_s28 = sadd.s32 1, %s3904_s26 }
  0x25   : > { %4748 = sst [smem:[#allocation10_spill]] %s3900_s3  ;;  %p718_p1 = scmp.ne.s32.totalorder %s3888_s6, %s3884_s2 }
  0x26   : > { %4749 = sst [smem:[#allocation11_spill]] %s3904_s26  ;;  %p719_p2 = scmp.eq.s32.totalorder %s3300_s8, 3 }
  0x27   : > { %4750 = sst [smem:[#allocation12_spill]] %s3908_s1  ;;  %s4838_s4 = smov (%p49_p0, %s48_s4), 0 }
  0x28   : > { %4751 = sst [smem:[#allocation13_spill]] %s4838_s4  ;;  %s4840_s28 = smov (!%p49_p0, %s51_s28), %s3904_s26 }
  0x29   : > { %p4093_p3 = por %p719_p2, %p718_p1  ;;  %p724_p4 = scmp.ne.s32.totalorder %s3884_s2, %s3880_s29 }
  0x2a   : > { %p53_p5 = scmp.ge.s32.totalorder %s4840_s28, 2  ;;  %p725_p6 = scmp.eq.s32.totalorder %s3301_s27, 3 }
  0x2b   : > { %s4752_s9 = scalar_select %p4093_p3, 1, 0 }
  0x2c   : > { %p3304_p7 = scmp.ge.s32.totalorder %s3908_s1, 1  ;;  %p907_p8 = scmp.lt.s32.totalorder %s3908_s1, 5 }
  0x2d   : > { %4753 = sst [smem:[#allocation14_spill]] %s4752_s9  ;;  %s4842_s28 = smov (%p53_p5, %s4840_s28), 0 }
  0x2e   : > { %4754 = sst [smem:[#allocation15_spill]] %s4842_s28  ;;  %p4103_p9 = por %p725_p6, %p724_p4 }
  0x2f   : > { %p908_p10 = pnand %p3304_p7, %p907_p8  ;;  %s705_s0 = ssub.s32 %s3904_s26, %s4842_s28 }
  0x30   : > { %s4755_s5 = scalar_select %p4103_p9, 1, 0 }
  0x31   : > { %s708_s8 = sadd.s32 1, %s3888_s6  ;;  %p706_p11 = scmp.eq.s32.totalorder %s705_s0, 0 }
  0x32   : > { %4756 = sst [smem:[#allocation16_spill]] %s4755_s5  ;;  %911 = sbr.rel (%p908_p10) target bundleno = 6070 (0x17b6), region = 116 }
  0x33   : > { %s4111_s4 = scalar_select %p706_p11, %s3888_s6, %s708_s8  }
  0x35   : > { %4757 = sst [smem:[#allocation17_spill]] %s4111_s4 }
  0x37   : > { %s4699_s27 = sand.u32 1, %s3884_s2   ;;  %p1066_p12 = scmp.lt.s32.totalorder %s3896_s7, 1 }
  0x38   : > { %s4117_s3 = sshll.u32 %s4699_s27, 5  ;;  %p1081_p13 = scmp.lt.s32.totalorder %s3892_s30, 1 }
  0x39   : > { %s4121_s5 = scalar_select %p1066_p12, %s3896_s7, 1 }
  0x3a   : > { %s4124_s0 = scalar_select %p1081_p13, %s3892_s30, 1 }
  0x3b   : > { %s4712_s8 = sshll.u32 %s4121_s5, 3  ;;  %s3601_s27 = sshll.u32 %s4121_s5, 4 }
  0x3c   : > { %s4758_s4 = sld [smem:[#allocation23_spill]]  ;;  %s3663_s19 = smul.u32 192, %s4124_s0 }
  0x3d   : > { %s4760_s25 = sld [smem:[#allocation24_spill]]  ;;  %s3602_s26 = sshll.u32 %s4124_s0, 4 }
  0x3e   : > { %s3664_s28 = smul.u32 12, %s4124_s0  ;;  %s4769_s24 = sld [smem:[#allocation28_spill]] }
  0x3f   : > { %s4772_s10 = sld [smem:[#allocation33_spill]]  ;;  %s3314_s20 = sshll.u32 %s4124_s0, 2 }
  0x40   : > { %s4773_s11 = sld [smem:[#allocation34_spill]]  ;;  %s3604_s23 = sshll.u32 %s4124_s0, 7 }
  0x41   : > { %s4774_s12 = sld [smem:[#allocation35_spill]] }
  0x42   : > { %s4133_s6 = scalar_lea.vmem %s4758_s4, %s4712_s8  ;;  %s4775_s13 = sld [smem:[#allocation36_spill]] }
  0x43   : > { %4759 = sst [smem:[#allocation18_spill]] %s4133_s6  ;;  %s4138_s9 = scalar_lea.vmem %s4760_s25, %s3601_s27 }
  0x44   : > { %4761 = sst [smem:[#allocation19_spill]] %s4138_s9  ;;  %s4168_s9 = scalar_lea.vmem %s4769_s24, %s3664_s28 }
  0x45   : > { %s4764_s6 = sld [smem:[#allocation29_spill]] }
  0x46   : > { %s4766_s27 = sld [smem:[#allocation27_spill]]  ;;  %s4188_s22 = scalar_lea.vmem %s4773_s11, %s3314_s20 }
  0x47   : > { %s4194_s4 = scalar_lea.vmem %s4774_s12, %s3604_s23  ;;  %s4776_s14 = sld [smem:[#allocation37_spill]] }
  0x48   : > { %s4780_s25 = sld [smem:[#allocation41_spill]] }
  0x49   : > { %s4784_s23 = sld [smem:[#allocation44_spill]] }
  0x4a   : > { %s4785_s17 = sld [smem:[#allocation45_spill]] }
  0x4b   : > { %s4154_s29 = scalar_lea.vmem %s4764_s6, %s3602_s26 }
  0x4c   : > { %4765 = sst [smem:[#allocation20_spill]] %s4154_s29  ;;  %s4159_s2 = scalar_lea.vmem %s4766_s27, %s3663_s19 }
  0x4d   : > { %4767 = sst [smem:[#allocation21_spill]] %s4159_s2  ;;  %s3603_s27 = sshll.u32 %s4124_s0, 6 }
  0x4e   : > { %s4182_s7 = scalar_lea.vmem %s4772_s10, %s3603_s27  ;;  %s3317_s2 = sshll.u32 %s4124_s0, 3 }
  0x4f   : > { %s4200_s1 = scalar_lea.vmem %s4775_s13, %s3317_s2  ;;  %s4205_s24 = scalar_lea.vmem %s4776_s14, %s3602_s26 }
  0x50   : > { %s4222_s11 = scalar_lea.vmem %s4780_s25, %s3602_s26  ;;  %s3607_s14 = sshll.u32 %s4124_s0, 5 }
  0x51   : > { %4781 = sst [smem:[#allocation22_spill]] %s4222_s11  ;;  %s1151_s21 = scalar_lea.vmem %s4784_s23, %s4124_s0 }
  0x52   : > { %s4783_s19 = sld [smem:[#allocation43_spill]]  ;;  %s1154_s6 = scalar_lea.vmem %s4785_s17, %s4124_s0 }
  0x53   : > { %s4786_s25 = sld [smem:[#allocation46_spill]]  ;;  %s4787_s27 = sshll.u32 %s4121_s5, 3 }
  0x54   : > { %s4788_s13 = sld [smem:[#allocation47_spill]] }
  0x58   : > { %s4232_s15 = scalar_lea.vmem %s4783_s19, %s3607_s14  ;;  %s4254_s14 = scalar_lea.vmem [#allocation2], %s4117_s3 }
  0x59   : > { %s1157_s16 = scalar_lea.vmem %s4786_s25, %s4124_s0  ;;  %s4789_s19 = sld [smem:[#allocation8_spill]] }
  0x5a   : > { %s4251_s11 = scalar_lea.vmem %s4788_s13, %s4787_s27 }
  0x5f   : > { %p3325_p0 = scmp.ne.s32.totalorder %s4789_s19, 0 }
  0x60   : > { %s4790_s23 = sld [smem:[#allocation18_spill]] (!%p3325_p0) }
  0x61   : > { %1166 = sbr.rel (%p3325_p0) target bundleno = 104 (0x68), region = 120 }
  0x66   : > { %v1167_v0 = vld [vmem:[%s4790_s23] sm:$0xff]  ;;  %vm1168_vm0 = vcmask 261120  }
  0x67   : > { %1169 = vst.msk [vmem:[%s4251_s11] sm:$0xff] %vm1168_vm0, %v1167_v0 }
  0x68 PF: > { %s4791_s10 = sld [smem:[#allocation21_spill]]  ;;  %vm1273_vm1 = vcmask 261120   ;;  %v3741_v7 = vld [vmem:[%s4168_s9 + $0x4] ss:$0 sm:$0xff]  ;;  %v3740_v10 = vld [vmem:[%s4168_s9] ss:$0 sm:$0xff]  ;;  %v1175_v21 = vlaneseq }
  0x69   : > { %vm1348_vm2 = vcmask 64512   ;;  %s4792_s3 = sld [smem:[#allocation25_spill]]  ;;  %v3910_v22 = vmov 0   ;;  %v3742_v40 = vld [vmem:[%s4168_s9 + $0x8] ss:$0 sm:$0xff]  ;;  %vm1398_vm7 = vcmask 1043456  }
  0x6a   : > { %v1176_v24 = vshrl.u32 %v1175_v21, 7  ;;  %v1178_v25 = vand.u32 127, %v1175_v21  ;;  %s4796_s28 = sld [smem:[#allocation20_spill]]  ;;  %v3743_v62 = vld [vmem:[%s4168_s9 + $0x5] ss:$0 sm:$0xff] }
  0x6b   : > { %s4797_s8 = sld [smem:[#allocation30_spill]] }
  0x6c   : > { %vm1182_vm5 = vcmp.le.s32.totalorder %v1178_v25, %v1176_v24  ;;  %s4800_s27 = sld [smem:[#allocation31_spill]] }
  0x6d   : > { %s4802_s23 = sld [smem:[#allocation32_spill]] }
  0x6e   : > { %v3609_v1 = vld [vmem:[%s4791_s10 + $0x8] sm:$0xff]  ;;  %v3608_v3 = vld [vmem:[%s4791_s10] sm:$0xff]  ;;  %v3619_v32 = vld [vmem:[%s4791_s10 + $0x58] sm:$0xff] }
  0x6f   : > { %v3617_v2 = vld [vmem:[%s4791_s10 + $0x48] sm:$0xff]  ;;  %v3616_v4 = vld [vmem:[%s4791_s10 + $0x40] sm:$0xff]  ;;  %1283 = vmatpush.bf16.msra.mxu0 %v3609_v1  ;;  %s4793_s20 = scalar_lea.vmem %s4792_s3, %s4121_s5  ;;  %v3618_v42 = vld [vmem:[%s4791_s10 + $0x50] sm:$0xff]  ;;  %s4804_s3 = sld [smem:[#allocation26_spill]] }
  0x70   : > { %1311 = vmatpush.bf16.msra.mxu1 %v3617_v2  ;;  %v4264_v5 = vld [vmem:[%s4251_s11] sm:$0xff]  ;;  %v3625_v18 = vld [vmem:[%s4791_s10 + $0x88] sm:$0xff]  ;;  %v3611_v44 = vld [vmem:[%s4791_s10 + $0x18] sm:$0xff] }
  0x71   : > { %v4268_v6 = vpack.c.bf16 %v4264_v5, %v4264_v5  ;;  %1339 = vmatpush.bf16.msra.mxu2 %v3625_v18  ;;  %v3624_v19 = vld [vmem:[%s4791_s10 + $0x80] sm:$0xff]  ;;  %v3610_v46 = vld [vmem:[%s4791_s10 + $0x10] sm:$0xff]  ;;  %s4798_s26 = scalar_lea.vmem %s4797_s8, %s4124_s0 }
  0x72   : > { %v1173_v20 = vld [vmem:[%s4793_s20] sm:$0x1]  ;;  %s4801_s12 = scalar_lea.vmem %s4800_s27, %s4124_s0 }
  0x73   : > { %1284 = vmatpush.bf16.msra.mxu0 %v3608_v3  ;;  %vm1174_vm3 = vcmp.gt.f32.partialorder %v1173_v20, 0.5  ;;  %v1249_v47 = vld [vmem:[%s4796_s28] sm:$0xf] }
  0x74   : > { %1312 = vmatpush.bf16.msra.mxu1 %v3616_v4  ;;  %v1179_v23 = vsel %vm1174_vm3, 1, %v3910_v22  ;;  %v1420_v48 = vsel %vm1398_vm7, %v1249_v47, 0 }
  0x75   : > { %1340 = vmatpush.bf16.msra.mxu2 %v3624_v19  ;;  %v1180_v26 = vperm.slane %v1179_v23, 0  ;;  %v3746_v23 = vld [vmem:[%s4168_s9 + $0x9] ss:$0 sm:$0xff]  ;;  %s4805_s20 = scalar_lea.vmem %s4804_s3, %s4121_s5  ;;  %s4820_s5 = sld [smem:[#allocation8_spill]] }
  0x76   : > { %3334 = vmatmul.msk.bf16.vlgmr.msra.gmra.mxu0 %vm1273_vm1, %v4268_v6 }
  0x77   : > { %3343 = vmatmul.msk.bf16.vlgmr.msra.gmra.mxu1 %vm1273_vm1, %v4268_v6  ;;  %vm1181_vm4 = vcmp.eq.s32.totalorder %v1180_v26, 1 }
  0x78   : > { %3352 = vmatmul.msk.bf16.vlgmr.msra.gmra.mxu2 %vm1273_vm1, %v4268_v6  ;;  %vm4288_vm6 = vmand %vm1181_vm4, %vm1182_vm5  ;;  %1429 = vmatpush.bf16.msrb.mxu1 %v1420_v48 }
  0x79   : > { %1457 = vmatpush.bf16.msrb.mxu2 %v3611_v44 }
  0x7b   : > { %p3592_p1 = scmp.ne.s32.totalorder %s4820_s5, 1 }
  0x7d   : > { %1458 = vmatpush.bf16.msrb.mxu2 %v3610_v46 }
  0x88   : > { %3364 = vmatmul.msk.bf16.vlgmr.msrb.gmra.mxu2 %vm1273_vm1, %v4268_v6 }
  0xf3   : > { %v1286_v8 = vpop.f32.mrf.mxu0 }
  0xf4   : > { %v1314_v9 = vpop.f32.mrf.mxu1  ;;  %v1287_v13 = vadd.f32 %v3740_v10, %v1286_v8  ;;  %v3744_v10 = vld [vmem:[%s4168_s9 + $0x1] ss:$0 sm:$0xff] }
  0xf5   : > { %v1315_v11 = vadd.f32 %v3741_v7, %v1314_v9 }
  0xf6   : > { %v1346_v17 = vpack.c.bf16 %v1287_v13, %v1287_v13 }
  0xf7   : > { %v1347_v12 = vpack.c.bf16 %v1315_v11, %v1315_v11 }
  0xf9   : > { %v1353_v14 = vsel %vm1348_vm2, %v1347_v12, 0 }
  0xfa   : > { %1362 = vmatpush.bf16.xpose.msra.mxu3 %v1353_v14  ;;  %v3627_v14 = vld [vmem:[%s4791_s10 + $0x98] sm:$0xff] }
  0xfb   : > { %v1288_v15 = vpop.f32.mrf.mxu0  ;;  %v1342_v33 = vpop.f32.mrf.mxu2 }
  0xfc   : > { %v1316_v16 = vpop.f32.mrf.mxu1  ;;  %v1343_v41 = vadd.f32 %v3742_v40, %v1342_v33  ;;  %v3626_v15 = vld [vmem:[%s4791_s10 + $0x90] sm:$0xff]  ;;  %v3612_v40 = vld [vmem:[%s4791_s10 + $0x20] sm:$0xff] }
  0xfe   : > { %v1394_v43 = vpack.c.bf16 %v1343_v41, %v1343_v41 }
 0x100   : > { %v1400_v45 = vsel %vm1398_vm7, %v1394_v43, 0 }
 0x101   : > { %3353 = vmatmul.msk.bf16.vlgmr.msra.gmra.mxu3 %vm1348_vm2, %v1346_v17  ;;  %1409 = vmatpush.bf16.msrb.mxu0 %v1400_v45 }
 0x102   : > { %1485 = vmatpush.bf16.msrb.mxu3 %v3619_v32 }
 0x103   : > { %v1344_v37 = vpop.f32.mrf.mxu2 }
 0x104   : > { %v3613_v37 = vld [vmem:[%s4791_s10 + $0x28] sm:$0xff] }
 0x105   : > { %1513 = vmatpush.bf16.msra.mxu0 %v3627_v14 }
 0x106   : > { %1486 = vmatpush.bf16.msrb.mxu3 %v3618_v42 }
 0x109   : > { %1514 = vmatpush.bf16.msra.mxu0 %v3626_v15 }
 0x10b   : > { %v1460_v4 = vpop.f32.mrf.mxu2 }
 0x10c   : > { %v1461_v12 = vadd.f32 %v3744_v10, %v1460_v4  ;;  %v3629_v4 = vld [vmem:[%s4791_s10 + $0xa8] sm:$0xff] }
 0x10e   : > { %v1520_v13 = vpack.c.bf16 %v1461_v12, %v1461_v12 }
 0x111   : > { %3373 = vmatmul.msk.bf16.vlgmr.msrb.gmra.mxu3 %vm1273_vm1, %v4268_v6 }
 0x113   : > { %v1462_v7 = vpop.f32.mrf.mxu2 }
 0x114   : > { %v3628_v7 = vld [vmem:[%s4791_s10 + $0xa0] sm:$0xff] }
 0x184   : > { %v1364_v28 = vpop.f32.mrf.mxu3 }
 0x185   : > { %v1368_v29 = vsel %vm4288_vm6, %v1364_v28, -1e+10 }
 0x186   : > { %v1369_v30 = vsel %vm1348_vm2, %v1368_v29, -inf }
 0x187   : > { %1370 = vmax.xlane.f32.xlu0 %v1369_v30 }
 0x18c   : > { %v1366_v31 = vpop.f32.mrf.mxu3 }
 0x194   : > { %v1488_v63 = vpop.f32.mrf.mxu3 }
 0x195   : > { %v1489_v0 = vadd.f32 %v3743_v62, %v1488_v63 }
 0x197   : > { %v1521_v1 = vpack.c.bf16 %v1489_v0, %v1489_v0  ;;  %v3748_v0 = vld [vmem:[%s4168_s9 + $0x2] ss:$0 sm:$0xff] }
 0x199   : > { %v1526_v2 = vsel %vm1348_vm2, %v1521_v1, 0 }
 0x19a   : > { %1535 = vmatpush.bf16.xpose.msra.mxu1 %v1526_v2 }
 0x19c   : > { %v1490_v3 = vpop.f32.mrf.mxu3 }
 0x1fa   : > { %v1371_v34 = vpop.xlane.xlu0 %1370 }
 0x1fb   : > { %v1372_v35 = vsub.f32 %v1368_v29, %v1371_v34 }
 0x1fd   : > { %v1373_v36 = vmul.f32 1.442695, %v1372_v35  ;;  %v3621_v35 = vld [vmem:[%s4791_s10 + $0x68] sm:$0xff] }
 0x1ff   : > { %3774 = vpow2.f32 %v1373_v36  ;;  %v3620_v36 = vld [vmem:[%s4791_s10 + $0x60] sm:$0xff] }
 0x205   : > { %v3775_v38 = vpop.eup %3774 }
 0x206   : > { %v1375_v39 = vsel %vm1348_vm2, %v3775_v38, 0.0 }
 0x207   : > { %1376 = vadd.xlane.f32.xlu0 %v1375_v39 }
 0x27a   : > { %v1377_v49 = vpop.xlane.xlu0 %1376 }
 0x27b   : > { %3776 = vrcp.f32 %v1377_v49  ;;  %v1389_v53 = vand.u32 2147483648, %v1377_v49  ;;  %v1387_v55 = vand.u32 2147483647, %v1377_v49  ;;  %vm1383_vm9 = vweird.f32 %v1377_v49 }
 0x27d   : > { %v1390_v57 = vor.u32 1.1754944e-38, %v1389_v53  ;;  %vm1388_vm11 = vcmp.eq.f32.partialorder %v1387_v55, 8.507059e+37 }
 0x281   : > { %v3777_v50 = vpop.eup %3776 }
 0x282   : > { %v1379_v51 = vmul.f32 %v3777_v50, %v1377_v49  ;;  %vm1384_vm8 = vweird.f32 %v3777_v50 }
 0x283   : > { %vm1385_vm10 = vmor %vm1383_vm9, %vm1384_vm8 }
 0x284   : > { %v1380_v52 = vsub.f32 1.0, %v1379_v51 }
 0x286   : > { %v1381_v54 = vmul.f32 %v3777_v50, %v1380_v52 }
 0x288   : > { %v1382_v56 = vadd.f32 %v3777_v50, %v1381_v54  ;;  %v3747_v54 = vld [vmem:[%s4168_s9 + $0x6] ss:$0 sm:$0xff] }
 0x28a   : > { %v1386_v58 = vsel %vm1385_vm10, %v3777_v50, %v1382_v56 }
 0x28b   : > { %v1391_v59 = vsel %vm1388_vm11, %v1390_v57, %v1386_v58 }
 0x28c   : > { %v1392_v60 = vmul.f32 %v3775_v38, %v1391_v59  ;;  %v1250_v38 = vld [vmem:[%s4796_s28 + $0x4] sm:$0xf] }
 0x28d   : > { %v1592_v39 = vsel %vm1398_vm7, %v1250_v38, 0 }
 0x28e   : > { %v1393_v61 = vpack.c.bf16 %v1392_v60, %v1392_v60  ;;  %1601 = vmatpush.bf16.msra.mxu3 %v1592_v39 }
 0x290   : > { %3354 = vmatmul.msk.bf16.vlgmr.msrb.gmra.mxu0 %vm1348_vm2, %v1393_v61 }
 0x291   : > { %1629 = vmatpush.bf16.msrb.mxu0 %v3613_v37 }
 0x295   : > { %1630 = vmatpush.bf16.msrb.mxu0 %v3612_v40 }
 0x2a0   : > { %3382 = vmatmul.msk.bf16.vlgmr.msra.gmra.mxu0 %vm1273_vm1, %v4268_v6 }
 0x2b0   : > { %3394 = vmatmul.msk.bf16.vlgmr.msrb.gmra.mxu0 %vm1273_vm1, %v4268_v6 }
 0x30d   : > { %v1411_v8 = vpop.f32.mrf.mxu0 }
 0x30e   : > { %v1415_v9 = vpack.c.bf16 %v1411_v8, %v1411_v8  ;;  %v3745_v8 = vld [vmem:[%s4798_s26] ss:$0 sm:$0xff] }
 0x310   : > { %3355 = vmatmul.msk.bf16.vlgmr.msrb.gmra.mxu1 %vm1348_vm2, %v1415_v9 }
 0x311   : > { %1657 = vmatpush.bf16.msrb.mxu1 %v3621_v35 }
 0x315   : > { %v1413_v11 = vpop.f32.mrf.mxu0  ;;  %1658 = vmatpush.bf16.msrb.mxu1 %v3620_v36 }
 0x31d   : > { %v1516_v24 = vpop.f32.mrf.mxu0 }
 0x31e   : > { %v1517_v25 = vadd.f32 %v3746_v23, %v1516_v24 }
 0x320   : > { %3383 = vmatmul.msk.bf16.vlgmr.msra.gmra.mxu1 %vm1348_vm2, %v1520_v13  ;;  %v1567_v26 = vpack.c.bf16 %v1517_v25, %v1517_v25 }
 0x322   : > { %v1572_v28 = vsel %vm1398_vm7, %v1567_v26, 0 }
 0x323   : > { %1581 = vmatpush.bf16.msra.mxu2 %v1572_v28 }
 0x325   : > { %v1518_v30 = vpop.f32.mrf.mxu0 }
 0x327   : > { %1685 = vmatpush.bf16.msrb.mxu2 %v3629_v4 }
 0x32b   : > { %1686 = vmatpush.bf16.msrb.mxu2 %v3628_v7 }
 0x32d   : > { %v1632_v59 = vpop.f32.mrf.mxu0 }
 0x32e   : > { %v1633_v2 = vadd.f32 %v3748_v0, %v1632_v59  ;;  %v3751_v59 = vld [vmem:[%s4168_s9 + $0x3] ss:$0 sm:$0xff]  ;;  %v3630_v0 = vld [vmem:[%s4791_s10 + $0xb0] sm:$0xff] }
 0x330   : > { %3403 = vmatmul.msk.bf16.vlgmr.msrb.gmra.mxu1 %vm1273_vm1, %v4268_v6  ;;  %v1692_v3 = vpack.c.bf16 %v1633_v2, %v1633_v2 }
 0x335   : > { %v1634_v61 = vpop.f32.mrf.mxu0 }
 0x38d   : > { %v4316_v16 = vpop.f32.mrf.mxu1 }
 0x38e   : > { %v1435_v9 = vadd.f32 %v3745_v8, %v4316_v16 }
 0x395   : > { %v1433_v17 = vpop.f32.mrf.mxu1 }
 0x39d   : > { %v1537_v18 = vpop.f32.mrf.mxu1 }
 0x39e   : > { %v1541_v19 = vsel %vm4288_vm6, %v1537_v18, -1e+10  ;;  %v3623_v18 = vld [vmem:[%s4791_s10 + $0x78] sm:$0xff] }
 0x39f   : > { %v1542_v20 = vsel %vm1348_vm2, %v1541_v19, -inf }
 0x3a0   : > { %1543 = vmax.xlane.f32.xlu1 %v1542_v20 }
 0x3a5   : > { %v1539_v21 = vpop.f32.mrf.mxu1 }
 0x3ad   : > { %v1660_v55 = vpop.f32.mrf.mxu1 }
 0x3ae   : > { %v1661_v56 = vadd.f32 %v3747_v54, %v1660_v55 }
 0x3b0   : > { %v1693_v57 = vpack.c.bf16 %v1661_v56, %v1661_v56 }
 0x3b2   : > { %v1698_v58 = vsel %vm1348_vm2, %v1693_v57, 0 }
 0x3b3   : > { %1707 = vmatpush.bf16.xpose.msrb.mxu3 %v1698_v58 }
 0x3b5   : > { %v1662_v60 = vpop.f32.mrf.mxu1 }
 0x413   : > { %v1544_v29 = vpop.xlane.xlu1 %1543 }
 0x414   : > { %v1545_v31 = vsub.f32 %v1541_v19, %v1544_v29  ;;  %v3749_v19 = vld [vmem:[%s4168_s9 + $0xa] ss:$0 sm:$0xff] }
 0x416   : > { %v1546_v32 = vmul.f32 1.442695, %v1545_v31  ;;  %v3622_v31 = vld [vmem:[%s4791_s10 + $0x70] sm:$0xff] }
 0x418   : > { %3778 = vpow2.f32 %v1546_v32  ;;  %v3615_v32 = vld [vmem:[%s4791_s10 + $0x38] sm:$0xff] }
 0x41e   : > { %v3779_v33 = vpop.eup %3778 }
 0x41f   : > { %v1548_v34 = vsel %vm1348_vm2, %v3779_v33, 0.0 }
 0x420   : > { %1549 = vadd.xlane.f32.xlu1 %v1548_v34  ;;  %v1251_v34 = vld [vmem:[%s4796_s28 + $0x8] sm:$0xf] }
 0x421   : > { %v1764_v35 = vsel %vm1398_vm7, %v1251_v34, 0 }
 0x422   : > { %1773 = vmatpush.bf16.msra.mxu1 %v1764_v35 }
 0x493   : > { %v1550_v41 = vpop.xlane.xlu1 %1549 }
 0x494   : > { %3780 = vrcp.f32 %v1550_v41  ;;  %v1562_v45 = vand.u32 2147483648, %v1550_v41  ;;  %v1560_v47 = vand.u32 2147483647, %v1550_v41  ;;  %vm1556_vm13 = vweird.f32 %v1550_v41 }
 0x496   : > { %v1563_v49 = vor.u32 1.1754944e-38, %v1562_v45  ;;  %vm1561_vm15 = vcmp.eq.f32.partialorder %v1560_v47, 8.507059e+37 }
 0x49a   : > { %v3781_v42 = vpop.eup %3780 }
 0x49b   : > { %v1552_v43 = vmul.f32 %v3781_v42, %v1550_v41  ;;  %vm1557_vm12 = vweird.f32 %v3781_v42 }
 0x49c   : > { %vm1558_vm14 = vmor %vm1556_vm13, %vm1557_vm12 }
 0x49d   : > { %v1553_v44 = vsub.f32 1.0, %v1552_v43 }
 0x49f   : > { %v1554_v46 = vmul.f32 %v3781_v42, %v1553_v44 }
 0x4a1   : > { %v1555_v48 = vadd.f32 %v3781_v42, %v1554_v46 }
 0x4a3   : > { %v1559_v50 = vsel %vm1558_vm14, %v3781_v42, %v1555_v48 }
 0x4a4   : > { %v1564_v51 = vsel %vm1561_vm15, %v1563_v49, %v1559_v50  ;;  %v3750_v49 = vld [vmem:[%s4168_s9 + $0x7] ss:$0 sm:$0xff] }
 0x4a5   : > { %v1565_v52 = vmul.f32 %v3779_v33, %v1564_v51  ;;  %v3614_v33 = vld [vmem:[%s4791_s10 + $0x30] sm:$0xff] }
 0x4a7   : > { %v1566_v53 = vpack.c.bf16 %v1565_v52, %v1565_v52 }
 0x4a9   : > { %3384 = vmatmul.msk.bf16.vlgmr.msra.gmra.mxu2 %vm1348_vm2, %v1566_v53 }
 0x4aa   : > { %1801 = vmatpush.bf16.msra.mxu2 %v3615_v32 }
 0x4ae   : > { %1802 = vmatpush.bf16.msra.mxu2 %v3614_v33 }
 0x4b9   : > { %3412 = vmatmul.msk.bf16.vlgmr.msrb.gmra.mxu2 %vm1273_vm1, %v4268_v6 }
 0x4c9   : > { %3424 = vmatmul.msk.bf16.vlgmr.msra.gmra.mxu2 %vm1273_vm1, %v4268_v6 }
 0x52c   : > { %v1583_v62 = vpop.f32.mrf.mxu2 }
 0x52d   : > { %v1587_v63 = vpack.c.bf16 %v1583_v62, %v1583_v62 }
 0x52f   : > { %3385 = vmatmul.msk.bf16.vlgmr.msra.gmra.mxu3 %vm1348_vm2, %v1587_v63  ;;  %v3631_v63 = vld [vmem:[%s4791_s10 + $0xb8] sm:$0xff]  ;;  %s4803_s10 = scalar_lea.vmem %s4802_s23, %s4124_s0 }
 0x530   : > { %1829 = vmatpush.bf16.msra.mxu3 %v3623_v18 }
 0x534   : > { %v1585_v1 = vpop.f32.mrf.mxu2  ;;  %1830 = vmatpush.bf16.msra.mxu3 %v3622_v31 }
 0x53c   : > { %v1688_v16 = vpop.f32.mrf.mxu2 }
 0x53d   : > { %v1689_v20 = vadd.f32 %v3749_v19, %v1688_v16  ;;  %v1252_v16 = vld [vmem:[%s4796_s28 + $0xc] sm:$0xf]  ;;  %s4808_s28 = sld [smem:[#allocation38_spill]] }
 0x53f   : > { %3413 = vmatmul.msk.bf16.vlgmr.msrb.gmra.mxu3 %vm1348_vm2, %v1692_v3  ;;  %v1739_v24 = vpack.c.bf16 %v1689_v20, %v1689_v20  ;;  %v1936_v20 = vsel %vm1398_vm7, %v1252_v16, 0 }
 0x540   : > { %1945 = vmatpush.bf16.msrb.mxu3 %v1936_v20  ;;  %v3754_v20 = vld [vmem:[%s4803_s10] ss:$0 sm:$0xff] }
 0x541   : > { %v1744_v26 = vsel %vm1398_vm7, %v1739_v24, 0 }
 0x542   : > { %1753 = vmatpush.bf16.msra.mxu0 %v1744_v26 }
 0x543   : > { %s4809_s29 = scalar_lea.vmem %s4808_s28, %s4124_s0 }
 0x544   : > { %v1690_v28 = vpop.f32.mrf.mxu2 }
 0x546   : > { %1857 = vmatpush.bf16.msrb.mxu0 %v3631_v63  ;;  %v3651_v63 = vld [vmem:[%s4182_s7 + $0x18] sm:$0xff] }
 0x54a   : > { %1858 = vmatpush.bf16.msrb.mxu0 %v3630_v0  ;;  %v3648_v0 = vld [vmem:[%s4182_s7] sm:$0xff] }
 0x54c   : > { %v1804_v55 = vpop.f32.mrf.mxu2 }
 0x54d   : > { %v1805_v61 = vadd.f32 %v3751_v59, %v1804_v55 }
 0x54f   : > { %3433 = vmatmul.msk.bf16.vlgmr.msra.gmra.mxu3 %vm1273_vm1, %v4268_v6  ;;  %v1864_v62 = vpack.c.bf16 %v1805_v61, %v1805_v61  ;;  %v3640_v61 = vld [vmem:[%s4194_s4 + $0x40] sm:$0xff] }
 0x554   : > { %v1806_v56 = vpop.f32.mrf.mxu2 }
 0x5b2   : > { %v1603_v10 = vpop.f32.mrf.mxu3 }
 0x5b3   : > { %v4350_v11 = vadd.f32 %v1603_v10, %v1435_v9  ;;  %v3752_v10 = vld [vmem:[%s4168_s9 + $0xb] ss:$0 sm:$0xff]  ;;  %s4799_s9 = sld [smem:[#allocation19_spill]] }
 0x5ba   : > { %v1605_v12 = vpop.f32.mrf.mxu3 }
 0x5c2   : > { %v1709_v13 = vpop.f32.mrf.mxu3 }
 0x5c3   : > { %v1713_v14 = vsel %vm4288_vm6, %v1709_v13, -1e+10 }
 0x5c4   : > { %v1714_v15 = vsel %vm1348_vm2, %v1713_v14, -inf }
 0x5c5   : > { %1715 = vmax.xlane.f32.xlu2 %v1714_v15 }
 0x5ca   : > { %v1711_v17 = vpop.f32.mrf.mxu3 }
 0x5d2   : > { %v1832_v50 = vpop.f32.mrf.mxu3 }
 0x5d3   : > { %v1833_v51 = vadd.f32 %v3750_v49, %v1832_v50 }
 0x5d5   : > { %v1865_v52 = vpack.c.bf16 %v1833_v51, %v1833_v51 }
 0x5d7   : > { %v1870_v53 = vsel %vm1348_vm2, %v1865_v52, 0 }
 0x5d8   : > { %1879 = vmatpush.bf16.xpose.msrb.mxu1 %v1870_v53 }
 0x5da   : > { %v1834_v54 = vpop.f32.mrf.mxu3 }
 0x638   : > { %v1716_v21 = vpop.xlane.xlu2 %1715 }
 0x639   : > { %v1717_v23 = vsub.f32 %v1713_v14, %v1716_v21 }
 0x63b   : > { %v1718_v25 = vmul.f32 1.442695, %v1717_v23 }
 0x63d   : > { %3782 = vpow2.f32 %v1718_v25 }
 0x643   : > { %v3783_v29 = vpop.eup %3782 }
 0x644   : > { %v1720_v30 = vsel %vm1348_vm2, %v3783_v29, 0.0 }
 0x645   : > { %1721 = vadd.xlane.f32.xlu2 %v1720_v30 }
 0x6b8   : > { %v1722_v36 = vpop.xlane.xlu2 %1721 }
 0x6b9   : > { %3784 = vrcp.f32 %v1722_v36  ;;  %v1734_v40 = vand.u32 2147483648, %v1722_v36  ;;  %v1732_v42 = vand.u32 2147483647, %v1722_v36  ;;  %vm1728_vm3 = vweird.f32 %v1722_v36 }
 0x6bb   : > { %v1735_v44 = vor.u32 1.1754944e-38, %v1734_v40  ;;  %vm1733_vm5 = vcmp.eq.f32.partialorder %v1732_v42, 8.507059e+37 }
 0x6bf   : > { %v3785_v37 = vpop.eup %3784 }
 0x6c0   : > { %v1724_v38 = vmul.f32 %v3785_v37, %v1722_v36  ;;  %vm1729_vm0 = vweird.f32 %v3785_v37 }
 0x6c1   : > { %vm1730_vm4 = vmor %vm1728_vm3, %vm1729_vm0  ;;  %vm2176_vm3 = vcmask 80896  }
 0x6c2   : > { %v1725_v39 = vsub.f32 1.0, %v1724_v38 }
 0x6c4   : > { %v1726_v41 = vmul.f32 %v3785_v37, %v1725_v39 }
 0x6c6   : > { %v1727_v43 = vadd.f32 %v3785_v37, %v1726_v41 }
 0x6c8   : > { %v1731_v45 = vsel %vm1730_vm4, %v3785_v37, %v1727_v43  ;;  %vm2206_vm4 = vcmask 1044480  }
 0x6c9   : > { %v1736_v46 = vsel %vm1733_vm5, %v1735_v44, %v1731_v45  ;;  %v3911_v44 = vmov 32.0   ;;  %v3633_v45 = vld [vmem:[%s4194_s4 + $0x8] sm:$0xff] }
 0x6ca   : > { %v1737_v47 = vmul.f32 %v3783_v29, %v1736_v46  ;;  %v3632_v46 = vld [vmem:[%s4194_s4] sm:$0xff] }
 0x6cc   : > { %v1738_v48 = vpack.c.bf16 %v1737_v47, %v1737_v47  ;;  %v1171_v47 = vld [vmem:[%s4799_s9] sm:$0xff] }
 0x6ce   : > { %3414 = vmatmul.msk.bf16.vlgmr.msra.gmra.mxu0 %vm1348_vm2, %v1738_v48  ;;  %v1172_v48 = vld [vmem:[%s4799_s9 + $0x8] sm:$0x3]  ;;  %s4813_s9 = sld [smem:[#allocation40_spill]] }
 0x6cf   : > { %v4397_v50 = vpack.c.bf16 %v1172_v48, %v1171_v47  ;;  %v3635_v48 = vld [vmem:[%s4194_s4 + $0x18] sm:$0xff] }
 0x6d4   : > { %s4814_s2 = scalar_lea.vmem %s4813_s9, %s4124_s0 }
 0x6de   : > { %3442 = vmatmul.msk.bf16.vlgmr.msrb.gmra.mxu0 %vm1273_vm1, %v4268_v6 }
 0x74b   : > { %v1755_v57 = vpop.f32.mrf.mxu0 }
 0x74c   : > { %v1759_v58 = vpack.c.bf16 %v1755_v57, %v1755_v57 }
 0x74e   : > { %3415 = vmatmul.msk.bf16.vlgmr.msra.gmra.mxu1 %vm1348_vm2, %v1759_v58 }
 0x74f   : > { %2117 = vmatpush.bf16.msra.mxu1 %v3633_v45 }
 0x753   : > { %v1757_v60 = vpop.f32.mrf.mxu0  ;;  %2118 = vmatpush.bf16.msra.mxu1 %v3632_v46 }
 0x754   : > { %v3641_v60 = vld [vmem:[%s4194_s4 + $0x48] sm:$0xff] }
 0x75b   : > { %v1860_v12 = vpop.f32.mrf.mxu0 }
 0x75c   : > { %v1861_v13 = vadd.f32 %v3752_v10, %v1860_v12 }
 0x75e   : > { %3443 = vmatmul.msk.bf16.vlgmr.msrb.gmra.mxu1 %vm1348_vm2, %v1864_v62  ;;  %v1911_v14 = vpack.c.bf16 %v1861_v13, %v1861_v13  ;;  %v3649_v62 = vld [vmem:[%s4182_s7 + $0x8] sm:$0xff] }
 0x75f   : > { %2086 = vmatpush.bf16.msra.mxu0 %v3649_v62 }
 0x760   : > { %v1916_v15 = vsel %vm1398_vm7, %v1911_v14, 0 }
 0x761   : > { %1925 = vmatpush.bf16.msrb.mxu2 %v1916_v15 }
 0x763   : > { %v1862_v17 = vpop.f32.mrf.mxu0  ;;  %2087 = vmatpush.bf16.msra.mxu0 %v3648_v0 }
 0x765   : > { %2146 = vmatpush.bf16.msra.mxu2 %v3641_v60 }
 0x769   : > { %2147 = vmatpush.bf16.msra.mxu2 %v3640_v61 }
 0x76e   : > { %3463 = vmatmul.msk.bf16.vlgmr.msra.gmra.mxu1 %vm1273_vm1, %v4397_v50 }
 0x7cb   : > { %v1775_v1 = vpop.f32.mrf.mxu1 }
 0x7cc   : > { %v1779_v2 = vadd.f32 %v1775_v1, %v4350_v11  ;;  %v3650_v1 = vld [vmem:[%s4182_s7 + $0x10] sm:$0xff] }
 0x7d3   : > { %v1777_v3 = vpop.f32.mrf.mxu1 }
 0x7db   : > { %v1881_v4 = vpop.f32.mrf.mxu1 }
 0x7dc   : > { %v1885_v7 = vsel %vm4288_vm6, %v1881_v4, -1e+10 }
 0x7dd   : > { %v1886_v8 = vsel %vm1348_vm2, %v1885_v7, -inf }
 0x7de   : > { %1887 = vmax.xlane.f32.xlu0 %v1886_v8 }
 0x7e3   : > { %v1883_v9 = vpop.f32.mrf.mxu1 }
 0x851   : > { %v1888_v11 = vpop.xlane.xlu0 %1887 }
 0x852   : > { %v1889_v6 = vsub.f32 %v1885_v7, %v1888_v11  ;;  %v3755_v7 = vld [vmem:[%s4200_s1] ss:$0 sm:$0xff] }
 0x854   : > { %v1890_v18 = vmul.f32 1.442695, %v1889_v6 }
 0x856   : > { %3786 = vpow2.f32 %v1890_v18 }
 0x85c   : > { %v3787_v19 = vpop.eup %3786 }
 0x85d   : > { %v1892_v27 = vsel %vm1348_vm2, %v3787_v19, 0.0 }
 0x85e   : > { %1893 = vadd.xlane.f32.xlu1 %v1892_v27  ;;  %v3753_v27 = vld [vmem:[%s4801_s12] ss:$0 sm:$0xff]  ;;  %s4815_s12 = sld [smem:[#allocation42_spill]] }
 0x864   : > { %s4816_s30 = scalar_lea.vmem %s4815_s12, %s4124_s0 }
 0x8d1   : > { %v1894_v21 = vpop.xlane.xlu1 %1893 }
 0x8d2   : > { %3788 = vrcp.f32 %v1894_v21  ;;  %v1906_v26 = vand.u32 2147483648, %v1894_v21  ;;  %v1904_v29 = vand.u32 2147483647, %v1894_v21  ;;  %vm1900_vm8 = vweird.f32 %v1894_v21 }
 0x8d3   : > { %3790 = vrcp.f32 %v3911_v44 }
 0x8d4   : > { %v1907_v31 = vor.u32 1.1754944e-38, %v1906_v26  ;;  %vm1905_vm10 = vcmp.eq.f32.partialorder %v1904_v29, 8.507059e+37 }
 0x8d8   : > { %v3789_v23 = vpop.eup %3788 }
 0x8d9   : > { %v1896_v24 = vmul.f32 %v3789_v23, %v1894_v21  ;;  %vm1901_vm6 = vweird.f32 %v3789_v23  ;;  %v3791_v49 = vpop.eup %3790 }
 0x8da   : > { %vm1902_vm9 = vmor %vm1900_vm8, %vm1901_vm6  ;;  %v1959_v51 = vmul.f32 32.0, %v3791_v49  ;;  %vm1963_vm11 = vweird.f32 %v3791_v49 }
 0x8db   : > { %v1897_v25 = vsub.f32 1.0, %v1896_v24 }
 0x8dd   : > { %v1898_v28 = vmul.f32 %v3789_v23, %v1897_v25 }
 0x8df   : > { %v1899_v30 = vadd.f32 %v3789_v23, %v1898_v28  ;;  %v3756_v28 = vld [vmem:[%s4200_s1 + $0x4] ss:$0 sm:$0xff] }
 0x8e1   : > { %v1903_v32 = vsel %vm1902_vm9, %v3789_v23, %v1899_v30 }
 0x8e2   : > { %v1908_v33 = vsel %vm1905_vm10, %v1907_v31, %v1903_v32 }
 0x8e3   : > { %v1909_v34 = vmul.f32 %v3787_v19, %v1908_v33  ;;  %v3757_v33 = vld [vmem:[%s4188_s22] ss:$0 sm:$0xff] }
 0x8e5   : > { %v1910_v35 = vpack.c.bf16 %v1909_v34, %v1909_v34 }
 0x8e7   : > { %3444 = vmatmul.msk.bf16.vlgmr.msrb.gmra.mxu2 %vm1348_vm2, %v1910_v35 }
 0x8e8   : > { %2265 = vmatpush.bf16.msrb.mxu2 %v3651_v63 }
 0x8ec   : > { %2266 = vmatpush.bf16.msrb.mxu2 %v3650_v1 }
 0x8f7   : > { %3472 = vmatmul.msk.bf16.vlgmr.msra.gmra.mxu2 %vm1273_vm1, %v4397_v50 }
 0x96a   : > { %v1927_v36 = vpop.f32.mrf.mxu2 }
 0x96b   : > { %v1931_v37 = vpack.c.bf16 %v1927_v36, %v1927_v36 }
 0x96d   : > { %3445 = vmatmul.msk.bf16.vlgmr.msrb.gmra.mxu3 %vm1348_vm2, %v1931_v37 }
 0x972   : > { %v1929_v38 = vpop.f32.mrf.mxu2 }
 0x97a   : > { %v2149_v26 = vpop.f32.mrf.mxu2 }
 0x97b   : > { %v2150_v29 = vadd.f32 %v3756_v28, %v2149_v26 }
 0x982   : > { %v2151_v30 = vpop.f32.mrf.mxu2 }
 0x983   : > { %v2152_v31 = vadd.f32 %v3756_v28, %v2151_v30 }
 0x985   : > { %v2202_v32 = vpack.c.bf16 %v2152_v31, %v2150_v29  ;;  %v3760_v29 = vld [vmem:[%s4200_s1 + $0x5] ss:$0 sm:$0xff] }
 0x9f0   : > { %v1947_v39 = vpop.f32.mrf.mxu3 }
 0x9f1   : > { %v1951_v40 = vadd.f32 %v1947_v39, %v1779_v2  ;;  %v2120_v2 = vpop.f32.mrf.mxu1 }
 0x9f2   : > { %v2121_v9 = vadd.f32 %v3755_v7, %v2120_v2 }
 0x9f3   : > { %v1952_v41 = vadd.f32 %v1951_v40, %v4264_v5  ;;  %v1960_v5 = vsub.f32 1.0, %v1959_v51  ;;  %v1184_v40 = vld [vmem:[%s4805_s20] sm:$0x1] }
 0x9f4   : > { %vm1185_vm15 = vcmp.gt.f32.partialorder %v1184_v40, 0.5 }
 0x9f5   : > { %v1955_v42 = vsel %vm1273_vm1, %v1952_v41, 0.0  ;;  %v1961_v52 = vmul.f32 %v3791_v49, %v1960_v5 }
 0x9f6   : > { %1956 = vadd.xlane.f32.xlu2 %v1955_v42 }
 0x9f7   : > { %v1962_v53 = vadd.f32 %v3791_v49, %v1961_v52 }
 0x9f8   : > { %v1949_v43 = vpop.f32.mrf.mxu3 }
 0x9f9   : > { %v4401_v54 = vsel %vm1963_vm11, %v3791_v49, %v1962_v53  ;;  %v2122_v10 = vpop.f32.mrf.mxu1  ;;  %v3634_v49 = vld [vmem:[%s4194_s4 + $0x10] sm:$0xff] }
 0x9fa   : > { %v2123_v12 = vadd.f32 %v3755_v7, %v2122_v10 }
 0x9fc   : > { %v2155_v13 = vpack.c.bf16 %v2123_v12, %v2121_v9  ;;  %v2052_v12 = vld [vmem:[%s4205_s24] sm:$0xf] }
 0x9fe   : > { %v2160_v11 = vsel %vm1348_vm2, %v2155_v13, 0  ;;  %v3652_v13 = vld [vmem:[%s4182_s7 + $0x20] sm:$0xff] }
 0x9ff   : > { %2169 = vmatpush.bf16.xpose.msra.mxu3 %v2160_v11 }
 0xa07   : > { %2293 = vmatpush.bf16.msrb.mxu3 %v3635_v48 }
 0xa0b   : > { %2294 = vmatpush.bf16.msrb.mxu3 %v3634_v49  ;;  %v3636_v49 = vld [vmem:[%s4194_s4 + $0x20] sm:$0xff] }
 0xa69   : > { %v1957_v55 = vpop.xlane.xlu2 %1956 }
 0xa6a   : > { %v1965_v56 = vmul.f32 %v4401_v54, %v1957_v55 }
 0xa6c   : > { %v1966_v57 = vsub.f32 %v1952_v41, %v1965_v56  ;;  %v1186_v41 = vsel %vm1185_vm15, 1, %v3910_v22  ;;  %v2208_v22 = vsel %vm2206_vm4, %v2202_v32, 0  ;;  %v3643_v56 = vld [vmem:[%s4194_s4 + $0x58] sm:$0xff] }
 0xa6d   : > { %v1187_v42 = vperm.slane %v1186_v41, 0  ;;  %2217 = vmatpush.bf16.msrb.mxu0 %v2208_v22  ;;  %v3637_v22 = vld [vmem:[%s4194_s4 + $0x28] sm:$0xff] }
 0xa6e   : > { %v1967_v58 = vmul.f32 %v1966_v57, %v1966_v57 }
 0xa6f   : > { %vm4447_vm0 = vcmp.eq.s32.totalorder %v1187_v42, 1 }
 0xa70   : > { %v1968_v59 = vsel %vm1273_vm1, %v1967_v58, 0.0 }
 0xa71   : > { %1969 = vadd.xlane.f32.xlu0 %v1968_v59 }
 0xae4   : > { %v1970_v3 = vpop.xlane.xlu0 %1969 }
 0xae5   : > { %v1971_v4 = vmul.f32 %v1970_v3, %v4401_v54 }
 0xae7   : > { %v1972_v8 = vadd.f32 1e-05, %v1971_v4 }
 0xae9   : > { %3792 = vrsqrt.f32 %v1972_v8  ;;  %vm1979_vm13 = vweird.f32 %v1972_v8 }
 0xaef   : > { %v3793_v14 = vpop.eup %3792 }
 0xaf0   : > { %v1974_v15 = vmul.f32 %v3793_v14, %v1972_v8  ;;  %vm1980_vm12 = vweird.f32 %v3793_v14  ;;  %v3653_v8 = vld [vmem:[%s4182_s7 + $0x28] sm:$0xff] }
 0xaf1   : > { %vm1981_vm14 = vmor %vm1979_vm13, %vm1980_vm12 }
 0xaf2   : > { %v1975_v17 = vmul.f32 %v3793_v14, %v1974_v15  ;;  %v3759_v15 = vld [vmem:[%s4200_s1 + $0x1] ss:$0 sm:$0xff] }
 0xaf4   : > { %v1976_v6 = vmul.f32 0.5, %v1975_v17 }
 0xaf6   : > { %v1977_v18 = vsub.f32 1.5, %v1976_v6 }
 0xaf8   : > { %v1978_v19 = vmul.f32 %v3793_v14, %v1977_v18 }
 0xafa   : > { %v1982_v16 = vsel %vm1981_vm14, %v3793_v14, %v1978_v19  ;;  %v2228_v14 = vsel %vm1398_vm7, %v2052_v12, 0 }
 0xafb   : > { %v1983_v21 = vmul.f32 %v1982_v16, %v1966_v57  ;;  %v3642_v57 = vld [vmem:[%s4194_s4 + $0x50] sm:$0xff]  ;;  %2237 = vmatpush.bf16.msrb.mxu1 %v2228_v14 }
 0xafd   : > { %v1987_v23 = vmul.f32 %v3753_v27, %v1983_v21  ;;  %v3758_v21 = vld [vmem:[%s4188_s22 + $0x1] ss:$0 sm:$0xff] }
 0xaff   : > { %v4426_v24 = vadd.f32 %v3754_v20, %v1987_v23 }
 0xb01   : > { %v4430_v25 = vpack.c.bf16 %v4426_v24, %v4426_v24 }
 0xb03   : > { %3454 = vmatmul.msk.bf16.vlgmr.msra.gmra.mxu0 %vm1273_vm1, %v4430_v25  ;;  %3484 = vmatmul.msk.bf16.vlgmr.msrb.gmra.mxu2 %vm1273_vm1, %v4430_v25 }
 0xb04   : > { %2322 = vmatpush.bf16.msra.mxu0 %v3643_v56 }
 0xb08   : > { %2323 = vmatpush.bf16.msra.mxu0 %v3642_v57 }
 0xb80   : > { %v2089_v34 = vpop.f32.mrf.mxu0 }
 0xb81   : > { %v2090_v35 = vadd.f32 %v3757_v33, %v2089_v34 }
 0xb83   : > { %v2154_v36 = vpack.c.bf16 %v2090_v35, %v2090_v35 }
 0xb85   : > { %3473 = vmatmul.msk.bf16.vlgmr.msra.gmra.mxu3 %vm1348_vm2, %v2154_v36 }
 0xb86   : > { %v4439_v37 = vpop.f32.mrf.mxu2 }
 0xb87   : > { %v2269_v23 = vadd.f32 %v3758_v21, %v4439_v37 }
 0xb88   : > { %v2091_v38 = vpop.f32.mrf.mxu0 }
 0xb89   : > { %v2330_v28 = vpack.c.bf16 %v2269_v23, %v2269_v23 }
 0xb8e   : > { %v2270_v39 = vpop.f32.mrf.mxu2 }
 0xb95   : > { %3493 = vmatmul.msk.bf16.vlgmr.msrb.gmra.mxu3 %vm1273_vm1, %v4397_v50 }
 0xc08   : > { %v2171_v44 = vpop.f32.mrf.mxu3 }
 0xc09   : > { %v2175_v45 = vsel %vm4447_vm0, %v2171_v44, -1e+10 }
 0xc0a   : > { %v2177_v46 = vsel %vm2176_vm3, %v2175_v45, -inf }
 0xc0b   : > { %2178 = vmax.xlane.f32.xlu1 %v2177_v46 }
 0xc10   : > { %v2173_v47 = vpop.f32.mrf.mxu3 }
 0xc18   : > { %v2296_v10 = vpop.f32.mrf.mxu3 }
 0xc19   : > { %v2297_v11 = vadd.f32 %v3759_v15, %v2296_v10  ;;  %v3763_v10 = vld [vmem:[%s4200_s1 + $0x2] ss:$0 sm:$0xff] }
 0xc20   : > { %v2298_v17 = vpop.f32.mrf.mxu3 }
 0xc21   : > { %v2299_v6 = vadd.f32 %v3759_v15, %v2298_v17 }
 0xc23   : > { %v2331_v18 = vpack.c.bf16 %v2299_v6, %v2297_v11 }
 0xc25   : > { %v2336_v19 = vsel %vm1348_vm2, %v2331_v18, 0  ;;  %v3761_v18 = vld [vmem:[%s4188_s22 + $0x2] ss:$0 sm:$0xff] }
 0xc26   : > { %2345 = vmatpush.bf16.xpose.msra.mxu1 %v2336_v19 }
 0xc7e   : > { %v2179_v51 = vpop.xlane.xlu1 %2178 }
 0xc7f   : > { %v2180_v5 = vsub.f32 %v2175_v45, %v2179_v51  ;;  %v3645_v51 = vld [vmem:[%s4194_s4 + $0x68] sm:$0xff] }
 0xc81   : > { %v2181_v52 = vmul.f32 1.442695, %v2180_v5  ;;  %v3644_v5 = vld [vmem:[%s4194_s4 + $0x60] sm:$0xff] }
 0xc83   : > { %3794 = vpow2.f32 %v2181_v52 }
 0xc89   : > { %v3795_v53 = vpop.eup %3794 }
 0xc8a   : > { %v2183_v55 = vsel %vm2176_vm3, %v3795_v53, 0.0 }
 0xc8b   : > { %2184 = vadd.xlane.f32.xlu2 %v2183_v55 }
 0xcfe   : > { %v2185_v58 = vpop.xlane.xlu2 %2184 }
 0xcff   : > { %3796 = vrcp.f32 %v2185_v58  ;;  %v2197_v62 = vand.u32 2147483648, %v2185_v58  ;;  %v2195_v0 = vand.u32 2147483647, %v2185_v58  ;;  %vm2191_vm6 = vweird.f32 %v2185_v58 }
 0xd01   : > { %v2198_v2 = vor.u32 1.1754944e-38, %v2197_v62  ;;  %vm2196_vm9 = vcmp.eq.f32.partialorder %v2195_v0, 8.507059e+37 }
 0xd05   : > { %v3797_v59 = vpop.eup %3796 }
 0xd06   : > { %v2187_v60 = vmul.f32 %v3797_v59, %v2185_v58  ;;  %vm2192_vm5 = vweird.f32 %v3797_v59 }
 0xd07   : > { %vm2193_vm8 = vmor %vm2191_vm6, %vm2192_vm5 }
 0xd08   : > { %v2188_v61 = vsub.f32 1.0, %v2187_v60 }
 0xd0a   : > { %v2189_v63 = vmul.f32 %v3797_v59, %v2188_v61 }
 0xd0c   : > { %v2190_v1 = vadd.f32 %v3797_v59, %v2189_v63 }
 0xd0e   : > { %v2194_v3 = vsel %vm2193_vm8, %v3797_v59, %v2190_v1  ;;  %v3655_v1 = vld [vmem:[%s4182_s7 + $0x38] sm:$0xff] }
 0xd0f   : > { %v2199_v4 = vsel %vm2196_vm9, %v2198_v2, %v2194_v3  ;;  %v3654_v3 = vld [vmem:[%s4182_s7 + $0x30] sm:$0xff] }
 0xd10   : > { %v4462_v7 = vmul.f32 %v3795_v53, %v2199_v4  ;;  %v2053_v4 = vld [vmem:[%s4205_s24 + $0x4] sm:$0xf] }
 0xd12   : > { %v2201_v9 = vpack.c.bf16 %v4462_v7, %v4462_v7 }
 0xd14   : > { %3474 = vmatmul.msk.bf16.vlgmr.msrb.gmra.mxu0 %vm2176_vm3, %v2201_v9 }
 0xd15   : > { %2439 = vmatpush.bf16.msrb.mxu0 %v3653_v8  ;;  %v2402_v8 = vsel %vm1398_vm7, %v2053_v4, 0 }
 0xd16   : > { %2411 = vmatpush.bf16.msra.mxu3 %v2402_v8 }
 0xd19   : > { %2440 = vmatpush.bf16.msrb.mxu0 %v3652_v13 }
 0xd24   : > { %3502 = vmatmul.msk.bf16.vlgmr.msra.gmra.mxu0 %vm1273_vm1, %v4397_v50 }
 0xd34   : > { %3514 = vmatmul.msk.bf16.vlgmr.msrb.gmra.mxu0 %vm1273_vm1, %v4430_v25 }
 0xd91   : > { %v2219_v27 = vpop.f32.mrf.mxu0 }
 0xd92   : > { %v2223_v16 = vpack.c.bf16 %v2219_v27, %v2219_v27 }
 0xd94   : > { %3475 = vmatmul.msk.bf16.vlgmr.msrb.gmra.mxu1 %vm1348_vm2, %v2223_v16 }
 0xd95   : > { %2467 = vmatpush.bf16.msrb.mxu1 %v3637_v22  ;;  %v2054_v22 = vld [vmem:[%s4205_s24 + $0x8] sm:$0xf] }
 0xd99   : > { %v2221_v20 = vpop.f32.mrf.mxu0  ;;  %2468 = vmatpush.bf16.msrb.mxu1 %v3636_v49  ;;  %v2576_v49 = vsel %vm1398_vm7, %v2054_v22, 0 }
 0xd9a   : > { %v3764_v20 = vld [vmem:[%s4200_s1 + $0x6] ss:$0 sm:$0xff] }
 0xda1   : > { %v2325_v26 = vpop.f32.mrf.mxu0 }
 0xda2   : > { %v2326_v30 = vadd.f32 %v3760_v29, %v2325_v26 }
 0xda4   : > { %3503 = vmatmul.msk.bf16.vlgmr.msra.gmra.mxu1 %vm1348_vm2, %v2330_v28 }
 0xda5   : > { %2585 = vmatpush.bf16.msra.mxu1 %v2576_v49 }
 0xda9   : > { %v2327_v31 = vpop.f32.mrf.mxu0 }
 0xdaa   : > { %v2328_v32 = vadd.f32 %v3760_v29, %v2327_v31  ;;  %v3762_v31 = vld [vmem:[%s4809_s29] ss:$0 sm:$0xff] }
 0xdac   : > { %v2377_v33 = vpack.c.bf16 %v2328_v32, %v2326_v30 }
 0xdae   : > { %v2382_v42 = vsel %vm2206_vm4, %v2377_v33, 0 }
 0xdaf   : > { %2391 = vmatpush.bf16.msra.mxu2 %v2382_v42 }
 0xdb1   : > { %v4482_v34 = vpop.f32.mrf.mxu0 }
 0xdb2   : > { %v2443_v19 = vadd.f32 %v3761_v18, %v4482_v34 }
 0xdb3   : > { %2496 = vmatpush.bf16.msrb.mxu2 %v3645_v51 }
 0xdb4   : > { %3523 = vmatmul.msk.bf16.vlgmr.msrb.gmra.mxu1 %vm1273_vm1, %v4397_v50  ;;  %v2504_v16 = vpack.c.bf16 %v2443_v19, %v2443_v19 }
 0xdb7   : > { %2497 = vmatpush.bf16.msrb.mxu2 %v3644_v5  ;;  %v3766_v5 = vld [vmem:[%s4200_s1 + $0x3] ss:$0 sm:$0xff] }
 0xdb9   : > { %v2444_v35 = vpop.f32.mrf.mxu0 }
 0xe11   : > { %v4484_v36 = vpop.f32.mrf.mxu1 }
 0xe12   : > { %v2243_v32 = vadd.f32 %v3762_v31, %v4484_v36  ;;  %v3638_v36 = vld [vmem:[%s4194_s4 + $0x30] sm:$0xff] }
 0xe19   : > { %v2241_v38 = vpop.f32.mrf.mxu1 }
 0xe21   : > { %v2347_v39 = vpop.f32.mrf.mxu1 }
 0xe22   : > { %v2351_v37 = vsel %vm4447_vm0, %v2347_v39, -1e+10 }
 0xe23   : > { %v2352_v40 = vsel %vm2176_vm3, %v2351_v37, -inf }
 0xe24   : > { %2353 = vmax.xlane.f32.xlu0 %v2352_v40 }
 0xe29   : > { %v2349_v41 = vpop.f32.mrf.mxu1 }
 0xe2a   : > { %v3639_v41 = vld [vmem:[%s4194_s4 + $0x38] sm:$0xff] }
 0xe31   : > { %v2470_v9 = vpop.f32.mrf.mxu1 }
 0xe32   : > { %v2471_v12 = vadd.f32 %v3763_v10, %v2470_v9 }
 0xe39   : > { %v2472_v13 = vpop.f32.mrf.mxu1 }
 0xe3a   : > { %v2473_v14 = vadd.f32 %v3763_v10, %v2472_v13 }
 0xe3c   : > { %v2505_v15 = vpack.c.bf16 %v2473_v14, %v2471_v12 }
 0xe3e   : > { %v2510_v11 = vsel %vm1348_vm2, %v2505_v15, 0  ;;  %v3765_v15 = vld [vmem:[%s4188_s22 + $0x3] ss:$0 sm:$0xff]  ;;  %s4810_s22 = sld [smem:[#allocation22_spill]] }
 0xe3f   : > { %2519 = vmatpush.bf16.xpose.msrb.mxu3 %v2510_v11 }
 0xe97   : > { %v2354_v44 = vpop.xlane.xlu0 %2353 }
 0xe98   : > { %v2355_v45 = vsub.f32 %v2351_v37, %v2354_v44 }
 0xe9a   : > { %v2356_v46 = vmul.f32 1.442695, %v2355_v45 }
 0xe9c   : > { %3798 = vpow2.f32 %v2356_v46 }
 0xea2   : > { %v3799_v47 = vpop.eup %3798 }
 0xea3   : > { %v2358_v48 = vsel %vm2176_vm3, %v3799_v47, 0.0 }
 0xea4   : > { %2359 = vadd.xlane.f32.xlu1 %v2358_v48 }
 0xf17   : > { %v2360_v52 = vpop.xlane.xlu1 %2359 }
 0xf18   : > { %3800 = vrcp.f32 %v2360_v52  ;;  %v2372_v57 = vand.u32 2147483648, %v2360_v52  ;;  %v2370_v59 = vand.u32 2147483647, %v2360_v52  ;;  %vm2366_vm11 = vweird.f32 %v2360_v52 }
 0xf1a   : > { %v2373_v61 = vor.u32 1.1754944e-38, %v2372_v57  ;;  %vm2371_vm13 = vcmp.eq.f32.partialorder %v2370_v59, 8.507059e+37 }
 0xf1e   : > { %v3801_v53 = vpop.eup %3800 }
 0xf1f   : > { %v2362_v55 = vmul.f32 %v3801_v53, %v2360_v52  ;;  %vm2367_vm10 = vweird.f32 %v3801_v53 }
 0xf20   : > { %vm2368_vm12 = vmor %vm2366_vm11, %vm2367_vm10  ;;  %vm2874_vm11 = vcmask 523264  }
 0xf21   : > { %v2363_v56 = vsub.f32 1.0, %v2362_v55 }
 0xf23   : > { %v2364_v58 = vmul.f32 %v3801_v53, %v2363_v56 }
 0xf25   : > { %v2365_v60 = vadd.f32 %v3801_v53, %v2364_v58 }
 0xf27   : > { %v2369_v62 = vsel %vm2368_vm12, %v3801_v53, %v2365_v60 }
 0xf28   : > { %v2374_v63 = vsel %vm2371_vm13, %v2373_v61, %v2369_v62 }
 0xf29   : > { %v4497_v0 = vmul.f32 %v3799_v47, %v2374_v63 }
 0xf2b   : > { %v2376_v2 = vpack.c.bf16 %v4497_v0, %v4497_v0 }
 0xf2d   : > { %3504 = vmatmul.msk.bf16.vlgmr.msra.gmra.mxu2 %vm2176_vm3, %v2376_v2 }
 0xf2e   : > { %2613 = vmatpush.bf16.msra.mxu2 %v3655_v1 }
 0xf32   : > { %2614 = vmatpush.bf16.msra.mxu2 %v3654_v3 }
 0xf3d   : > { %3532 = vmatmul.msk.bf16.vlgmr.msrb.gmra.mxu2 %vm1273_vm1, %v4397_v50 }
 0xf4d   : > { %3544 = vmatmul.msk.bf16.vlgmr.msra.gmra.mxu2 %vm1273_vm1, %v4430_v25 }
 0xfb0   : > { %v2393_v17 = vpop.f32.mrf.mxu2 }
 0xfb1   : > { %v2397_v6 = vpack.c.bf16 %v2393_v17, %v2393_v17 }
 0xfb3   : > { %3505 = vmatmul.msk.bf16.vlgmr.msra.gmra.mxu3 %vm1348_vm2, %v2397_v6  ;;  %v3647_v6 = vld [vmem:[%s4194_s4 + $0x78] sm:$0xff] }
 0xfb4   : > { %2641 = vmatpush.bf16.msra.mxu3 %v3639_v41 }
 0xfb8   : > { %v2395_v25 = vpop.f32.mrf.mxu2  ;;  %2642 = vmatpush.bf16.msra.mxu3 %v3638_v36 }
 0xfb9   : > { %v3646_v25 = vld [vmem:[%s4194_s4 + $0x70] sm:$0xff] }
 0xfc0   : > { %v2499_v27 = vpop.f32.mrf.mxu2 }
 0xfc1   : > { %v2500_v21 = vadd.f32 %v3764_v20, %v2499_v27 }
 0xfc3   : > { %3533 = vmatmul.msk.bf16.vlgmr.msrb.gmra.mxu3 %vm1348_vm2, %v2504_v16 }
 0xfc8   : > { %v2501_v23 = vpop.f32.mrf.mxu2 }
 0xfc9   : > { %v2502_v26 = vadd.f32 %v3764_v20, %v2501_v23 }
 0xfcb   : > { %v2551_v28 = vpack.c.bf16 %v2502_v26, %v2500_v21 }
 0xfcd   : > { %v2556_v42 = vsel %vm2206_vm4, %v2551_v28, 0  ;;  %v3767_v28 = vld [vmem:[%s4200_s1 + $0x7] ss:$0 sm:$0xff] }
 0xfce   : > { %2565 = vmatpush.bf16.msra.mxu0 %v2556_v42 }
 0xfd0   : > { %v2616_v29 = vpop.f32.mrf.mxu2 }
 0xfd1   : > { %v2617_v11 = vadd.f32 %v3765_v15, %v2616_v29 }
 0xfd2   : > { %2670 = vmatpush.bf16.msrb.mxu0 %v3647_v6 }
 0xfd3   : > { %3553 = vmatmul.msk.bf16.vlgmr.msra.gmra.mxu3 %vm1273_vm1, %v4397_v50  ;;  %v2678_v17 = vpack.c.bf16 %v2617_v11, %v2617_v11 }
 0xfd6   : > { %2671 = vmatpush.bf16.msrb.mxu0 %v3646_v25 }
 0xfd8   : > { %v2618_v30 = vpop.f32.mrf.mxu2 }
0x1036   : > { %v2413_v33 = vpop.f32.mrf.mxu3 }
0x1037   : > { %v4523_v34 = vadd.f32 %v2413_v33, %v2243_v32 }
0x103e   : > { %v2415_v35 = vpop.f32.mrf.mxu3 }
0x1046   : > { %v2521_v38 = vpop.f32.mrf.mxu3 }
0x1047   : > { %v2525_v39 = vsel %vm4447_vm0, %v2521_v38, -1e+10 }
0x1048   : > { %v2526_v37 = vsel %vm2176_vm3, %v2525_v39, -inf }
0x1049   : > { %2527 = vmax.xlane.f32.xlu2 %v2526_v37 }
0x104e   : > { %v2523_v40 = vpop.f32.mrf.mxu3 }
0x1056   : > { %v2644_v51 = vpop.f32.mrf.mxu3 }
0x1057   : > { %v2645_v53 = vadd.f32 %v3766_v5, %v2644_v51 }
0x105e   : > { %v2646_v55 = vpop.f32.mrf.mxu3 }
0x105f   : > { %v2647_v56 = vadd.f32 %v3766_v5, %v2646_v55 }
0x1061   : > { %v2679_v57 = vpack.c.bf16 %v2647_v56, %v2645_v53 }
0x1063   : > { %v2684_v58 = vsel %vm1348_vm2, %v2679_v57, 0 }
0x1064   : > { %2693 = vmatpush.bf16.xpose.msrb.mxu1 %v2684_v58 }
0x10bc   : > { %v2528_v44 = vpop.xlane.xlu2 %2527 }
0x10bd   : > { %v2529_v45 = vsub.f32 %v2525_v39, %v2528_v44  ;;  %v2055_v39 = vld [vmem:[%s4205_s24 + $0xc] sm:$0xf]  ;;  %s4811_s24 = sld [smem:[#allocation39_spill]] }
0x10be   : > { %v2750_v37 = vsel %vm1398_vm7, %v2055_v39, 0 }
0x10bf   : > { %v2530_v46 = vmul.f32 1.442695, %v2529_v45  ;;  %2759 = vmatpush.bf16.msrb.mxu3 %v2750_v37 }
0x10c1   : > { %3802 = vpow2.f32 %v2530_v46 }
0x10c3   : > { %s4812_s18 = scalar_lea.vmem %s4811_s24, %s4124_s0 }
0x10c7   : > { %v3803_v47 = vpop.eup %3802 }
0x10c8   : > { %v2532_v48 = vsel %vm2176_vm3, %v3803_v47, 0.0 }
0x10c9   : > { %2533 = vadd.xlane.f32.xlu0 %v2532_v48 }
0x113c   : > { %v2534_v52 = vpop.xlane.xlu0 %2533 }
0x113d   : > { %3804 = vrcp.f32 %v2534_v52  ;;  %v2546_v62 = vand.u32 2147483648, %v2534_v52  ;;  %v2544_v1 = vand.u32 2147483647, %v2534_v52  ;;  %vm2540_vm15 = vweird.f32 %v2534_v52 }
0x113f   : > { %v2547_v3 = vor.u32 1.1754944e-38, %v2546_v62  ;;  %vm2545_vm6 = vcmp.eq.f32.partialorder %v2544_v1, 8.507059e+37 }
0x1143   : > { %v3805_v59 = vpop.eup %3804 }
0x1144   : > { %v2536_v60 = vmul.f32 %v3805_v59, %v2534_v52  ;;  %vm2541_vm14 = vweird.f32 %v3805_v59 }
0x1145   : > { %vm2542_vm5 = vmor %vm2540_vm15, %vm2541_vm14 }
0x1146   : > { %v2537_v61 = vsub.f32 1.0, %v2536_v60 }
0x1148   : > { %v2538_v63 = vmul.f32 %v3805_v59, %v2537_v61 }
0x114a   : > { %v2539_v2 = vadd.f32 %v3805_v59, %v2538_v63 }
0x114c   : > { %v2543_v4 = vsel %vm2542_vm5, %v3805_v59, %v2539_v2 }
0x114d   : > { %v2548_v8 = vsel %vm2545_vm6, %v2547_v3, %v2543_v4  ;;  %v3657_v3 = vld [vmem:[%s4810_s22 + $0x8] sm:$0xff]  ;;  %v3656_v4 = vld [vmem:[%s4810_s22] sm:$0xff] }
0x114e   : > { %v4538_v9 = vmul.f32 %v3803_v47, %v2548_v8  ;;  %v3661_v8 = vld [vmem:[%s4232_s15 + $0x18] sm:$0xff] }
0x1150   : > { %v2550_v10 = vpack.c.bf16 %v4538_v9, %v4538_v9 }
0x1152   : > { %3534 = vmatmul.msk.bf16.vlgmr.msra.gmra.mxu0 %vm2176_vm3, %v2550_v10 }
0x1153   : > { %2829 = vmatpush.bf16.msra.mxu0 %v3657_v3 }
0x1157   : > { %2830 = vmatpush.bf16.msra.mxu0 %v3656_v4 }
0x1162   : > { %3562 = vmatmul.msk.bf16.vlgmr.msrb.gmra.mxu0 %vm1273_vm1, %v4397_v50 }
0x11cf   : > { %v2567_v12 = vpop.f32.mrf.mxu0 }
0x11d0   : > { %v2571_v13 = vpack.c.bf16 %v2567_v12, %v2567_v12  ;;  %v3660_v12 = vld [vmem:[%s4232_s15 + $0x10] sm:$0xff] }
0x11d2   : > { %3535 = vmatmul.msk.bf16.vlgmr.msra.gmra.mxu1 %vm1348_vm2, %v2571_v13 }
0x11d3   : > { %2882 = vmatpush.bf16.msra.mxu1 %v3661_v8 }
0x11d7   : > { %v2569_v14 = vpop.f32.mrf.mxu0  ;;  %2883 = vmatpush.bf16.msra.mxu1 %v3660_v12 }
0x11d8   : > { %v3659_v14 = vld [vmem:[%s4232_s15 + $0x8] sm:$0xff] }
0x11db   : > { %2884 = vmatpush.bf16.msra.mxu1 %v3659_v14 }
0x11df   : > { %v2673_v26 = vpop.f32.mrf.mxu0 }
0x11e0   : > { %v2674_v29 = vadd.f32 %v3767_v28, %v2673_v26 }
0x11e2   : > { %3563 = vmatmul.msk.bf16.vlgmr.msrb.gmra.mxu1 %vm1348_vm2, %v2678_v17 }
0x11e7   : > { %v2675_v31 = vpop.f32.mrf.mxu0 }
0x11e8   : > { %v2676_v33 = vadd.f32 %v3767_v28, %v2675_v31  ;;  %v3658_v28 = vld [vmem:[%s4232_s15] sm:$0xff] }
0x11e9   : > { %2885 = vmatpush.bf16.msra.mxu1 %v3658_v28 }
0x11ea   : > { %v2725_v35 = vpack.c.bf16 %v2676_v33, %v2674_v29  ;;  %v3770_v29 = vld [vmem:[%s4816_s30] ss:$0 sm:$0xff] }
0x11ec   : > { %v2730_v50 = vsel %vm2206_vm4, %v2725_v35, 0  ;;  %v3771_v35 = vld [vmem:[%s1151_s21] ss:$0 sm:$0xff] }
0x11ed   : > { %2739 = vmatpush.bf16.msrb.mxu2 %v2730_v50 }
0x124f   : > { %v2587_v18 = vpop.f32.mrf.mxu1 }
0x1250   : > { %v2591_v19 = vadd.f32 %v2587_v18, %v4523_v34 }
0x1257   : > { %v2589_v27 = vpop.f32.mrf.mxu1 }
0x125f   : > { %v2695_v16 = vpop.f32.mrf.mxu1 }
0x1260   : > { %v2699_v20 = vsel %vm4447_vm0, %v2695_v16, -1e+10  ;;  %v3769_v16 = vld [vmem:[%s4814_s2] ss:$0 sm:$0xff] }
0x1261   : > { %v2700_v21 = vsel %vm2176_vm3, %v2699_v20, -inf }
0x1262   : > { %2701 = vmax.xlane.f32.xlu1 %v2700_v21 }
0x1267   : > { %v2697_v23 = vpop.f32.mrf.mxu1 }
0x12d5   : > { %v2702_v30 = vpop.xlane.xlu1 %2701 }
0x12d6   : > { %v2703_v32 = vsub.f32 %v2699_v20, %v2702_v30 }
0x12d8   : > { %v2704_v34 = vmul.f32 1.442695, %v2703_v32 }
0x12da   : > { %3806 = vpow2.f32 %v2704_v34 }
0x12e0   : > { %v3807_v43 = vpop.eup %3806 }
0x12e1   : > { %v2706_v38 = vsel %vm2176_vm3, %v3807_v43, 0.0 }
0x12e2   : > { %2707 = vadd.xlane.f32.xlu2 %v2706_v38 }
0x1355   : > { %v2708_v40 = vpop.xlane.xlu2 %2707 }
0x1356   : > { %3808 = vrcp.f32 %v2708_v40  ;;  %v2720_v44 = vand.u32 2147483648, %v2708_v40  ;;  %v2718_v46 = vand.u32 2147483647, %v2708_v40  ;;  %vm2714_vm4 = vweird.f32 %v2708_v40 }
0x1358   : > { %v2721_v48 = vor.u32 1.1754944e-38, %v2720_v44  ;;  %vm2719_vm9 = vcmp.eq.f32.partialorder %v2718_v46, 8.507059e+37 }
0x135c   : > { %v3809_v41 = vpop.eup %3808 }
0x135d   : > { %v2710_v42 = vmul.f32 %v3809_v41, %v2708_v40  ;;  %vm2715_vm0 = vweird.f32 %v3809_v41 }
0x135e   : > { %vm2716_vm8 = vmor %vm2714_vm4, %vm2715_vm0 }
0x135f   : > { %v2711_v36 = vsub.f32 1.0, %v2710_v42 }
0x1361   : > { %v2712_v45 = vmul.f32 %v3809_v41, %v2711_v36 }
0x1363   : > { %v2713_v47 = vadd.f32 %v3809_v41, %v2712_v45 }
0x1365   : > { %v2717_v22 = vsel %vm2716_vm8, %v3809_v41, %v2713_v47 }
0x1366   : > { %v2722_v49 = vsel %vm2719_vm9, %v2721_v48, %v2717_v22 }
0x1367   : > { %v4559_v51 = vmul.f32 %v3807_v43, %v2722_v49 }
0x1369   : > { %v2724_v5 = vpack.c.bf16 %v4559_v51, %v4559_v51 }
0x136b   : > { %3564 = vmatmul.msk.bf16.vlgmr.msrb.gmra.mxu2 %vm2176_vm3, %v2724_v5 }
0x13ee   : > { %v2741_v52 = vpop.f32.mrf.mxu2 }
0x13ef   : > { %v2745_v53 = vpack.c.bf16 %v2741_v52, %v2741_v52 }
0x13f1   : > { %3565 = vmatmul.msk.bf16.vlgmr.msrb.gmra.mxu3 %vm1348_vm2, %v2745_v53 }
0x13f6   : > { %v2743_v55 = vpop.f32.mrf.mxu2 }
0x13f7   : > { %v3772_v55 = vld [vmem:[%s1154_s6] ss:$0 sm:$0xff] }
0x1474   : > { %v2761_v56 = vpop.f32.mrf.mxu3 }
0x1475   : > { %v2765_v57 = vadd.f32 %v2761_v56, %v2591_v19  ;;  %v3768_v19 = vld [vmem:[%s4812_s18] ss:$0 sm:$0xff] }
0x1477   : > { %v2766_v58 = vadd.f32 %v2765_v57, %v4426_v24 }
0x1479   : > { %v2769_v59 = vsel %vm1273_vm1, %v2766_v58, 0.0 }
0x147a   : > { %2770 = vadd.xlane.f32.xlu0 %v2769_v59 }
0x147c   : > { %v2763_v60 = vpop.f32.mrf.mxu3 }
0x14ed   : > { %v2771_v61 = vpop.xlane.xlu0 %2770 }
0x14ee   : > { %v2772_v62 = vmul.f32 %v2771_v61, %v4401_v54 }
0x14f0   : > { %v2773_v63 = vsub.f32 %v2766_v58, %v2772_v62 }
0x14f2   : > { %v2774_v1 = vmul.f32 %v2773_v63, %v2773_v63 }
0x14f4   : > { %v2775_v2 = vsel %vm1273_vm1, %v2774_v1, 0.0 }
0x14f5   : > { %2776 = vadd.xlane.f32.xlu1 %v2775_v2 }
0x1568   : > { %v2777_v24 = vpop.xlane.xlu1 %2776 }
0x1569   : > { %v2778_v10 = vmul.f32 %v2777_v24, %v4401_v54 }
0x156b   : > { %v2779_v13 = vadd.f32 1e-05, %v2778_v10 }
0x156d   : > { %3810 = vrsqrt.f32 %v2779_v13  ;;  %vm2786_vm7 = vweird.f32 %v2779_v13 }
0x1573   : > { %v3811_v15 = vpop.eup %3810 }
0x1574   : > { %v2781_v11 = vmul.f32 %v3811_v15, %v2779_v13  ;;  %vm2787_vm2 = vweird.f32 %v3811_v15 }
0x1575   : > { %vm2788_vm10 = vmor %vm2786_vm7, %vm2787_vm2 }
0x1576   : > { %v2782_v17 = vmul.f32 %v3811_v15, %v2781_v11 }
0x1578   : > { %v2783_v6 = vmul.f32 0.5, %v2782_v17 }
0x157a   : > { %v2784_v25 = vsub.f32 1.5, %v2783_v6 }
0x157c   : > { %v2785_v18 = vmul.f32 %v3811_v15, %v2784_v25 }
0x157e   : > { %v2789_v27 = vsel %vm2788_vm10, %v3811_v15, %v2785_v18 }
0x157f   : > { %v2790_v20 = vmul.f32 %v2789_v27, %v2773_v63 }
0x1581   : > { %v2794_v21 = vmul.f32 %v3768_v19, %v2790_v20 }
0x1583   : > { %v2798_v23 = vadd.f32 %v3769_v16, %v2794_v21 }
0x1585   : > { %v2804_v26 = vpack.c.bf16 %v2798_v23, %v2798_v23 }
0x1587   : > { %3574 = vmatmul.msk.bf16.vlgmr.msra.gmra.mxu0 %vm1273_vm1, %v2804_v26 }
0x1604   : > { %v2832_v30 = vpop.f32.mrf.mxu0 }
0x1605   : > { %v2833_v31 = vadd.f32 %v3770_v29, %v2832_v30 }
0x1607   : > { %v2836_v32 = vmax.f32 %v2833_v31, 0.0 }
0x1609   : > { %v2846_v33 = vpack.c.bf16 %v2836_v32, %v2836_v32 }
0x160b   : > { %3591 = vmatmul.msk.bf16.vlgmr.msra.gmra.mxu1 %vm2874_vm11, %v2846_v33 }
0x160c   : > { %v2834_v34 = vpop.f32.mrf.mxu0 }
0x1688   : > { %v2887_v50 = vpop.f32.mrf.mxu1 }
0x1689   : > { %v2888_v43 = vadd.f32 %v3771_v35, %v2887_v50 }
0x168b   : > { %v2891_v38 = vadd.f32 %v2888_v43, %v2798_v23 }
0x168d   : > { %v2894_v39 = vsel %vm1273_vm1, %v2891_v38, 0.0 }
0x168e   : > { %2895 = vadd.xlane.f32.xlu2 %v2894_v39 }
0x1690   : > { %v2889_v37 = vpop.f32.mrf.mxu1 }
0x1701   : > { %v2896_v40 = vpop.xlane.xlu2 %2895 }
0x1702   : > { %v2897_v41 = vmul.f32 %v2896_v40, %v4401_v54 }
0x1704   : > { %v2898_v42 = vsub.f32 %v2891_v38, %v2897_v41 }
0x1706   : > { %v2899_v36 = vmul.f32 %v2898_v42, %v2898_v42 }
0x1708   : > { %v2900_v44 = vsel %vm1273_vm1, %v2899_v36, 0.0 }
0x1709   : > { %2901 = vadd.xlane.f32.xlu0 %v2900_v44 }
0x177c   : > { %v2902_v45 = vpop.xlane.xlu0 %2901 }
0x177d   : > { %v2903_v46 = vmul.f32 %v2902_v45, %v4401_v54  ;;  %v3773_v54 = vld [vmem:[%s1157_s16] ss:$0 sm:$0xff] }
0x177f   : > { %v2904_v47 = vadd.f32 1e-05, %v2903_v46 }
0x1781   : > { %3812 = vrsqrt.f32 %v2904_v47  ;;  %vm2911_vm13 = vweird.f32 %v2904_v47 }
0x1787   : > { %v3813_v48 = vpop.eup %3812 }
0x1788   : > { %v2906_v22 = vmul.f32 %v3813_v48, %v2904_v47  ;;  %vm2912_vm12 = vweird.f32 %v3813_v48 }
0x1789   : > { %vm2913_vm14 = vmor %vm2911_vm13, %vm2912_vm12 }
0x178a   : > { %v2907_v49 = vmul.f32 %v3813_v48, %v2906_v22 }
0x178c   : > { %v2908_v5 = vmul.f32 0.5, %v2907_v49 }
0x178e   : > { %v2909_v52 = vsub.f32 1.5, %v2908_v5 }
0x1790   : > { %v2910_v53 = vmul.f32 %v3813_v48, %v2909_v52 }
0x1792   : > { %v2914_v56 = vsel %vm2913_vm14, %v3813_v48, %v2910_v53 }
0x1793   : > { %v2915_v57 = vmul.f32 %v2914_v56, %v2898_v42 }
0x1795   : > { %v2919_v58 = vmul.f32 %v3772_v55, %v2915_v57  ;;  %2928 = sbr.rel (%p3592_p1) target bundleno = 6047 (0x179f), region = 124 }
0x1797   : > { %v2923_v59 = vadd.f32 %v3773_v54, %v2919_v58 }
0x1799   : > { %2924 = vst.msk [vmem:[%s4251_s11] sm:$0xff] %vm1273_vm1, %v2923_v59 }
0x179a   : > { %v2929_v60 = vsel %vm2176_vm3, %v4462_v7, 0.0  ;;  %v2931_v61 = vsel %vm2176_vm3, %v4497_v0, 0.0  ;;  %v2934_v62 = vsel %vm2176_vm3, %v4538_v9, 0.0  ;;  %v2937_v63 = vsel %vm2176_vm3, %v4559_v51, 0.0 }
0x179b   : > { %2930 = vst [vmem:[%s4254_s14] sm:$0xff] %v2929_v60 }
0x179c   : > { %3593 = vst [vmem:[%s4254_s14 + $0x8] sm:$0xff] %v2931_v61 }
0x179d   : > { %3594 = vst [vmem:[%s4254_s14 + $0x10] sm:$0xff] %v2934_v62 }
0x179e   : > { %3595 = vst [vmem:[%s4254_s14 + $0x18] sm:$0xff] %v2937_v63 }
0x179f PF: > { %s4821_s11 = sld [smem:[#allocation9_spill]]  ;;  %s2960_s1 = sshll.u32 %s4254_s14, 4  ;;  %s2961_s1 = int_to_ptr.vmem [resolvable:$true] %s2960_s1 }
0x17a0   : > { %s4822_s16 = sld [smem:[#allocation6_spill]] }
0x17a1   : > { %s4824_s29 = sld [smem:[#allocation48_spill]] }
0x17a5   : > { %s3662_s6 = sshll.u32 %s4821_s11, 5 }
0x17a6   : > { %s4826_s18 = sand.u32 1, %s4822_s16  }
0x17a7   : > { %s4825_s22 = smov %s4824_s29  ;;  %s2959_s4 = scalar_lea.hbm %s4824_s29, %s3662_s6 }
0x17a8   : > { %s2962_s24 = sshll.u32 %s2959_s4, 4  ;;  %s2945_s8 = scalar_lea.sflag [#allocation3], %s4826_s18  ;;  %s2963_s24 = int_to_ptr.hbm [resolvable:$true] %s2962_s24 }
0x17a9   : > { %s3828_s26 = sshra.s32 %s2963_s24, 4  ;;  %s3834_s27 = scalar_lea.hbm %s4825_s22, 64  ;;  %s3829_s26 = int_to_ptr.hbm [resolvable:$true] %s3828_s26 }
0x17aa   : > { %s3830_s9 = scalar_lea.hbm %s3829_s26, 32  ;;  %p3835_p6 = scmp.lt.s32.totalorder %s3829_s26, %s4825_s22 }
0x17ab   : > { %p3831_p2 = scmp.ne.s32.totalorder %s3829_s26, %s3830_s9  ;;  %p3836_p7 = scmp.lt.s32.totalorder %s3834_s27, %s3830_s9 }
0x17ad   : > { %p3832_p4 = pnand %p3831_p2, %p4093_p3  ;;  %p3837_p8 = por %p3836_p7, %p3835_p6 }
0x17af   : > { %p3833_p5 = pneg %p3832_p4 }
0x17b1   : > { %p3838_p10 = pnand %p3837_p8, %p3833_p5 }
0x17b3   : > { %3841 = shalt.err (!%p3838_p10)
}
0x17b4   : > { %s3912_s14 = smov 128   ;;  %s3913_s19 = smov 8  }
0x17b5   : > { %3665 = dma.vmem_to_hbm [thread:$0]  (%p4093_p3), %s2961_s1, 512, %s2963_s24, %s2945_s8, %s3912_s14, %s3912_s14, %s3913_s19  }
0x17b6 PF: > { %s4827_s23 = sld [smem:[#allocation12_spill]] }
0x17b7   : > { %s4828_s10 = sld [smem:[#allocation5_spill]] }
0x17bc   : > { %p3671_p11 = scmp.ge.s32.totalorder %s4827_s23, 2 }
0x17bd   : > { %s2984_s21 = sand.u32 1, %s4828_s10  }
0x17be   : > { %p3668_p12 = pnand %p3671_p11, %p4103_p9  ;;  %s2985_s13 = scalar_lea.sflag [#allocation3], %s2984_s21 }
0x17c0   : > { %p3669_p13 = pneg %p3668_p12 }
0x17c2   : > { %3875 = dma.done.wait (%p3669_p13), %s2985_s13, 512  }
0x17c3   : > { %3877 = vsyncadd (%p3669_p13), %s2985_s13, 4294966784  ;;  %s39_s1 = sadd.s32 1, %s4827_s23   ;;  %s4830_s29 = sld [smem:[#allocation6_spill]] }
0x17c4   : > { %p36_p0 = scmp.ge.s32.totalorder %s39_s1, 6   ;;  %s4831_s2 = sld [smem:[#allocation7_spill]] }
0x17c5   : > { %s4832_s6 = sld [smem:[#allocation17_spill]] }
0x17c6   : > { %s4833_s30 = sld [smem:[#allocation10_spill]]  ;;  %38 = sbr.rel (!%p36_p0) target bundleno = 32 (0x20), region = 243 }
0x17c7   : > { %s4834_s7 = sld [smem:[#allocation11_spill]] }
0x17c8   : > { %s4835_s3 = sld [smem:[#allocation13_spill]] }
0x17c9   : > { %s4836_s26 = sld [smem:[#allocation15_spill]] }
0x17cb   :  { %2991 = vsyncpa [#allocation3], 1 }
0x17cc   :  { %2993 = vsyncpa [#allocation3 + $0x1], 1 }

</bundles_post_ra>
